<compile_context>
chip_gen: v7x
topology: tpu7x:2x2x1
jax: 0.10.0
libtpu: 0.0.40
codegen_flags: <defaults>
</compile_context>

<pallas_src>
import functools

import jax
import jax.numpy as jnp
from jax.experimental import pallas as pl
from jax.experimental.pallas import tpu as pltpu

HID = 512  # fixed by the nn.Linear sizes in the module


def _vmem():
    return pl.BlockSpec(memory_space=pltpu.MemorySpace.VMEM)


# ----------------------------------------------------------------------------
# Single fused kernel: subnets -> head MLPs -> global finalize -> scalar
# ----------------------------------------------------------------------------
def fused_kernel(x01_ref, x2_ref, x3_ref,
                 spq_w_ref, spq_b_ref, tpq_w_ref, tpq_b_ref, vdp_w_ref, vdp_b_ref,
                 whc_ref, whs_ref, sc_b1_ref, sc_w2_ref,
                 o_w1_ref, o_b1_ref, o_w2_ref,
                 v_w1_ref, v_b1_ref, v_w2_ref,
                 sb_ref,              # SMEM (3,): [sc_fc2.b, o_fc2.b, vdp_fc2.b]
                 out_ref,             # (1, 1) f32
                 *, patches, ppf, kfn):
    P = patches
    f32 = jnp.float32
    bf16 = jnp.bfloat16

    # ---- subnet stand-ins: relu(x @ W + b); bf16 MXU operands, f32 accumulate
    # x[0] and x[1] share spq weights -> one stacked (2P, F) matmul.
    h01 = jnp.dot(x01_ref[...].astype(bf16), spq_w_ref[...],
                  preferred_element_type=f32)
    h01 = jnp.maximum(h01 + spq_b_ref[...], 0.0)              # (2P, 512)
    hs = h01[0:P, :]
    hc = h01[P:2 * P, :]

    ho = jnp.maximum(
        jnp.dot(x2_ref[...].astype(bf16), tpq_w_ref[...],
                preferred_element_type=f32) + tpq_b_ref[...], 0.0)
    hv = jnp.maximum(
        jnp.dot(x3_ref[...].astype(bf16), vdp_w_ref[...],
                preferred_element_type=f32) + vdp_b_ref[...], 0.0)

    # ---- sc branch: folded concat-matmul
    #   cat([hc-hs, hc, hs]) @ W1 == hc @ (W1a+W1b) + hs @ (W1c-W1a)
    h1 = (jnp.dot(hc.astype(bf16), whc_ref[...], preferred_element_type=f32)
          + jnp.dot(hs.astype(bf16), whs_ref[...], preferred_element_type=f32))
    h1 = jnp.maximum(h1 + sc_b1_ref[...], 0.0)
    spq = jnp.sum(h1 * sc_w2_ref[...], axis=1, keepdims=True) + sb_ref[0]   # (P,1)

    # ---- o branch
    h2 = jnp.maximum(
        jnp.dot(ho.astype(bf16), o_w1_ref[...],
                preferred_element_type=f32) + o_b1_ref[...], 0.0)
    tpq = jnp.sum(h2 * o_w2_ref[...], axis=1, keepdims=True) + sb_ref[1]    # (P,1)

    # ---- vdp branch
    h3 = jnp.maximum(
        jnp.dot(hv.astype(bf16), v_w1_ref[...],
                preferred_element_type=f32) + v_b1_ref[...], 0.0)
    hv2 = jnp.sum(h3 * v_w2_ref[...], axis=1, keepdims=True) + sb_ref[2]    # (P,1)

    # ---- finalize (module semantics: no epsilon/sign guard on maxpq)
    stpq = spq * tpq                                                        # (P,1)
    maxpq = jnp.max(stpq, axis=(0, 1), keepdims=True)
    stpsur = jax.nn.sigmoid(stpq * pl.reciprocal(maxpq, approx=True) * 12.0 - 6.0)

    hvs = hv2 - jnp.min(hv2, axis=(0, 1), keepdims=True)                    # (P,1)

    # per-frame aggregation without a (P,1)->(K,Pf) relayout: membership matmul
    k_idx = jax.lax.broadcasted_iota(jnp.int32, (kfn, P), 0)
    p_idx = jax.lax.broadcasted_iota(jnp.int32, (kfn, P), 1)
    lower = k_idx * ppf
    member = jnp.logical_and(p_idx >= lower, p_idx < lower + ppf).astype(f32)

    num = jnp.dot(member, stpsur * hvs, preferred_element_type=f32)         # (K,1)
    den = jnp.dot(member, hvs, preferred_element_type=f32) + 1e-10          # (K,1)
    frame_sur = num * pl.reciprocal(den, approx=True)                       # (K,1)

    out_ref[...] = jnp.mean(frame_sur, axis=(0, 1), keepdims=True)          # (1,1)


# ----------------------------------------------------------------------------
# Full forward pass
# ----------------------------------------------------------------------------
def vdp_weight_stsur_forward(x, params, patch_per_frame, key_frame_nb):
    P = patch_per_frame * key_frame_nb
    bf16 = jnp.bfloat16
    f32 = jnp.float32

    # flatten patches (row-major, free); stack shared-weight spq inputs
    x0 = x[0].reshape(P, -1)
    x1 = x[1].reshape(P, -1)
    x01 = jnp.concatenate([x0, x1], axis=0)          # (2P, F)
    x2 = x[2].reshape(P, -1)
    x3 = x[3].reshape(P, -1)

    # fold concat-matmul weights on the host (one-time):
    w1 = params["sc_fc1_w"]                          # (3*HID, HID), (in, out)
    w_hc = (w1[0:HID] + w1[HID:2 * HID]).astype(bf16)
    w_hs = (w1[2 * HID:3 * HID] - w1[0:HID]).astype(bf16)

    scalar_biases = jnp.stack([params["sc_fc2_b"],
                               params["o_fc2_b"],
                               params["vdp_fc2_b"]]).astype(f32)

    kernel = functools.partial(fused_kernel,
                               patches=P, ppf=patch_per_frame, kfn=key_frame_nb)

    out = pl.pallas_call(
        kernel,
        out_shape=jax.ShapeDtypeStruct((1, 1), jnp.float32),
        in_specs=[_vmem()] * 19
                 + [pl.BlockSpec(memory_space=pltpu.MemorySpace.SMEM)],
        out_specs=_vmem(),
    )(x01, x2, x3,
      params["spq_w"].astype(bf16), params["spq_b"].reshape(1, HID).astype(f32),
      params["tpq_w"].astype(bf16), params["tpq_b"].reshape(1, HID).astype(f32),
      params["vdp_w"].astype(bf16), params["vdp_b"].reshape(1, HID).astype(f32),
      w_hc, w_hs,
      params["sc_fc1_b"].reshape(1, HID).astype(f32),
      params["sc_fc2_w"].reshape(1, HID).astype(f32),
      params["o_fc1_w"].astype(bf16), params["o_fc1_b"].reshape(1, HID).astype(f32),
      params["o_fc2_w"].reshape(1, HID).astype(f32),
      params["vdp_fc1_w"].astype(bf16), params["vdp_fc1_b"].reshape(1, HID).astype(f32),
      params["vdp_fc2_w"].reshape(1, HID).astype(f32),
      scalar_biases)
    return out[0, 0]


# ----------------------------------------------------------------------------
# Deterministic parameter init (synthetic — shapes dictated by the module)
# ----------------------------------------------------------------------------
def init_params(key, feat_dim):
    ks = jax.random.split(key, 16)

    def w(k, shape, scale=0.02):
        return jax.random.normal(k, shape, jnp.float32) * scale

    return {
        # subnet stand-ins
        "spq_w": w(ks[0], (feat_dim, HID)), "spq_b": w(ks[1], (HID,), 0.01),
        "tpq_w": w(ks[2], (feat_dim, HID)), "tpq_b": w(ks[3], (HID,), 0.01),
        "vdp_w": w(ks[4], (feat_dim, HID)), "vdp_b": w(ks[5], (HID,), 0.01),
        # head (weights stored as (in, out); torch Linear is x @ W.T + b)
        "sc_fc1_w": w(ks[6], (3 * HID, HID)), "sc_fc1_b": w(ks[7], (HID,), 0.01),
        "sc_fc2_w": w(ks[8], (HID,)),         "sc_fc2_b": w(ks[9], (), 0.01),
        "o_fc1_w":  w(ks[10], (HID, HID)),    "o_fc1_b":  w(ks[11], (HID,), 0.01),
        "o_fc2_w":  w(ks[12], (HID,)),        "o_fc2_b":  w(ks[13], (), 0.01),
        "vdp_fc1_w": w(ks[14], (HID, HID)),   "vdp_fc1_b": w(ks[15], (HID,), 0.01),
        "vdp_fc2_w": w(jax.random.fold_in(key, 100), (HID,)),
        "vdp_fc2_b": w(jax.random.fold_in(key, 101), (), 0.01),
    }


if __name__ == "__main__":
    PATCH_PER_FRAME = 8
    KEY_FRAME_NB = 4
    PATCHES = PATCH_PER_FRAME * KEY_FRAME_NB
    C, H, W = 4, 8, 8
    FEAT = C * H * W

    key = jax.random.PRNGKey(0)
    kx, kp = jax.random.split(key)
    # x is the tuple of 4 per-patch image stacks fed to the subnets
    xs = jax.random.normal(kx, (4, PATCHES, C, H, W), jnp.float32)

    params = init_params(kp, FEAT)

    out = vdp_weight_stsur_forward(xs, params, PATCH_PER_FRAME, KEY_FRAME_NB)
    out = jax.block_until_ready(out)
    assert out.shape == () and jnp.isfinite(out)
    print("KERNEL_OK")
</pallas_src>

<mosaic_0001>
module attributes {stable_mosaic.version = 11 : i64} {
  func.func @fused_kernel(%arg0: memref<64x256xf32, #tpu.memory_space<vmem>>, %arg1: memref<32x256xf32, #tpu.memory_space<vmem>>, %arg2: memref<32x256xf32, #tpu.memory_space<vmem>>, %arg3: memref<256x512xbf16, #tpu.memory_space<vmem>>, %arg4: memref<1x512xf32, #tpu.memory_space<vmem>>, %arg5: memref<256x512xbf16, #tpu.memory_space<vmem>>, %arg6: memref<1x512xf32, #tpu.memory_space<vmem>>, %arg7: memref<256x512xbf16, #tpu.memory_space<vmem>>, %arg8: memref<1x512xf32, #tpu.memory_space<vmem>>, %arg9: memref<512x512xbf16, #tpu.memory_space<vmem>>, %arg10: memref<512x512xbf16, #tpu.memory_space<vmem>>, %arg11: memref<1x512xf32, #tpu.memory_space<vmem>>, %arg12: memref<1x512xf32, #tpu.memory_space<vmem>>, %arg13: memref<512x512xbf16, #tpu.memory_space<vmem>>, %arg14: memref<1x512xf32, #tpu.memory_space<vmem>>, %arg15: memref<1x512xf32, #tpu.memory_space<vmem>>, %arg16: memref<512x512xbf16, #tpu.memory_space<vmem>>, %arg17: memref<1x512xf32, #tpu.memory_space<vmem>>, %arg18: memref<1x512xf32, #tpu.memory_space<vmem>>, %arg19: memref<3xf32, #tpu.memory_space<smem>>, %arg20: memref<1x1xf32, #tpu.memory_space<vmem>>) attributes {dimension_semantics = [], scalar_prefetch = 0 : i64, scratch_operands = 0 : i64, tpu.core_type = #tpu.core_type<tc>} {
    %c0 = arith.constant 0 : index
    %c0_0 = arith.constant 0 : index
    %0 = vector.load %arg0[%c0, %c0_0] : memref<64x256xf32, #tpu.memory_space<vmem>>, vector<64x256xf32>
    %1 = arith.truncf %0 : vector<64x256xf32> to vector<64x256xbf16>
    %c0_1 = arith.constant 0 : index
    %c0_2 = arith.constant 0 : index
    %2 = vector.load %arg3[%c0_1, %c0_2] : memref<256x512xbf16, #tpu.memory_space<vmem>>, vector<256x512xbf16>
    %cst = arith.constant dense<0.000000e+00> : vector<64x512xf32>
    %3 = tpu.matmul %1, %2, %cst {dimension_numbers = #tpu.dot_dimension_numbers<[1], [0], [0], [1], [0, 0, 1, 1], [], []>} : vector<64x256xbf16>, vector<256x512xbf16>, vector<64x512xf32> -> vector<64x512xf32>
    %c0_3 = arith.constant 0 : index
    %c0_4 = arith.constant 0 : index
    %4 = vector.load %arg4[%c0_3, %c0_4] : memref<1x512xf32, #tpu.memory_space<vmem>>, vector<1x512xf32>
    %5 = vector.broadcast %4 : vector<1x512xf32> to vector<64x512xf32>
    %6 = arith.addf %3, %5 : vector<64x512xf32>
    %cst_5 = arith.constant 0.000000e+00 : f32
    %7 = vector.broadcast %cst_5 : f32 to vector<64x512xf32>
    %8 = arith.maximumf %6, %7 : vector<64x512xf32>
    %9 = vector.extract_strided_slice %8 {offsets = [0, 0], sizes = [32, 512], strides = [1, 1]} : vector<64x512xf32> to vector<32x512xf32>
    %10 = vector.extract_strided_slice %8 {offsets = [32, 0], sizes = [32, 512], strides = [1, 1]} : vector<64x512xf32> to vector<32x512xf32>
    %c0_6 = arith.constant 0 : index
    %c0_7 = arith.constant 0 : index
    %11 = vector.load %arg1[%c0_6, %c0_7] : memref<32x256xf32, #tpu.memory_space<vmem>>, vector<32x256xf32>
    %12 = arith.truncf %11 : vector<32x256xf32> to vector<32x256xbf16>
    %c0_8 = arith.constant 0 : index
    %c0_9 = arith.constant 0 : index
    %13 = vector.load %arg5[%c0_8, %c0_9] : memref<256x512xbf16, #tpu.memory_space<vmem>>, vector<256x512xbf16>
    %cst_10 = arith.constant dense<0.000000e+00> : vector<32x512xf32>
    %14 = tpu.matmul %12, %13, %cst_10 {dimension_numbers = #tpu.dot_dimension_numbers<[1], [0], [0], [1], [0, 0, 1, 1], [], []>} : vector<32x256xbf16>, vector<256x512xbf16>, vector<32x512xf32> -> vector<32x512xf32>
    %c0_11 = arith.constant 0 : index
    %c0_12 = arith.constant 0 : index
    %15 = vector.load %arg6[%c0_11, %c0_12] : memref<1x512xf32, #tpu.memory_space<vmem>>, vector<1x512xf32>
    %16 = vector.broadcast %15 : vector<1x512xf32> to vector<32x512xf32>
    %17 = arith.addf %14, %16 : vector<32x512xf32>
    %cst_13 = arith.constant 0.000000e+00 : f32
    %18 = vector.broadcast %cst_13 : f32 to vector<32x512xf32>
    %19 = arith.maximumf %17, %18 : vector<32x512xf32>
    %c0_14 = arith.constant 0 : index
    %c0_15 = arith.constant 0 : index
    %20 = vector.load %arg2[%c0_14, %c0_15] : memref<32x256xf32, #tpu.memory_space<vmem>>, vector<32x256xf32>
    %21 = arith.truncf %20 : vector<32x256xf32> to vector<32x256xbf16>
    %c0_16 = arith.constant 0 : index
    %c0_17 = arith.constant 0 : index
    %22 = vector.load %arg7[%c0_16, %c0_17] : memref<256x512xbf16, #tpu.memory_space<vmem>>, vector<256x512xbf16>
    %cst_18 = arith.constant dense<0.000000e+00> : vector<32x512xf32>
    %23 = tpu.matmul %21, %22, %cst_18 {dimension_numbers = #tpu.dot_dimension_numbers<[1], [0], [0], [1], [0, 0, 1, 1], [], []>} : vector<32x256xbf16>, vector<256x512xbf16>, vector<32x512xf32> -> vector<32x512xf32>
    %c0_19 = arith.constant 0 : index
    %c0_20 = arith.constant 0 : index
    %24 = vector.load %arg8[%c0_19, %c0_20] : memref<1x512xf32, #tpu.memory_space<vmem>>, vector<1x512xf32>
    %25 = vector.broadcast %24 : vector<1x512xf32> to vector<32x512xf32>
    %26 = arith.addf %23, %25 : vector<32x512xf32>
    %cst_21 = arith.constant 0.000000e+00 : f32
    %27 = vector.broadcast %cst_21 : f32 to vector<32x512xf32>
    %28 = arith.maximumf %26, %27 : vector<32x512xf32>
    %29 = arith.truncf %10 : vector<32x512xf32> to vector<32x512xbf16>
    %c0_22 = arith.constant 0 : index
    %c0_23 = arith.constant 0 : index
    %30 = vector.load %arg9[%c0_22, %c0_23] : memref<512x512xbf16, #tpu.memory_space<vmem>>, vector<512x512xbf16>
    %cst_24 = arith.constant dense<0.000000e+00> : vector<32x512xf32>
    %31 = tpu.matmul %29, %30, %cst_24 {dimension_numbers = #tpu.dot_dimension_numbers<[1], [0], [0], [1], [0, 0, 1, 1], [], []>} : vector<32x512xbf16>, vector<512x512xbf16>, vector<32x512xf32> -> vector<32x512xf32>
    %32 = arith.truncf %9 : vector<32x512xf32> to vector<32x512xbf16>
    %c0_25 = arith.constant 0 : index
    %c0_26 = arith.constant 0 : index
    %33 = vector.load %arg10[%c0_25, %c0_26] : memref<512x512xbf16, #tpu.memory_space<vmem>>, vector<512x512xbf16>
    %cst_27 = arith.constant dense<0.000000e+00> : vector<32x512xf32>
    %34 = tpu.matmul %32, %33, %cst_27 {dimension_numbers = #tpu.dot_dimension_numbers<[1], [0], [0], [1], [0, 0, 1, 1], [], []>} : vector<32x512xbf16>, vector<512x512xbf16>, vector<32x512xf32> -> vector<32x512xf32>
    %35 = arith.addf %31, %34 : vector<32x512xf32>
    %c0_28 = arith.constant 0 : index
    %c0_29 = arith.constant 0 : index
    %36 = vector.load %arg11[%c0_28, %c0_29] : memref<1x512xf32, #tpu.memory_space<vmem>>, vector<1x512xf32>
    %37 = vector.broadcast %36 : vector<1x512xf32> to vector<32x512xf32>
    %38 = arith.addf %35, %37 : vector<32x512xf32>
    %cst_30 = arith.constant 0.000000e+00 : f32
    %39 = vector.broadcast %cst_30 : f32 to vector<32x512xf32>
    %40 = arith.maximumf %38, %39 : vector<32x512xf32>
    %c0_31 = arith.constant 0 : index
    %c0_32 = arith.constant 0 : index
    %41 = vector.load %arg12[%c0_31, %c0_32] : memref<1x512xf32, #tpu.memory_space<vmem>>, vector<1x512xf32>
    %42 = vector.broadcast %41 : vector<1x512xf32> to vector<32x512xf32>
    %43 = arith.mulf %40, %42 : vector<32x512xf32>
    %cst_33 = arith.constant dense<0.000000e+00> : vector<32xf32>
    %44 = vector.multi_reduction <add>, %43, %cst_33 [1] : vector<32x512xf32> to vector<32xf32>
    %45 = vector.shape_cast %44 : vector<32xf32> to vector<32x1xf32>
    %c0_34 = arith.constant 0 : index
    %46 = memref.load %arg19[%c0_34] : memref<3xf32, #tpu.memory_space<smem>>
    %47 = vector.broadcast %46 : f32 to vector<32x1xf32>
    %48 = arith.addf %45, %47 : vector<32x1xf32>
    %49 = arith.truncf %19 : vector<32x512xf32> to vector<32x512xbf16>
    %c0_35 = arith.constant 0 : index
    %c0_36 = arith.constant 0 : index
    %50 = vector.load %arg13[%c0_35, %c0_36] : memref<512x512xbf16, #tpu.memory_space<vmem>>, vector<512x512xbf16>
    %cst_37 = arith.constant dense<0.000000e+00> : vector<32x512xf32>
    %51 = tpu.matmul %49, %50, %cst_37 {dimension_numbers = #tpu.dot_dimension_numbers<[1], [0], [0], [1], [0, 0, 1, 1], [], []>} : vector<32x512xbf16>, vector<512x512xbf16>, vector<32x512xf32> -> vector<32x512xf32>
    %c0_38 = arith.constant 0 : index
    %c0_39 = arith.constant 0 : index
    %52 = vector.load %arg14[%c0_38, %c0_39] : memref<1x512xf32, #tpu.memory_space<vmem>>, vector<1x512xf32>
    %53 = vector.broadcast %52 : vector<1x512xf32> to vector<32x512xf32>
    %54 = arith.addf %51, %53 : vector<32x512xf32>
    %cst_40 = arith.constant 0.000000e+00 : f32
    %55 = vector.broadcast %cst_40 : f32 to vector<32x512xf32>
    %56 = arith.maximumf %54, %55 : vector<32x512xf32>
    %c0_41 = arith.constant 0 : index
    %c0_42 = arith.constant 0 : index
    %57 = vector.load %arg15[%c0_41, %c0_42] : memref<1x512xf32, #tpu.memory_space<vmem>>, vector<1x512xf32>
    %58 = vector.broadcast %57 : vector<1x512xf32> to vector<32x512xf32>
    %59 = arith.mulf %56, %58 : vector<32x512xf32>
    %cst_43 = arith.constant dense<0.000000e+00> : vector<32xf32>
    %60 = vector.multi_reduction <add>, %59, %cst_43 [1] : vector<32x512xf32> to vector<32xf32>
    %61 = vector.shape_cast %60 : vector<32xf32> to vector<32x1xf32>
    %c1 = arith.constant 1 : index
    %62 = memref.load %arg19[%c1] : memref<3xf32, #tpu.memory_space<smem>>
    %63 = vector.broadcast %62 : f32 to vector<32x1xf32>
    %64 = arith.addf %61, %63 : vector<32x1xf32>
    %65 = arith.truncf %28 : vector<32x512xf32> to vector<32x512xbf16>
    %c0_44 = arith.constant 0 : index
    %c0_45 = arith.constant 0 : index
    %66 = vector.load %arg16[%c0_44, %c0_45] : memref<512x512xbf16, #tpu.memory_space<vmem>>, vector<512x512xbf16>
    %cst_46 = arith.constant dense<0.000000e+00> : vector<32x512xf32>
    %67 = tpu.matmul %65, %66, %cst_46 {dimension_numbers = #tpu.dot_dimension_numbers<[1], [0], [0], [1], [0, 0, 1, 1], [], []>} : vector<32x512xbf16>, vector<512x512xbf16>, vector<32x512xf32> -> vector<32x512xf32>
    %c0_47 = arith.constant 0 : index
    %c0_48 = arith.constant 0 : index
    %68 = vector.load %arg17[%c0_47, %c0_48] : memref<1x512xf32, #tpu.memory_space<vmem>>, vector<1x512xf32>
    %69 = vector.broadcast %68 : vector<1x512xf32> to vector<32x512xf32>
    %70 = arith.addf %67, %69 : vector<32x512xf32>
    %cst_49 = arith.constant 0.000000e+00 : f32
    %71 = vector.broadcast %cst_49 : f32 to vector<32x512xf32>
    %72 = arith.maximumf %70, %71 : vector<32x512xf32>
    %c0_50 = arith.constant 0 : index
    %c0_51 = arith.constant 0 : index
    %73 = vector.load %arg18[%c0_50, %c0_51] : memref<1x512xf32, #tpu.memory_space<vmem>>, vector<1x512xf32>
    %74 = vector.broadcast %73 : vector<1x512xf32> to vector<32x512xf32>
    %75 = arith.mulf %72, %74 : vector<32x512xf32>
    %cst_52 = arith.constant dense<0.000000e+00> : vector<32xf32>
    %76 = vector.multi_reduction <add>, %75, %cst_52 [1] : vector<32x512xf32> to vector<32xf32>
    %77 = vector.shape_cast %76 : vector<32xf32> to vector<32x1xf32>
    %c2 = arith.constant 2 : index
    %78 = memref.load %arg19[%c2] : memref<3xf32, #tpu.memory_space<smem>>
    %79 = vector.broadcast %78 : f32 to vector<32x1xf32>
    %80 = arith.addf %77, %79 : vector<32x1xf32>
    %81 = arith.mulf %48, %64 : vector<32x1xf32>
    %82 = vector.shape_cast %81 : vector<32x1xf32> to vector<1x32x1xf32>
    %cst_53 = arith.constant dense<0xFF800000> : vector<1xf32>
    %83 = vector.multi_reduction <maximumf>, %82, %cst_53 [1, 2] : vector<1x32x1xf32> to vector<1xf32>
    %84 = vector.shape_cast %83 : vector<1xf32> to vector<1x1x1xf32>
    %85 = vector.extract %84[0, 0, 0] : f32 from vector<1x1x1xf32>
    %86 = vector.broadcast %85 : f32 to vector<1x1xf32>
    %87 = tpu.reciprocal %86 {approx = true} : vector<1x1xf32> -> vector<1x1xf32>
    %88 = vector.broadcast %87 : vector<1x1xf32> to vector<32x1xf32>
    %89 = arith.mulf %81, %88 : vector<32x1xf32>
    %cst_54 = arith.constant 1.200000e+01 : f32
    %90 = vector.broadcast %cst_54 : f32 to vector<32x1xf32>
    %91 = arith.mulf %89, %90 : vector<32x1xf32>
    %cst_55 = arith.constant 6.000000e+00 : f32
    %92 = vector.broadcast %cst_55 : f32 to vector<32x1xf32>
    %93 = arith.subf %91, %92 : vector<32x1xf32>
    %94 = arith.negf %93 : vector<32x1xf32>
    %95 = math.exp %94 : vector<32x1xf32>
    %cst_56 = arith.constant 1.000000e+00 : f32
    %96 = vector.broadcast %cst_56 : f32 to vector<32x1xf32>
    %97 = arith.addf %96, %95 : vector<32x1xf32>
    %98 = arith.divf %96, %97 : vector<32x1xf32>
    %99 = vector.shape_cast %80 : vector<32x1xf32> to vector<1x32x1xf32>
    %cst_57 = arith.constant dense<0x7F800000> : vector<1xf32>
    %100 = vector.multi_reduction <minimumf>, %99, %cst_57 [1, 2] : vector<1x32x1xf32> to vector<1xf32>
    %101 = vector.shape_cast %100 : vector<1xf32> to vector<1x1x1xf32>
    %102 = vector.extract %101[0, 0, 0] : f32 from vector<1x1x1xf32>
    %103 = vector.broadcast %102 : f32 to vector<1x1xf32>
    %104 = vector.broadcast %103 : vector<1x1xf32> to vector<32x1xf32>
    %105 = arith.subf %80, %104 : vector<32x1xf32>
    %106 = tpu.iota {dimensions = array<i32: 0>} : vector<4x32xi32>
    %107 = tpu.iota {dimensions = array<i32: 1>} : vector<4x32xi32>
    %c8_i32 = arith.constant 8 : i32
    %108 = vector.broadcast %c8_i32 : i32 to vector<4x32xi32>
    %109 = arith.muli %106, %108 : vector<4x32xi32>
    %110 = arith.cmpi sge, %107, %109 : vector<4x32xi32>
    %c8_i32_58 = arith.constant 8 : i32
    %111 = vector.broadcast %c8_i32_58 : i32 to vector<4x32xi32>
    %112 = arith.addi %109, %111 : vector<4x32xi32>
    %113 = arith.cmpi slt, %107, %112 : vector<4x32xi32>
    %114 = arith.andi %110, %113 : vector<4x32xi1>
    %115 = arith.extui %114 : vector<4x32xi1> to vector<4x32xi32>
    %116 = arith.sitofp %115 : vector<4x32xi32> to vector<4x32xf32>
    %117 = arith.mulf %98, %105 : vector<32x1xf32>
    %cst_59 = arith.constant dense<0.000000e+00> : vector<4x1xf32>
    %118 = tpu.matmul %116, %117, %cst_59 {dimension_numbers = #tpu.dot_dimension_numbers<[1], [0], [0], [1], [0, 0, 1, 1], [], []>} : vector<4x32xf32>, vector<32x1xf32>, vector<4x1xf32> -> vector<4x1xf32>
    %cst_60 = arith.constant dense<0.000000e+00> : vector<4x1xf32>
    %119 = tpu.matmul %116, %105, %cst_60 {dimension_numbers = #tpu.dot_dimension_numbers<[1], [0], [0], [1], [0, 0, 1, 1], [], []>} : vector<4x32xf32>, vector<32x1xf32>, vector<4x1xf32> -> vector<4x1xf32>
    %cst_61 = arith.constant 1.000000e-10 : f32
    %120 = vector.broadcast %cst_61 : f32 to vector<4x1xf32>
    %121 = arith.addf %119, %120 : vector<4x1xf32>
    %122 = tpu.reciprocal %121 {approx = true} : vector<4x1xf32> -> vector<4x1xf32>
    %123 = arith.mulf %118, %122 : vector<4x1xf32>
    %124 = vector.shape_cast %123 : vector<4x1xf32> to vector<1x4x1xf32>
    %cst_62 = arith.constant dense<0.000000e+00> : vector<1xf32>
    %125 = vector.multi_reduction <add>, %124, %cst_62 [1, 2] : vector<1x4x1xf32> to vector<1xf32>
    %126 = vector.shape_cast %125 : vector<1xf32> to vector<1x1x1xf32>
    %127 = vector.extract %126[0, 0, 0] : f32 from vector<1x1x1xf32>
    %128 = vector.broadcast %127 : f32 to vector<1x1xf32>
    %cst_63 = arith.constant 4.000000e+00 : f32
    %129 = vector.broadcast %cst_63 : f32 to vector<1x1xf32>
    %130 = arith.divf %128, %129 : vector<1x1xf32>
    %c0_64 = arith.constant 0 : index
    %c0_65 = arith.constant 0 : index
    %131 = vector.load %arg20[%c0_64, %c0_65] : memref<1x1xf32, #tpu.memory_space<vmem>>, vector<1x1xf32>
    tpu.vector_store %arg20[%c0_64, %c0_65], %130 {strides = array<i32>} : memref<1x1xf32, #tpu.memory_space<vmem>>, vector<1x1xf32>,
    return
  }
}

</mosaic_0001>

<bundles_post_ra>
// kernel: tpu_custom_call.1
= control target key start
LH: loop header
LB: loop body
LE: loop exit
PB: predicated region body
PF: predicated region fallthrough
CT: control target
= control target key end

     0   :  { %s9331_s0 = inlined_call_operand.hbm [shape: f32[64,256], index: 0, kind: input, shape index: {}]   ;;  %s9332_s1 = inlined_call_operand.hbm [shape: f32[32,256], index: 1, kind: input, shape index: {}]   ;;  %s9333_s2 = inlined_call_operand.hbm [shape: f32[32,256], index: 2, kind: input, shape index: {}]   ;;  %s9334_s3 = inlined_call_operand.hbm [shape: bf16[256,512], index: 3, kind: input, shape index: {}]   ;;  %s9335_s4 = inlined_call_operand.vmem [shape: f32[1,512], index: 4, kind: input, shape index: {}]   ;;  %s9336_s5 = inlined_call_operand.hbm [shape: bf16[256,512], index: 5, kind: input, shape index: {}]   ;;  %s9337_s6 = inlined_call_operand.vmem [shape: f32[1,512], index: 6, kind: input, shape index: {}]   ;;  %s9338_s7 = inlined_call_operand.hbm [shape: bf16[256,512], index: 7, kind: input, shape index: {}]   ;;  %s9339_s8 = inlined_call_operand.vmem [shape: f32[1,512], index: 8, kind: input, shape index: {}]   ;;  %s9340_s9 = inlined_call_operand.hbm [shape: bf16[512,512], index: 9, kind: input, shape index: {}]   ;;  %s9341_s10 = inlined_call_operand.hbm [shape: bf16[512,512], index: 10, kind: input, shape index: {}]   ;;  %s9342_s11 = inlined_call_operand.vmem [shape: f32[1,512], index: 11, kind: input, shape index: {}]   ;;  %s9343_s12 = inlined_call_operand.vmem [shape: f32[1,512], index: 12, kind: input, shape index: {}]   ;;  %s9344_s13 = inlined_call_operand.hbm [shape: bf16[512,512], index: 13, kind: input, shape index: {}]   ;;  %s9345_s14 = inlined_call_operand.vmem [shape: f32[1,512], index: 14, kind: input, shape index: {}]   ;;  %s9346_s15 = inlined_call_operand.vmem [shape: f32[1,512], index: 15, kind: input, shape index: {}]   ;;  %s9347_s16 = inlined_call_operand.hbm [shape: bf16[512,512], index: 16, kind: input, shape index: {}]   ;;  %s9348_s17 = inlined_call_operand.vmem [shape: f32[1,512], index: 17, kind: input, shape index: {}]   ;;  %s9349_s18 = inlined_call_operand.vmem [shape: f32[1,512], index: 18, kind: input, shape index: {}]   ;;  %s9350_s19 = inlined_call_operand.vmem [shape: f32[3], index: 19, kind: input, shape index: {}]   ;;  %s9351_s20 = inlined_call_operand.hbm [shape: f32[1,1], index: 20, kind: output, shape index: {}]  }
   0x1   :  { %9357 = sst [smem:[#allocation30_spill]] %s9331_s0 }
   0x2   :  { %9358 = sst [smem:[#allocation31_spill]] %s9332_s1 }
   0x3   :  { %9359 = sst [smem:[#allocation32_spill]] %s9333_s2 }
   0x4   :  { %9360 = sst [smem:[#allocation33_spill]] %s9334_s3 }
   0x5   :  { %9361 = sst [smem:[#allocation34_spill]] %s9335_s4 }
   0x6   :  { %9362 = sst [smem:[#allocation35_spill]] %s9349_s18 }
   0x7   :  { %9363 = sst [smem:[#allocation36_spill]] %s9351_s20 }
   0x8   :  { %25 = vsyncpa [#allocation3], 0 }
   0x9   :  { %26 = vsyncpa [#allocation7], 0 }
   0xa   :  { %27 = vsyncpa [#allocation10], 0 }
   0xb   :  { %28 = vsyncpa [#allocation13], 0 }
   0xc   :  { %29 = vsyncpa [#allocation16], 0 }
   0xd   :  { %30 = vsyncpa [#allocation19], 0 }
   0xe   :  { %31 = vsyncpa [#allocation5], 0 }
   0xf   :  { %32 = vsyncpa [#allocation4], 0  ;;  %s8684_s1 = smov [#allocation6]   ;;  %s8685_s23 = smov [#allocation9]  }
  0x10   :  { %s50_s22 = sshll.u32 %s8684_s1, 4  ;;  %s74_s24 = sshll.u32 %s8685_s23, 4  ;;  %s51_s22 = int_to_ptr.vmem [resolvable:$true] %s50_s22  ;;  %s8806_s24 = int_to_ptr.vmem [resolvable:$true] %s74_s24 }
  0x11   :  { %s9364_s3 = sld [smem:[#allocation31_spill]] }
  0x17   :  { %s8414_s26 = scalar_lea.hbm %s9364_s3, 1024 }
  0x18   :  { %p8415_p0 = scmp.ne.s32.totalorder %s9364_s3, %s8414_s26  ;;  %p8418_p1 = scmp.lt.u32.totalorder %s8414_s26, %s9364_s3 }
  0x1a   :  { %p8420_p2 = pnand %p8418_p1, %p8415_p0 }
  0x1c   :  { %8423 = shalt.err (!%p8420_p2)
}
  0x1d   :  { %s8424_s30 = scalar_lea.vmem %s51_s22, 1024  ;;  %p8429_p4 = scmp.lt.s32.totalorder %s51_s22, %s51_s22 }
  0x1e   :  { %p8425_p3 = scmp.ne.s32.totalorder %s51_s22, %s8424_s30  ;;  %p8430_p5 = scmp.lt.s32.totalorder %s8424_s30, %s8424_s30 }
  0x20   :  { %p8431_p6 = por %p8430_p5, %p8429_p4 }
  0x22   :  { %p8432_p7 = pnand %p8431_p6, %p8425_p3 }
  0x24   :  { %8435 = shalt.err (!%p8432_p7)
}
  0x25   :  { %s8686_s0 = smov 256   ;;  %s8687_s21 = smov 16  }
  0x26   :  { %56 = dma.hbm_to_vmem [thread:$0]  %s9364_s3, 1024, %s51_s22, [#allocation7], %s8686_s0, %s8686_s0, %s8687_s21  }
  0x27   :  { %s9365_s26 = sld [smem:[#allocation33_spill]] }
  0x2d   :  { %s8436_s27 = scalar_lea.hbm %s9365_s26, 8192 }
  0x2e   :  { %p8437_p8 = scmp.ne.s32.totalorder %s9365_s26, %s8436_s27  ;;  %p8440_p9 = scmp.lt.u32.totalorder %s8436_s27, %s9365_s26 }
  0x30   :  { %p8442_p10 = pnand %p8440_p9, %p8437_p8 }
  0x32   :  { %8445 = shalt.err (!%p8442_p10)
}
  0x33   :  { %s8446_s20 = scalar_lea.vmem %s8806_s24, 8192  ;;  %p8451_p12 = scmp.lt.s32.totalorder %s8806_s24, %s8806_s24 }
  0x34   :  { %p8447_p11 = scmp.ne.s32.totalorder %s8806_s24, %s8446_s20  ;;  %p8452_p13 = scmp.lt.s32.totalorder %s8446_s20, %s8446_s20 }
  0x36   :  { %p8453_p0 = por %p8452_p13, %p8451_p12 }
  0x38   :  { %p8454_p1 = pnand %p8453_p0, %p8447_p11 }
  0x3a   :  { %8457 = shalt.err (!%p8454_p1)
}
  0x3b   :  { %80 = dma.hbm_to_vmem [thread:$0]  %s9365_s26, 8192, %s8806_s24, [#allocation10], %s8686_s0, %s8686_s0, %s8687_s21  }
  0x3c   :  { %s8688_s1 = smov [#allocation12]   ;;  %s8689_s2 = smov [#allocation15]  }
  0x3d   :  { %s102_s23 = sshll.u32 %s8688_s1, 4  ;;  %s128_s25 = sshll.u32 %s8689_s2, 4  ;;  %s103_s23 = int_to_ptr.vmem [resolvable:$true] %s102_s23  ;;  %s8843_s25 = int_to_ptr.vmem [resolvable:$true] %s128_s25 }
  0x3e   :  { %s8458_s28 = scalar_lea.hbm %s9338_s7, 8192 }
  0x3f   :  { %p8459_p2 = scmp.ne.s32.totalorder %s9338_s7, %s8458_s28  ;;  %p8462_p3 = scmp.lt.u32.totalorder %s8458_s28, %s9338_s7 }
  0x41   :  { %p8464_p4 = pnand %p8462_p3, %p8459_p2 }
  0x43   :  { %8467 = shalt.err (!%p8464_p4)
}
  0x44   :  { %s8468_s24 = scalar_lea.vmem %s103_s23, 8192  ;;  %p8473_p6 = scmp.lt.s32.totalorder %s103_s23, %s103_s23 }
  0x45   :  { %p8469_p5 = scmp.ne.s32.totalorder %s103_s23, %s8468_s24  ;;  %p8474_p7 = scmp.lt.s32.totalorder %s8468_s24, %s8468_s24 }
  0x47   :  { %p8475_p8 = por %p8474_p7, %p8473_p6 }
  0x49   :  { %p8476_p9 = pnand %p8475_p8, %p8469_p5 }
  0x4b   :  { %8479 = shalt.err (!%p8476_p9)
}
  0x4c   :  { %108 = dma.hbm_to_vmem [thread:$0]  %s9338_s7, 8192, %s103_s23, [#allocation13], %s8686_s0, %s8686_s0, %s8687_s21  }
  0x4d   :  { %s8480_s18 = scalar_lea.hbm %s9341_s10, 16384 }
  0x4e   :  { %p8481_p10 = scmp.ne.s32.totalorder %s9341_s10, %s8480_s18  ;;  %p8484_p11 = scmp.lt.u32.totalorder %s8480_s18, %s9341_s10 }
  0x50   :  { %p8486_p12 = pnand %p8484_p11, %p8481_p10 }
  0x52   :  { %8489 = shalt.err (!%p8486_p12)
}
  0x53   :  { %s8490_s4 = scalar_lea.vmem %s8843_s25, 16384  ;;  %p8495_p0 = scmp.lt.s32.totalorder %s8843_s25, %s8843_s25 }
  0x54   :  { %p8491_p13 = scmp.ne.s32.totalorder %s8843_s25, %s8490_s4  ;;  %p8496_p1 = scmp.lt.s32.totalorder %s8490_s4, %s8490_s4 }
  0x56   :  { %p8497_p2 = por %p8496_p1, %p8495_p0 }
  0x58   :  { %p8498_p3 = pnand %p8497_p2, %p8491_p13 }
  0x5a   :  { %8501 = shalt.err (!%p8498_p3)
}
  0x5b   :  { %134 = dma.hbm_to_vmem [thread:$0]  %s9341_s10, 16384, %s8843_s25, [#allocation16], %s8686_s0, %s8686_s0, %s8687_s21  }
  0x5c   :  { %s8690_s29 = smov [#allocation2]   ;;  %s8691_s24 = smov [#allocation8]  }
  0x5d   :  { %s38_s30 = sshll.u32 %s8690_s29, 4  ;;  %s62_s26 = sshll.u32 %s8691_s24, 4  ;;  %s39_s30 = int_to_ptr.vmem [resolvable:$true] %s38_s30  ;;  %s8880_s26 = int_to_ptr.vmem [resolvable:$true] %s62_s26 }
  0x5e   :  { %s9366_s1 = sld [smem:[#allocation30_spill]] }
  0x64   :  { %s8502_s18 = scalar_lea.hbm %s9366_s1, 2048 }
  0x65   :  { %p8503_p4 = scmp.ne.s32.totalorder %s9366_s1, %s8502_s18  ;;  %p8506_p5 = scmp.lt.u32.totalorder %s8502_s18, %s9366_s1 }
  0x67   :  { %p8508_p6 = pnand %p8506_p5, %p8503_p4 }
  0x69   :  { %8511 = shalt.err (!%p8508_p6)
}
  0x6a   :  { %s8512_s10 = scalar_lea.vmem %s39_s30, 2048  ;;  %p8517_p8 = scmp.lt.s32.totalorder %s39_s30, %s39_s30 }
  0x6b   :  { %p8513_p7 = scmp.ne.s32.totalorder %s39_s30, %s8512_s10  ;;  %p8518_p9 = scmp.lt.s32.totalorder %s8512_s10, %s8512_s10 }
  0x6d   :  { %p8519_p10 = por %p8518_p9, %p8517_p8 }
  0x6f   :  { %p8520_p11 = pnand %p8519_p10, %p8513_p7 }
  0x71   :  { %8523 = shalt.err (!%p8520_p11)
}
  0x72   :  { %44 = dma.hbm_to_vmem [thread:$0]  %s9366_s1, 2048, %s39_s30, [#allocation3], %s8686_s0, %s8686_s0, %s8687_s21  }
  0x73   :  { %s9367_s29 = sld [smem:[#allocation32_spill]] }
  0x79   :  { %s8524_s24 = scalar_lea.hbm %s9367_s29, 1024 }
  0x7a   :  { %p8525_p12 = scmp.ne.s32.totalorder %s9367_s29, %s8524_s24  ;;  %p8528_p13 = scmp.lt.u32.totalorder %s8524_s24, %s9367_s29 }
  0x7c   :  { %p8530_p0 = pnand %p8528_p13, %p8525_p12 }
  0x7e   :  { %8533 = shalt.err (!%p8530_p0)
}
  0x7f   :  { %s8534_s27 = scalar_lea.vmem %s8880_s26, 1024  ;;  %p8539_p2 = scmp.lt.s32.totalorder %s8880_s26, %s8880_s26 }
  0x80   :  { %p8535_p1 = scmp.ne.s32.totalorder %s8880_s26, %s8534_s27  ;;  %p8540_p3 = scmp.lt.s32.totalorder %s8534_s27, %s8534_s27 }
  0x82   :  { %p8541_p4 = por %p8540_p3, %p8539_p2 }
  0x84   :  { %p8542_p5 = pnand %p8541_p4, %p8535_p1 }
  0x86   :  { %8545 = shalt.err (!%p8542_p5)
}
  0x87   :  { %68 = dma.hbm_to_vmem [thread:$0]  %s9367_s29, 1024, %s8880_s26, [#allocation7], %s8686_s0, %s8686_s0, %s8687_s21  }
  0x88   :  { %s8692_s20 = smov [#allocation11]   ;;  %s8693_s10 = smov [#allocation14]  }
  0x89   :  { %s88_s28 = sshll.u32 %s8692_s20, 4  ;;  %s116_s25 = sshll.u32 %s8693_s10, 4  ;;  %s89_s28 = int_to_ptr.vmem [resolvable:$true] %s88_s28  ;;  %s8917_s25 = int_to_ptr.vmem [resolvable:$true] %s116_s25 }
  0x8a   :  { %s8546_s23 = scalar_lea.hbm %s9336_s5, 8192 }
  0x8b   :  { %p8547_p6 = scmp.ne.s32.totalorder %s9336_s5, %s8546_s23  ;;  %p8550_p7 = scmp.lt.u32.totalorder %s8546_s23, %s9336_s5 }
  0x8d   :  { %p8552_p8 = pnand %p8550_p7, %p8547_p6 }
  0x8f   :  { %8555 = shalt.err (!%p8552_p8)
}
  0x90   :  { %s8556_s26 = scalar_lea.vmem %s89_s28, 8192  ;;  %p8561_p10 = scmp.lt.s32.totalorder %s89_s28, %s89_s28 }
  0x91   :  { %p8557_p9 = scmp.ne.s32.totalorder %s89_s28, %s8556_s26  ;;  %p8562_p11 = scmp.lt.s32.totalorder %s8556_s26, %s8556_s26 }
  0x93   :  { %p8563_p12 = por %p8562_p11, %p8561_p10 }
  0x95   :  { %p8564_p13 = pnand %p8563_p12, %p8557_p9 }
  0x97   :  { %8567 = shalt.err (!%p8564_p13)
}
  0x98   :  { %94 = dma.hbm_to_vmem [thread:$0]  %s9336_s5, 8192, %s89_s28, [#allocation10], %s8686_s0, %s8686_s0, %s8687_s21  }
  0x99   :  { %s8568_s1 = scalar_lea.hbm %s9340_s9, 16384 }
  0x9a   :  { %p8569_p0 = scmp.ne.s32.totalorder %s9340_s9, %s8568_s1  ;;  %p8572_p1 = scmp.lt.u32.totalorder %s8568_s1, %s9340_s9 }
  0x9c   :  { %p8574_p2 = pnand %p8572_p1, %p8569_p0 }
  0x9e   :  { %8577 = shalt.err (!%p8574_p2)
}
  0x9f   :  { %s8578_s23 = scalar_lea.vmem %s8917_s25, 16384  ;;  %p8583_p4 = scmp.lt.s32.totalorder %s8917_s25, %s8917_s25 }
  0xa0   :  { %p8579_p3 = scmp.ne.s32.totalorder %s8917_s25, %s8578_s23  ;;  %p8584_p5 = scmp.lt.s32.totalorder %s8578_s23, %s8578_s23 }
  0xa2   :  { %p8585_p6 = por %p8584_p5, %p8583_p4 }
  0xa4   :  { %p8586_p7 = pnand %p8585_p6, %p8579_p3 }
  0xa6   :  { %8589 = shalt.err (!%p8586_p7)
}
  0xa7   :  { %122 = dma.hbm_to_vmem [thread:$0]  %s9340_s9, 16384, %s8917_s25, [#allocation13], %s8686_s0, %s8686_s0, %s8687_s21  }
  0xa8   :  { %s8694_s24 = smov [#allocation17]   ;;  %s8695_s3 = smov [#allocation18]  }
  0xa9   :  { %s144_s22 = sshll.u32 %s8694_s24, 4  ;;  %s160_s18 = sshll.u32 %s8695_s3, 4  ;;  %s145_s22 = int_to_ptr.vmem [resolvable:$true] %s144_s22  ;;  %s8954_s18 = int_to_ptr.vmem [resolvable:$true] %s160_s18 }
  0xaa   :  { %s8590_s2 = scalar_lea.hbm %s9344_s13, 16384 }
  0xab   :  { %p8591_p8 = scmp.ne.s32.totalorder %s9344_s13, %s8590_s2  ;;  %p8594_p9 = scmp.lt.u32.totalorder %s8590_s2, %s9344_s13 }
  0xad   :  { %p8596_p10 = pnand %p8594_p9, %p8591_p8 }
  0xaf   :  { %8599 = shalt.err (!%p8596_p10)
}
  0xb0   :  { %s8600_s9 = scalar_lea.vmem %s145_s22, 16384  ;;  %p8605_p12 = scmp.lt.s32.totalorder %s145_s22, %s145_s22 }
  0xb1   :  { %p8601_p11 = scmp.ne.s32.totalorder %s145_s22, %s8600_s9  ;;  %p8606_p13 = scmp.lt.s32.totalorder %s8600_s9, %s8600_s9 }
  0xb3   :  { %p8607_p0 = por %p8606_p13, %p8605_p12 }
  0xb5   :  { %p8608_p1 = pnand %p8607_p0, %p8601_p11 }
  0xb7   :  { %8611 = shalt.err (!%p8608_p1)
}
  0xb8   :  { %150 = dma.hbm_to_vmem [thread:$0]  %s9344_s13, 16384, %s145_s22, [#allocation16], %s8686_s0, %s8686_s0, %s8687_s21  }
  0xb9   :  { %s8612_s23 = scalar_lea.hbm %s9347_s16, 16384 }
  0xba   :  { %p8613_p2 = scmp.ne.s32.totalorder %s9347_s16, %s8612_s23  ;;  %p8616_p3 = scmp.lt.u32.totalorder %s8612_s23, %s9347_s16 }
  0xbc   :  { %p8618_p4 = pnand %p8616_p3, %p8613_p2 }
  0xbe   :  { %8621 = shalt.err (!%p8618_p4)
}
  0xbf   :  { %s8622_s26 = scalar_lea.vmem %s8954_s18, 16384  ;;  %p8627_p6 = scmp.lt.s32.totalorder %s8954_s18, %s8954_s18 }
  0xc0   :  { %p8623_p5 = scmp.ne.s32.totalorder %s8954_s18, %s8622_s26  ;;  %p8628_p7 = scmp.lt.s32.totalorder %s8622_s26, %s8622_s26 }
  0xc2   :  { %p8629_p8 = por %p8628_p7, %p8627_p6 }
  0xc4   :  { %p8630_p9 = pnand %p8629_p8, %p8623_p5 }
  0xc6   :  { %8633 = shalt.err (!%p8630_p9)
}
  0xc7   :  { %166 = dma.hbm_to_vmem [thread:$0]  %s9347_s16, 16384, %s8954_s18, [#allocation19], %s8686_s0, %s8686_s0, %s8687_s21  }
  0xc8   :  { %s177_s27 = sshll.u32 %s9350_s19, 4  ;;  %s178_s27 = int_to_ptr.vmem [resolvable:$true] %s177_s27 }
  0xc9   :  { %s8634_s30 = scalar_lea.vmem %s178_s27, 16  ;;  %p8639_p11 = scmp.lt.s32.totalorder %s178_s27, %s178_s27 }
  0xca   :  { %p8635_p10 = scmp.ne.s32.totalorder %s178_s27, %s8634_s30  ;;  %p8640_p12 = scmp.lt.s32.totalorder %s8634_s30, %s8634_s30 }
  0xcc   :  { %p8641_p13 = por %p8640_p12, %p8639_p11 }
  0xce   :  { %p8642_p0 = pnand %p8641_p13, %p8635_p10 }
  0xd0   :  { %8645 = shalt.err (!%p8642_p0)
}
  0xd1   :  { %s8696_s1 = smov [#allocation20]  }
  0xd2   :  { %180 = dma.vmem_to_smem %s178_s27, 16, %s8696_s1, [#allocation5]  }
  0xd3   :  { %8668 = dma.done.wait [#allocation3], 2048  }
  0xd4   :  { %8669 = vsyncadd [#allocation3], 4294965248 }
  0xd5   :  { %8670 = dma.done.wait [#allocation7], 2048  }
  0xd6   :  { %8671 = vsyncadd [#allocation7], 4294965248 }
  0xd7   :  { %8672 = dma.done.wait [#allocation10], 16384  }
  0xd8   :  { %8673 = vsyncadd [#allocation10], 4294950912 }
  0xd9   :  { %8674 = dma.done.wait [#allocation13], 24576  }
  0xda   :  { %8675 = vsyncadd [#allocation13], 4294942720 }
  0xdb   :  { %8676 = dma.done.wait [#allocation16], 32768  }
  0xdc   :  { %8677 = vsyncadd [#allocation16], 4294934528 }
  0xdd   :  { %8678 = dma.done.wait [#allocation19], 16384  }
  0xde   :  { %8679 = vsyncadd [#allocation19], 4294950912 }
  0xdf   :  { %8680 = dma.done.wait [#allocation5], 16  }
  0xe0   :  { %8681 = vsyncadd [#allocation5], 4294967280 }
  0xe1   :  { %214 = sfence }
  0xe2   :  { %v7338_v0 = vld [vmem:[#allocation9 + $0x4] ss:$16 sps:$4 sm:$0xff]   ;;  %v7340_v1 = vld [vmem:[#allocation9] ss:$16 sps:$4 sm:$0xff]   ;;  %v7362_v8 = vld [vmem:[#allocation9 + $0xc] ss:$16 sps:$4 sm:$0xff]  }
  0xe3   :  { %645 = vmatprep.subr.bf16.mxu0 %v7338_v0  ;;  %v7341_v2 = vld [vmem:[#allocation9 + $0x24] ss:$16 sps:$4 sm:$0xff]   ;;  %v7343_v3 = vld [vmem:[#allocation9 + $0x20] ss:$16 sps:$4 sm:$0xff]   ;;  %v7364_v9 = vld [vmem:[#allocation9 + $0x8] ss:$16 sps:$4 sm:$0xff]   ;;  %718 = vmatprep.subr.bf16.mxu1 %v7362_v8 }
  0xe4   :  { %646 = vmatpush1.bf16.msra.mxu0 %v7340_v1  ;;  %v7344_v4 = vld [vmem:[#allocation9 + $0x44] ss:$16 sps:$4 sm:$0xff]   ;;  %v7346_v5 = vld [vmem:[#allocation9 + $0x40] ss:$16 sps:$4 sm:$0xff]   ;;  %719 = vmatpush1.bf16.msra.mxu1 %v7364_v9  ;;  %v7368_v11 = vld [vmem:[#allocation9 + $0x2c] ss:$16 sps:$4 sm:$0xff]  }
  0xe5   :  { %647 = vmatprep.subr.bf16.mxu0 %v7341_v2  ;;  %v7347_v6 = vld [vmem:[#allocation9 + $0x64] ss:$16 sps:$4 sm:$0xff]   ;;  %v7349_v7 = vld [vmem:[#allocation9 + $0x60] ss:$16 sps:$4 sm:$0xff]   ;;  %v7370_v12 = vld [vmem:[#allocation9 + $0x28] ss:$16 sps:$4 sm:$0xff]   ;;  %720 = vmatprep.subr.bf16.mxu1 %v7368_v11 }
  0xe6   :  { %v7350_v10 = vld [vmem:[#allocation9 + $0x84] ss:$16 sps:$4 sm:$0xff]   ;;  %v7352_v13 = vld [vmem:[#allocation9 + $0x80] ss:$16 sps:$4 sm:$0xff]   ;;  %v7374_v15 = vld [vmem:[#allocation9 + $0x4c] ss:$16 sps:$4 sm:$0xff]  }
  0xe7   :  { %v7353_v14 = vld [vmem:[#allocation9 + $0xa4] ss:$16 sps:$4 sm:$0xff]   ;;  %v7376_v16 = vld [vmem:[#allocation9 + $0x48] ss:$16 sps:$4 sm:$0xff]   ;;  %v7355_v17 = vld [vmem:[#allocation9 + $0xa0] ss:$16 sps:$4 sm:$0xff]  }
  0xe8   :  { %648 = vmatpush1.bf16.msra.mxu0 %v7343_v3  ;;  %721 = vmatpush1.bf16.msra.mxu1 %v7370_v12  ;;  %v7380_v18 = vld [vmem:[#allocation9 + $0x6c] ss:$16 sps:$4 sm:$0xff]   ;;  %v7356_v19 = vld [vmem:[#allocation9 + $0xc4] ss:$16 sps:$4 sm:$0xff]   ;;  %v7382_v20 = vld [vmem:[#allocation9 + $0x68] ss:$16 sps:$4 sm:$0xff]  }
  0xe9   :  { %649 = vmatprep.subr.bf16.mxu0 %v7344_v4  ;;  %722 = vmatprep.subr.bf16.mxu1 %v7374_v15  ;;  %v7358_v21 = vld [vmem:[#allocation9 + $0xc0] ss:$16 sps:$4 sm:$0xff]   ;;  %v7386_v22 = vld [vmem:[#allocation9 + $0x8c] ss:$16 sps:$4 sm:$0xff]   ;;  %v7359_v23 = vld [vmem:[#allocation9 + $0xe4] ss:$16 sps:$4 sm:$0xff]  }
  0xea   :  { %v7388_v24 = vld [vmem:[#allocation9 + $0x88] ss:$16 sps:$4 sm:$0xff]   ;;  %v7361_v25 = vld [vmem:[#allocation9 + $0xe0] ss:$16 sps:$4 sm:$0xff]   ;;  %v7392_v26 = vld [vmem:[#allocation9 + $0xac] ss:$16 sps:$4 sm:$0xff]  }
  0xeb   :  { %v7365_v27 = vld [vmem:[#allocation9 + $0x104] ss:$16 sps:$4 sm:$0xff]   ;;  %v7394_v28 = vld [vmem:[#allocation9 + $0xa8] ss:$16 sps:$4 sm:$0xff]   ;;  %v7367_v29 = vld [vmem:[#allocation9 + $0x100] ss:$16 sps:$4 sm:$0xff]  }
  0xec   :  { %650 = vmatpush1.bf16.msra.mxu0 %v7346_v5  ;;  %723 = vmatpush1.bf16.msra.mxu1 %v7376_v16  ;;  %v7398_v30 = vld [vmem:[#allocation9 + $0xcc] ss:$16 sps:$4 sm:$0xff]   ;;  %v7371_v31 = vld [vmem:[#allocation9 + $0x124] ss:$16 sps:$4 sm:$0xff]   ;;  %v7400_v34 = vld [vmem:[#allocation9 + $0xc8] ss:$16 sps:$4 sm:$0xff]  }
  0xed   :  { %651 = vmatprep.subr.bf16.mxu0 %v7347_v6  ;;  %724 = vmatprep.subr.bf16.mxu1 %v7380_v18  ;;  %v216_v32 = vld [vmem:[#allocation2 + $0x8] sm:$0xff]  ;;  %v218_v33 = vld [vmem:[#allocation2 + $0x18] sm:$0xff]  ;;  %v7373_v36 = vld [vmem:[#allocation9 + $0x120] ss:$16 sps:$4 sm:$0xff]   ;;  %s9368_s0 = sld [smem:[#allocation34_spill]]  ;;  %s9369_s28 = sld [smem:[#allocation35_spill]] }
  0xee   :  { %v232_v35 = vpack.c.bf16 %v218_v33, %v216_v32  ;;  %v7404_v37 = vld [vmem:[#allocation9 + $0xec] ss:$16 sps:$4 sm:$0xff]   ;;  %v7377_v38 = vld [vmem:[#allocation9 + $0x144] ss:$16 sps:$4 sm:$0xff]   ;;  %v7406_v39 = vld [vmem:[#allocation9 + $0xe8] ss:$16 sps:$4 sm:$0xff]  }
  0xef   :  { %v7379_v40 = vld [vmem:[#allocation9 + $0x140] ss:$16 sps:$4 sm:$0xff]   ;;  %v7410_v41 = vld [vmem:[#allocation9 + $0x10c] ss:$16 sps:$4 sm:$0xff]   ;;  %v7383_v42 = vld [vmem:[#allocation9 + $0x164] ss:$16 sps:$4 sm:$0xff]  }
  0xf0   :  { %652 = vmatpush1.bf16.msra.mxu0 %v7349_v7  ;;  %725 = vmatpush1.bf16.msra.mxu1 %v7382_v20  ;;  %v7412_v43 = vld [vmem:[#allocation9 + $0x108] ss:$16 sps:$4 sm:$0xff]   ;;  %v7385_v44 = vld [vmem:[#allocation9 + $0x160] ss:$16 sps:$4 sm:$0xff]   ;;  %v7413_v45 = vld [vmem:[#allocation9 + $0x12c] ss:$16 sps:$4 sm:$0xff]  }
  0xf1   :  { %653 = vmatprep.subr.bf16.mxu0 %v7350_v10  ;;  %726 = vmatprep.subr.bf16.mxu1 %v7386_v22  ;;  %v7389_v46 = vld [vmem:[#allocation9 + $0x184] ss:$16 sps:$4 sm:$0xff]   ;;  %v7415_v47 = vld [vmem:[#allocation9 + $0x128] ss:$16 sps:$4 sm:$0xff]   ;;  %v7391_v48 = vld [vmem:[#allocation9 + $0x180] ss:$16 sps:$4 sm:$0xff]  }
  0xf2   :  { %677 = vmatprep.mubr.bf16.mxu0 %v232_v35  ;;  %750 = vmatprep.mubr.bf16.mxu1 %v232_v35  ;;  %v7416_v49 = vld [vmem:[#allocation9 + $0x14c] ss:$16 sps:$4 sm:$0xff]   ;;  %v7395_v50 = vld [vmem:[#allocation9 + $0x1a4] ss:$16 sps:$4 sm:$0xff]   ;;  %v7418_v51 = vld [vmem:[#allocation9 + $0x148] ss:$16 sps:$4 sm:$0xff]  }
  0xf3   :  { %v7397_v52 = vld [vmem:[#allocation9 + $0x1a0] ss:$16 sps:$4 sm:$0xff]   ;;  %v7419_v53 = vld [vmem:[#allocation9 + $0x16c] ss:$16 sps:$4 sm:$0xff]   ;;  %v7401_v54 = vld [vmem:[#allocation9 + $0x1c4] ss:$16 sps:$4 sm:$0xff]  }
  0xf4   :  { %654 = vmatpush1.bf16.msra.mxu0 %v7352_v13  ;;  %727 = vmatpush1.bf16.msra.mxu1 %v7388_v24  ;;  %v7421_v55 = vld [vmem:[#allocation9 + $0x168] ss:$16 sps:$4 sm:$0xff]   ;;  %v7403_v56 = vld [vmem:[#allocation9 + $0x1c0] ss:$16 sps:$4 sm:$0xff]   ;;  %v7422_v57 = vld [vmem:[#allocation9 + $0x18c] ss:$16 sps:$4 sm:$0xff]  }
  0xf5   :  { %655 = vmatprep.subr.bf16.mxu0 %v7353_v14  ;;  %728 = vmatprep.subr.bf16.mxu1 %v7392_v26  ;;  %v7407_v58 = vld [vmem:[#allocation9 + $0x1e4] ss:$16 sps:$4 sm:$0xff]   ;;  %v7409_v59 = vld [vmem:[#allocation9 + $0x1e0] ss:$16 sps:$4 sm:$0xff]   ;;  %v7424_v62 = vld [vmem:[#allocation9 + $0x188] ss:$16 sps:$4 sm:$0xff]  }
  0xf6   :  { %v215_v60 = vld [vmem:[#allocation2] sm:$0xff]  ;;  %v217_v61 = vld [vmem:[#allocation2 + $0x10] sm:$0xff]  ;;  %v7425_v63 = vld [vmem:[#allocation9 + $0x1ac] ss:$16 sps:$4 sm:$0xff]   ;;  %s3991_s24 = sld [smem:[#allocation20]]  ;;  %vm8698_vm0 = vmmov 0  }
  0xf7   :  { %v220_v0 = vld [vmem:[#allocation2 + $0x28] sm:$0xff]  ;;  %v222_v1 = vld [vmem:[#allocation2 + $0x38] sm:$0xff]  ;;  %v7436_v2 = vld [vmem:[#allocation11 + $0x4] ss:$16 sps:$4 sm:$0xff]   ;;  %v231_v3 = vpack.c.bf16 %v217_v61, %v215_v60  ;;  %s7147_s3 = sld [smem:[#allocation20 + $0x2]]  ;;  %vm6259_vm4 = vcmask 261120  }
  0xf8   :  { %656 = vmatpush1.bf16.msra.mxu0 %v7355_v17  ;;  %729 = vmatpush1.bf16.msra.mxu1 %v7394_v28  ;;  %v7427_v4 = vld [vmem:[#allocation9 + $0x1a8] ss:$16 sps:$4 sm:$0xff]   ;;  %v7428_v5 = vld [vmem:[#allocation9 + $0x1cc] ss:$16 sps:$4 sm:$0xff]   ;;  %v234_v6 = vpack.c.bf16 %v222_v1, %v220_v0  ;;  %v7434_v7 = vld [vmem:[#allocation11] ss:$16 sps:$4 sm:$0xff]  }
  0xf9   :  { %657 = vmatprep.subr.bf16.mxu0 %v7356_v19  ;;  %730 = vmatprep.subr.bf16.mxu1 %v7398_v30  ;;  %v7442_v8 = vld [vmem:[#allocation11 + $0x24] ss:$16 sps:$4 sm:$0xff]   ;;  %v7430_v9 = vld [vmem:[#allocation9 + $0x1c8] ss:$16 sps:$4 sm:$0xff]   ;;  %v7431_v10 = vld [vmem:[#allocation9 + $0x1ec] ss:$16 sps:$4 sm:$0xff]  }
  0xfa   :  { %v219_v11 = vld [vmem:[#allocation2 + $0x20] sm:$0xff]  ;;  %v221_v12 = vld [vmem:[#allocation2 + $0x30] sm:$0xff]  ;;  %v7433_v15 = vld [vmem:[#allocation9 + $0x1e8] ss:$16 sps:$4 sm:$0xff]   ;;  %vm6405_vm5 = vcmask 3072   ;;  %s8700_s22 = smov [#allocation21]  }
  0xfb   :  { %v7440_v13 = vld [vmem:[#allocation11 + $0x20] ss:$16 sps:$4 sm:$0xff]   ;;  %v7448_v14 = vld [vmem:[#allocation11 + $0x44] ss:$16 sps:$4 sm:$0xff]   ;;  %v233_v16 = vpack.c.bf16 %v221_v12, %v219_v11  ;;  %v7439_v17 = vld [vmem:[#allocation11 + $0xc] ss:$16 sps:$4 sm:$0xff]  }
  0xfc   :  { %658 = vmatpush1.bf16.msra.mxu0 %v7358_v21  ;;  %731 = vmatpush1.bf16.msra.mxu1 %v7400_v34  ;;  %v7446_v18 = vld [vmem:[#allocation11 + $0x40] ss:$16 sps:$4 sm:$0xff]   ;;  %v7454_v19 = vld [vmem:[#allocation11 + $0x64] ss:$16 sps:$4 sm:$0xff]   ;;  %v7437_v20 = vld [vmem:[#allocation11 + $0x8] ss:$16 sps:$4 sm:$0xff]  }
  0xfd   :  { %659 = vmatprep.subr.bf16.mxu0 %v7359_v23  ;;  %732 = vmatprep.subr.bf16.mxu1 %v7404_v37  ;;  %v7445_v21 = vld [vmem:[#allocation11 + $0x2c] ss:$16 sps:$4 sm:$0xff]   ;;  %v7443_v22 = vld [vmem:[#allocation11 + $0x28] ss:$16 sps:$4 sm:$0xff]   ;;  %v7452_v23 = vld [vmem:[#allocation11 + $0x60] ss:$16 sps:$4 sm:$0xff]  }
  0xfe   :  { %v7460_v24 = vld [vmem:[#allocation11 + $0x84] ss:$16 sps:$4 sm:$0xff]   ;;  %v226_v26 = vld [vmem:[#allocation2 + $0x58] sm:$0xff]  ;;  %v7458_v32 = vld [vmem:[#allocation11 + $0x80] ss:$16 sps:$4 sm:$0xff]   ;;  %s6427_s29 = sshll.u32 %s8700_s22, 4  ;;  %s6428_s29 = int_to_ptr.vmem [resolvable:$true] %s6427_s29 }
  0xff   :  { %v223_v28 = vld [vmem:[#allocation2 + $0x40] sm:$0xff]  ;;  %v7451_v30 = vld [vmem:[#allocation11 + $0x4c] ss:$16 sps:$4 sm:$0xff]   ;;  %v7449_v34 = vld [vmem:[#allocation11 + $0x48] ss:$16 sps:$4 sm:$0xff]   ;;  %vm6419_vm6 = vcmask 0   ;;  %p8651_p2 = scmp.lt.s32.totalorder %s6428_s29, %s6428_s29 }
 0x100   :  { %660 = vmatpush1.bf16.msra.mxu0 %v7361_v25  ;;  %733 = vmatpush1.bf16.msra.mxu1 %v7406_v39  ;;  %v224_v25 = vld [vmem:[#allocation2 + $0x48] sm:$0xff]  ;;  %v7466_v33 = vld [vmem:[#allocation11 + $0xa4] ss:$16 sps:$4 sm:$0xff]   ;;  %v230_v39 = vld [vmem:[#allocation2 + $0x78] sm:$0xff]  ;;  %s8646_s27 = scalar_lea.vmem %s6428_s29, 16  ;;  %s8650_s30 = scalar_lea.vmem %s6428_s29, 32 }
 0x101   :  { %661 = vmatprep.subr.bf16.mxu0 %v7365_v27  ;;  %734 = vmatprep.subr.bf16.mxu1 %v7410_v41  ;;  %v236_v27 = vpack.c.bf16 %v226_v26, %v224_v25  ;;  %v7457_v35 = vld [vmem:[#allocation11 + $0x6c] ss:$16 sps:$4 sm:$0xff]   ;;  %v7472_v37 = vld [vmem:[#allocation11 + $0xc4] ss:$16 sps:$4 sm:$0xff]   ;;  %v7488_v61 = vld [vmem:[#allocation11 + $0x120] ss:$16 sps:$4 sm:$0xff]   ;;  %p8647_p1 = scmp.ne.s32.totalorder %s6428_s29, %s8646_s27  ;;  %p8652_p3 = scmp.lt.s32.totalorder %s8650_s30, %s8646_s27 }
 0x102   :  { %v7481_v60 = vld [vmem:[#allocation11 + $0xec] ss:$16 sps:$4 sm:$0xff]   ;;  %v7494_v1 = vld [vmem:[#allocation11 + $0x140] ss:$16 sps:$4 sm:$0xff]   ;;  %v7497_v11 = vld [vmem:[#allocation11 + $0x148] ss:$16 sps:$4 sm:$0xff]  }
 0x103   :  { %v7487_v0 = vld [vmem:[#allocation11 + $0x10c] ss:$16 sps:$4 sm:$0xff]   ;;  %v7515_v25 = vld [vmem:[#allocation11 + $0x1a8] ss:$16 sps:$4 sm:$0xff]   ;;  %p8653_p4 = por %p8652_p3, %p8651_p2 }
 0x104   :  { %662 = vmatpush1.bf16.msra.mxu0 %v7367_v29  ;;  %735 = vmatpush1.bf16.msra.mxu1 %v7412_v43  ;;  %v225_v29 = vld [vmem:[#allocation2 + $0x50] sm:$0xff]  ;;  %v7455_v43 = vld [vmem:[#allocation11 + $0x68] ss:$16 sps:$4 sm:$0xff]   ;;  %v7505_v12 = vld [vmem:[#allocation11 + $0x16c] ss:$16 sps:$4 sm:$0xff]  }
 0x105   :  { %663 = vmatprep.subr.bf16.mxu0 %v7371_v31  ;;  %736 = vmatprep.subr.bf16.mxu1 %v7413_v45  ;;  %v235_v31 = vpack.c.bf16 %v225_v29, %v223_v28  ;;  %v7463_v45 = vld [vmem:[#allocation11 + $0x8c] ss:$16 sps:$4 sm:$0xff]   ;;  %v7530_v28 = vld [vmem:[#allocation12] ss:$16 sps:$4 sm:$0xff]   ;;  %v7538_v29 = vld [vmem:[#allocation12 + $0x24] ss:$16 sps:$4 sm:$0xff]   ;;  %p8654_p5 = pnand %p8653_p4, %p8647_p1 }
 0x106   :  { %v7523_v26 = vld [vmem:[#allocation11 + $0x1cc] ss:$16 sps:$4 sm:$0xff]  }
 0x108   :  { %664 = vmatpush1.bf16.msra.mxu0 %v7373_v36  ;;  %737 = vmatpush1.bf16.msra.mxu1 %v7415_v47  ;;  %v7464_v36 = vld [vmem:[#allocation11 + $0xa0] ss:$16 sps:$4 sm:$0xff]   ;;  %v7478_v47 = vld [vmem:[#allocation11 + $0xe4] ss:$16 sps:$4 sm:$0xff]  }
 0x109   :  { %665 = vmatprep.subr.bf16.mxu0 %v7377_v38  ;;  %738 = vmatprep.subr.bf16.mxu1 %v7416_v49  ;;  %v228_v38 = vld [vmem:[#allocation2 + $0x68] sm:$0xff] }
 0x10a   :  { %v238_v41 = vpack.c.bf16 %v230_v39, %v228_v38  ;;  %v824_v49 = vld [vmem:[#allocation6 + $0x8] sm:$0xff]  ;;  %v7544_v38 = vld [vmem:[#allocation12 + $0x44] ss:$16 sps:$4 sm:$0xff]  }
 0x10b   :  { %v7527_v39 = vld [vmem:[#allocation11 + $0x1e8] ss:$16 sps:$4 sm:$0xff]  }
 0x10c   :  { %666 = vmatpush1.bf16.msra.mxu0 %v7379_v40  ;;  %739 = vmatpush1.bf16.msra.mxu1 %v7418_v51  ;;  %v227_v40 = vld [vmem:[#allocation2 + $0x60] sm:$0xff]  ;;  %v826_v51 = vld [vmem:[#allocation6 + $0x18] sm:$0xff] }
 0x10d   :  { %667 = vmatprep.subr.bf16.mxu0 %v7383_v42  ;;  %740 = vmatprep.subr.bf16.mxu1 %v7419_v53  ;;  %v229_v42 = vld [vmem:[#allocation2 + $0x70] sm:$0xff]  ;;  %v832_v53 = vpack.c.bf16 %v826_v51, %v824_v49  ;;  %v7539_v51 = vld [vmem:[#allocation12 + $0x28] ss:$16 sps:$4 sm:$0xff]  }
 0x10e   :  { %v7548_v49 = vld [vmem:[#allocation12 + $0x60] ss:$16 sps:$4 sm:$0xff]  }
 0x110   :  { %668 = vmatpush1.bf16.msra.mxu0 %v7385_v44  ;;  %741 = vmatpush1.bf16.msra.mxu1 %v7421_v55  ;;  %v237_v44 = vpack.c.bf16 %v229_v42, %v227_v40  ;;  %v7467_v55 = vld [vmem:[#allocation11 + $0xa8] ss:$16 sps:$4 sm:$0xff]   ;;  %v7535_v40 = vld [vmem:[#allocation12 + $0xc] ss:$16 sps:$4 sm:$0xff]   ;;  %v7542_v42 = vld [vmem:[#allocation12 + $0x40] ss:$16 sps:$4 sm:$0xff]  }
 0x111   :  { %669 = vmatprep.subr.bf16.mxu0 %v7389_v46  ;;  %742 = vmatprep.subr.bf16.mxu1 %v7422_v57  ;;  %v7470_v46 = vld [vmem:[#allocation11 + $0xc0] ss:$16 sps:$4 sm:$0xff]  }
 0x112   :  { %v7482_v57 = vld [vmem:[#allocation11 + $0x100] ss:$16 sps:$4 sm:$0xff]  }
 0x114   :  { %670 = vmatpush1.bf16.msra.mxu0 %v7391_v48  ;;  %743 = vmatpush1.bf16.msra.mxu1 %v7424_v62  ;;  %v7461_v48 = vld [vmem:[#allocation11 + $0x88] ss:$16 sps:$4 sm:$0xff]   ;;  %v7496_v62 = vld [vmem:[#allocation11 + $0x144] ss:$16 sps:$4 sm:$0xff]  }
 0x115   :  { %671 = vmatprep.subr.bf16.mxu0 %v7395_v50  ;;  %744 = vmatprep.subr.bf16.mxu1 %v7425_v63  ;;  %v7469_v50 = vld [vmem:[#allocation11 + $0xac] ss:$16 sps:$4 sm:$0xff]   ;;  %v7479_v63 = vld [vmem:[#allocation11 + $0xe8] ss:$16 sps:$4 sm:$0xff]  }
 0x118   :  { %672 = vmatpush1.bf16.msra.mxu0 %v7397_v52  ;;  %745 = vmatpush1.bf16.msra.mxu1 %v7427_v4  ;;  %v7476_v52 = vld [vmem:[#allocation11 + $0xe0] ss:$16 sps:$4 sm:$0xff]   ;;  %v7493_v4 = vld [vmem:[#allocation11 + $0x12c] ss:$16 sps:$4 sm:$0xff]  }
 0x119   :  { %673 = vmatprep.subr.bf16.mxu0 %v7401_v54  ;;  %746 = vmatprep.subr.bf16.mxu1 %v7428_v5  ;;  %v7484_v54 = vld [vmem:[#allocation11 + $0x104] ss:$16 sps:$4 sm:$0xff]   ;;  %v7500_v5 = vld [vmem:[#allocation11 + $0x160] ss:$16 sps:$4 sm:$0xff]  }
 0x11c   :  { %674 = vmatpush1.bf16.msra.mxu0 %v7403_v56  ;;  %747 = vmatpush1.bf16.msra.mxu1 %v7430_v9  ;;  %v7475_v56 = vld [vmem:[#allocation11 + $0xcc] ss:$16 sps:$4 sm:$0xff]   ;;  %v7506_v9 = vld [vmem:[#allocation11 + $0x180] ss:$16 sps:$4 sm:$0xff]  }
 0x11d   :  { %675 = vmatprep.subr.bf16.mxu0 %v7407_v58  ;;  %748 = vmatprep.subr.bf16.mxu1 %v7431_v10  ;;  %v7490_v58 = vld [vmem:[#allocation11 + $0x124] ss:$16 sps:$4 sm:$0xff]  }
 0x11e   :  { %v7514_v10 = vld [vmem:[#allocation11 + $0x1a4] ss:$16 sps:$4 sm:$0xff]  }
 0x120   :  { %676 = vmatpush1.bf16.msra.mxu0 %v7409_v59  ;;  %749 = vmatpush1.bf16.msra.mxu1 %v7433_v15  ;;  %v7473_v59 = vld [vmem:[#allocation11 + $0xc8] ss:$16 sps:$4 sm:$0xff]  }
 0x121   :  { %1241 = vmatprep.subr.bf16.mxu0 %v7436_v2  ;;  %1294 = vmatprep.subr.bf16.mxu1 %v7439_v17  ;;  %v7502_v2 = vld [vmem:[#allocation11 + $0x164] ss:$16 sps:$4 sm:$0xff]   ;;  %v7503_v15 = vld [vmem:[#allocation11 + $0x168] ss:$16 sps:$4 sm:$0xff]   ;;  %v7518_v17 = vld [vmem:[#allocation11 + $0x1c0] ss:$16 sps:$4 sm:$0xff]  }
 0x123   :  { %678 = vmatmul.mubr.bf16.vlgmr.msra.gmra.mrb[0].mxu0 %v231_v3  ;;  %751 = vmatmul.mubr.bf16.vlgmr.msra.gmra.mrb[0].mxu1 %v231_v3  ;;  %v7485_v3 = vld [vmem:[#allocation11 + $0x108] ss:$16 sps:$4 sm:$0xff]  }
 0x124   :  { %687 = vmatprep.mubr.bf16.mxu0 %v234_v6  ;;  %1242 = vmatpush1.bf16.msra.mxu0 %v7434_v7  ;;  %v7491_v7 = vld [vmem:[#allocation11 + $0x128] ss:$16 sps:$4 sm:$0xff]  }
 0x125   :  { %1243 = vmatprep.subr.bf16.mxu0 %v7442_v8  ;;  %1295 = vmatpush1.bf16.msra.mxu1 %v7437_v20  ;;  %v7499_v8 = vld [vmem:[#allocation11 + $0x14c] ss:$16 sps:$4 sm:$0xff]  }
 0x126   :  { %760 = vmatprep.mubr.bf16.mxu1 %v234_v6  ;;  %1296 = vmatprep.subr.bf16.mxu1 %v7445_v21  ;;  %v7508_v6 = vld [vmem:[#allocation11 + $0x184] ss:$16 sps:$4 sm:$0xff]   ;;  %v7517_v20 = vld [vmem:[#allocation11 + $0x1ac] ss:$16 sps:$4 sm:$0xff]   ;;  %v7524_v21 = vld [vmem:[#allocation11 + $0x1e0] ss:$16 sps:$4 sm:$0xff]  }
 0x128   :  { %1244 = vmatpush1.bf16.msra.mxu0 %v7440_v13  ;;  %v7512_v13 = vld [vmem:[#allocation11 + $0x1a0] ss:$16 sps:$4 sm:$0xff]  }
 0x129   :  { %1245 = vmatprep.subr.bf16.mxu0 %v7448_v14  ;;  %1297 = vmatpush1.bf16.msra.mxu1 %v7443_v22  ;;  %v7520_v14 = vld [vmem:[#allocation11 + $0x1c4] ss:$16 sps:$4 sm:$0xff]  }
 0x12a   :  { %1298 = vmatprep.subr.bf16.mxu1 %v7451_v30  ;;  %v823_v22 = vld [vmem:[#allocation6] sm:$0xff]  ;;  %v828_v30 = vld [vmem:[#allocation6 + $0x28] sm:$0xff] }
 0x12b   :  { %688 = vmatmul.mubr.bf16.gmra.mrb[4].mxu0 %v233_v16  ;;  %761 = vmatmul.mubr.bf16.gmra.mrb[4].mxu1 %v233_v16  ;;  %v7511_v16 = vld [vmem:[#allocation11 + $0x18c] ss:$16 sps:$4 sm:$0xff]  }
 0x12c   :  { %1246 = vmatpush1.bf16.msra.mxu0 %v7446_v18  ;;  %697 = vmatprep.mubr.bf16.mxu0 %v236_v27  ;;  %v7526_v18 = vld [vmem:[#allocation11 + $0x1e4] ss:$16 sps:$4 sm:$0xff]  }
 0x12d   :  { %1247 = vmatprep.subr.bf16.mxu0 %v7454_v19  ;;  %1299 = vmatpush1.bf16.msra.mxu1 %v7449_v34  ;;  %v7509_v19 = vld [vmem:[#allocation11 + $0x188] ss:$16 sps:$4 sm:$0xff]  }
 0x12e   :  { %770 = vmatprep.mubr.bf16.mxu1 %v236_v27  ;;  %1300 = vmatprep.subr.bf16.mxu1 %v7457_v35  ;;  %v7536_v35 = vld [vmem:[#allocation12 + $0x20] ss:$16 sps:$4 sm:$0xff]  }
 0x130   :  { %1248 = vmatpush1.bf16.msra.mxu0 %v7452_v23  ;;  %v825_v23 = vld [vmem:[#allocation6 + $0x10] sm:$0xff] }
 0x131   :  { %1249 = vmatprep.subr.bf16.mxu0 %v7460_v24  ;;  %1301 = vmatpush1.bf16.msra.mxu1 %v7455_v43  ;;  %v7532_v24 = vld [vmem:[#allocation12 + $0x4] ss:$16 sps:$4 sm:$0xff]   ;;  %v831_v27 = vpack.c.bf16 %v825_v23, %v823_v22  ;;  %v1364_v43 = vld [vmem:[#allocation8 + $0x8] sm:$0xff] }
 0x132   :  { %1302 = vmatprep.subr.bf16.mxu1 %v7463_v45  ;;  %v7550_v45 = vld [vmem:[#allocation12 + $0x64] ss:$16 sps:$4 sm:$0xff]   ;;  %v7593_v23 = vld [vmem:[#allocation12 + $0x148] ss:$16 sps:$4 sm:$0xff]  }
 0x133   :  { %698 = vmatmul.mubr.bf16.gmra.mrb[8].mxu0 %v235_v31  ;;  %771 = vmatmul.mubr.bf16.gmra.mrb[8].mxu1 %v235_v31  ;;  %v830_v31 = vld [vmem:[#allocation6 + $0x38] sm:$0xff]  ;;  %v7610_v22 = vld [vmem:[#allocation12 + $0x1a4] ss:$16 sps:$4 sm:$0xff]  }
 0x134   :  { %1250 = vmatpush1.bf16.msra.mxu0 %v7458_v32  ;;  %707 = vmatprep.mubr.bf16.mxu0 %v238_v41  ;;  %v7521_v32 = vld [vmem:[#allocation11 + $0x1c8] ss:$16 sps:$4 sm:$0xff]   ;;  %v834_v34 = vpack.c.bf16 %v830_v31, %v828_v30  ;;  %v7614_v30 = vld [vmem:[#allocation12 + $0x1c0] ss:$16 sps:$4 sm:$0xff]   ;;  %v7613_v31 = vld [vmem:[#allocation12 + $0x1ac] ss:$16 sps:$4 sm:$0xff]  }
 0x135   :  { %1251 = vmatprep.subr.bf16.mxu0 %v7466_v33  ;;  %1303 = vmatpush1.bf16.msra.mxu1 %v7461_v48  ;;  %v7529_v33 = vld [vmem:[#allocation11 + $0x1ec] ss:$16 sps:$4 sm:$0xff]  }
 0x136   :  { %780 = vmatprep.mubr.bf16.mxu1 %v238_v41  ;;  %1304 = vmatprep.subr.bf16.mxu1 %v7469_v50  ;;  %v7541_v48 = vld [vmem:[#allocation12 + $0x2c] ss:$16 sps:$4 sm:$0xff]   ;;  %v7556_v50 = vld [vmem:[#allocation12 + $0x84] ss:$16 sps:$4 sm:$0xff]  }
 0x138   :  { %1252 = vmatpush1.bf16.msra.mxu0 %v7464_v36  ;;  %v827_v36 = vld [vmem:[#allocation6 + $0x20] sm:$0xff] }
 0x139   :  { %1253 = vmatprep.subr.bf16.mxu0 %v7472_v37  ;;  %1305 = vmatpush1.bf16.msra.mxu1 %v7467_v55  ;;  %v829_v37 = vld [vmem:[#allocation6 + $0x30] sm:$0xff]  ;;  %v7545_v55 = vld [vmem:[#allocation12 + $0x48] ss:$16 sps:$4 sm:$0xff]  }
 0x13a   :  { %1306 = vmatprep.subr.bf16.mxu1 %v7475_v56  ;;  %v833_v41 = vpack.c.bf16 %v829_v37, %v827_v36  ;;  %v7553_v56 = vld [vmem:[#allocation12 + $0x6c] ss:$16 sps:$4 sm:$0xff]   ;;  %v7628_v36 = vld [vmem:[#allocation15 + $0x4] ss:$16 sps:$4 sm:$0xff]  }
 0x13b   :  { %708 = vmatmul.mubr.bf16.gmra.mrb[12].mxu0 %v237_v44  ;;  %781 = vmatmul.mubr.bf16.gmra.mrb[12].mxu1 %v237_v44  ;;  %v1366_v44 = vld [vmem:[#allocation8 + $0x18] sm:$0xff]  ;;  %v1368_v37 = vld [vmem:[#allocation8 + $0x28] sm:$0xff] }
 0x13c   :  { %1254 = vmatpush1.bf16.msra.mxu0 %v7470_v46  ;;  %1273 = vmatprep.mubr.bf16.mxu0 %v832_v53  ;;  %v1372_v46 = vpack.c.bf16 %v1366_v44, %v1364_v43  ;;  %v7617_v44 = vld [vmem:[#allocation12 + $0x1c8] ss:$16 sps:$4 sm:$0xff]  }
 0x13d   :  { %1255 = vmatprep.subr.bf16.mxu0 %v7478_v47  ;;  %1307 = vmatpush1.bf16.msra.mxu1 %v7473_v59  ;;  %v7533_v47 = vld [vmem:[#allocation12 + $0x8] ss:$16 sps:$4 sm:$0xff]  }
 0x13e   :  { %1326 = vmatprep.mubr.bf16.mxu1 %v832_v53  ;;  %1308 = vmatprep.subr.bf16.mxu1 %v7481_v60  ;;  %v7554_v53 = vld [vmem:[#allocation12 + $0x80] ss:$16 sps:$4 sm:$0xff]   ;;  %v7551_v59 = vld [vmem:[#allocation12 + $0x68] ss:$16 sps:$4 sm:$0xff]   ;;  %v7559_v60 = vld [vmem:[#allocation12 + $0x8c] ss:$16 sps:$4 sm:$0xff]  }
 0x140   :  { %1256 = vmatpush1.bf16.msra.mxu0 %v7476_v52  ;;  %v7547_v52 = vld [vmem:[#allocation12 + $0x4c] ss:$16 sps:$4 sm:$0xff]  }
 0x141   :  { %1257 = vmatprep.subr.bf16.mxu0 %v7484_v54  ;;  %1309 = vmatpush1.bf16.msra.mxu1 %v7479_v63  ;;  %v7562_v54 = vld [vmem:[#allocation12 + $0xa4] ss:$16 sps:$4 sm:$0xff]   ;;  %v7557_v63 = vld [vmem:[#allocation12 + $0x88] ss:$16 sps:$4 sm:$0xff]  }
 0x142   :  { %1310 = vmatprep.subr.bf16.mxu1 %v7487_v0  ;;  %v7565_v0 = vld [vmem:[#allocation12 + $0xac] ss:$16 sps:$4 sm:$0xff]  }
 0x144   :  { %1258 = vmatpush1.bf16.msra.mxu0 %v7482_v57  ;;  %v7560_v57 = vld [vmem:[#allocation12 + $0xa0] ss:$16 sps:$4 sm:$0xff]  }
 0x145   :  { %1259 = vmatprep.subr.bf16.mxu0 %v7490_v58  ;;  %1311 = vmatpush1.bf16.msra.mxu1 %v7485_v3  ;;  %v7568_v58 = vld [vmem:[#allocation12 + $0xc4] ss:$16 sps:$4 sm:$0xff]   ;;  %v7563_v3 = vld [vmem:[#allocation12 + $0xa8] ss:$16 sps:$4 sm:$0xff]  }
 0x146   :  { %1312 = vmatprep.subr.bf16.mxu1 %v7493_v4  ;;  %v7571_v4 = vld [vmem:[#allocation12 + $0xcc] ss:$16 sps:$4 sm:$0xff]  }
 0x148   :  { %1260 = vmatpush1.bf16.msra.mxu0 %v7488_v61  ;;  %v7566_v61 = vld [vmem:[#allocation12 + $0xc0] ss:$16 sps:$4 sm:$0xff]  }
 0x149   :  { %1261 = vmatprep.subr.bf16.mxu0 %v7496_v62  ;;  %1313 = vmatpush1.bf16.msra.mxu1 %v7491_v7  ;;  %v7574_v62 = vld [vmem:[#allocation12 + $0xe4] ss:$16 sps:$4 sm:$0xff]   ;;  %v7569_v7 = vld [vmem:[#allocation12 + $0xc8] ss:$16 sps:$4 sm:$0xff]  }
 0x14a   :  { %1314 = vmatprep.subr.bf16.mxu1 %v7499_v8  ;;  %v7577_v8 = vld [vmem:[#allocation12 + $0xec] ss:$16 sps:$4 sm:$0xff]  }
 0x14c   :  { %1262 = vmatpush1.bf16.msra.mxu0 %v7494_v1  ;;  %v7572_v1 = vld [vmem:[#allocation12 + $0xe0] ss:$16 sps:$4 sm:$0xff]  }
 0x14d   :  { %1263 = vmatprep.subr.bf16.mxu0 %v7502_v2  ;;  %1315 = vmatpush1.bf16.msra.mxu1 %v7497_v11  ;;  %v7580_v2 = vld [vmem:[#allocation12 + $0x104] ss:$16 sps:$4 sm:$0xff]   ;;  %v7575_v11 = vld [vmem:[#allocation12 + $0xe8] ss:$16 sps:$4 sm:$0xff]  }
 0x14e   :  { %1316 = vmatprep.subr.bf16.mxu1 %v7505_v12  ;;  %v7583_v12 = vld [vmem:[#allocation12 + $0x10c] ss:$16 sps:$4 sm:$0xff]  }
 0x150   :  { %1264 = vmatpush1.bf16.msra.mxu0 %v7500_v5  ;;  %v7578_v5 = vld [vmem:[#allocation12 + $0x100] ss:$16 sps:$4 sm:$0xff]  }
 0x151   :  { %1265 = vmatprep.subr.bf16.mxu0 %v7508_v6  ;;  %1317 = vmatpush1.bf16.msra.mxu1 %v7503_v15  ;;  %v7586_v6 = vld [vmem:[#allocation12 + $0x124] ss:$16 sps:$4 sm:$0xff]   ;;  %v7581_v15 = vld [vmem:[#allocation12 + $0x108] ss:$16 sps:$4 sm:$0xff]  }
 0x152   :  { %1318 = vmatprep.subr.bf16.mxu1 %v7511_v16  ;;  %v7589_v16 = vld [vmem:[#allocation12 + $0x12c] ss:$16 sps:$4 sm:$0xff]  }
 0x154   :  { %1266 = vmatpush1.bf16.msra.mxu0 %v7506_v9  ;;  %v7584_v9 = vld [vmem:[#allocation12 + $0x120] ss:$16 sps:$4 sm:$0xff]  }
 0x155   :  { %1267 = vmatprep.subr.bf16.mxu0 %v7514_v10  ;;  %1319 = vmatpush1.bf16.msra.mxu1 %v7509_v19  ;;  %v7592_v10 = vld [vmem:[#allocation12 + $0x144] ss:$16 sps:$4 sm:$0xff]   ;;  %v7587_v19 = vld [vmem:[#allocation12 + $0x128] ss:$16 sps:$4 sm:$0xff]  }
 0x156   :  { %1320 = vmatprep.subr.bf16.mxu1 %v7517_v20  ;;  %v7595_v20 = vld [vmem:[#allocation12 + $0x14c] ss:$16 sps:$4 sm:$0xff]  }
 0x158   :  { %1268 = vmatpush1.bf16.msra.mxu0 %v7512_v13  ;;  %v7590_v13 = vld [vmem:[#allocation12 + $0x140] ss:$16 sps:$4 sm:$0xff]  }
 0x159   :  { %1269 = vmatprep.subr.bf16.mxu0 %v7520_v14  ;;  %1321 = vmatpush1.bf16.msra.mxu1 %v7515_v25  ;;  %v7598_v14 = vld [vmem:[#allocation12 + $0x164] ss:$16 sps:$4 sm:$0xff]   ;;  %v7608_v25 = vld [vmem:[#allocation12 + $0x1a0] ss:$16 sps:$4 sm:$0xff]  }
 0x15a   :  { %1322 = vmatprep.subr.bf16.mxu1 %v7523_v26  ;;  %v7616_v26 = vld [vmem:[#allocation12 + $0x1c4] ss:$16 sps:$4 sm:$0xff]  }
 0x15c   :  { %1270 = vmatpush1.bf16.msra.mxu0 %v7518_v17  ;;  %v7596_v17 = vld [vmem:[#allocation12 + $0x160] ss:$16 sps:$4 sm:$0xff]  }
 0x15d   :  { %1271 = vmatprep.subr.bf16.mxu0 %v7526_v18  ;;  %1323 = vmatpush1.bf16.msra.mxu1 %v7521_v32  ;;  %v7604_v18 = vld [vmem:[#allocation12 + $0x184] ss:$16 sps:$4 sm:$0xff]  }
 0x15e   :  { %1324 = vmatprep.subr.bf16.mxu1 %v7529_v33  ;;  %v7622_v32 = vld [vmem:[#allocation12 + $0x1e4] ss:$16 sps:$4 sm:$0xff]   ;;  %v7620_v33 = vld [vmem:[#allocation12 + $0x1e0] ss:$16 sps:$4 sm:$0xff]  }
 0x160   :  { %1272 = vmatpush1.bf16.msra.mxu0 %v7524_v21  ;;  %v7602_v21 = vld [vmem:[#allocation12 + $0x180] ss:$16 sps:$4 sm:$0xff]  }
 0x161   :  { %1781 = vmatprep.subr.bf16.mxu0 %v7532_v24  ;;  %1325 = vmatpush1.bf16.msra.mxu1 %v7527_v39  ;;  %v7601_v24 = vld [vmem:[#allocation12 + $0x16c] ss:$16 sps:$4 sm:$0xff]   ;;  %v7611_v39 = vld [vmem:[#allocation12 + $0x1a8] ss:$16 sps:$4 sm:$0xff]  }
 0x162   :  { %1834 = vmatprep.subr.bf16.mxu1 %v7535_v40  ;;  %v7619_v40 = vld [vmem:[#allocation12 + $0x1cc] ss:$16 sps:$4 sm:$0xff]  }
 0x163   :  { %1274 = vmatmul.mubr.bf16.vlgmr.msra.gmra.mrb[16].mxu0 %v831_v27 }
 0x164   :  { %1782 = vmatpush1.bf16.msra.mxu0 %v7530_v28  ;;  %1283 = vmatprep.mubr.bf16.mxu0 %v834_v34  ;;  %v7607_v28 = vld [vmem:[#allocation12 + $0x18c] ss:$16 sps:$4 sm:$0xff]  }
 0x165   :  { %1783 = vmatprep.subr.bf16.mxu0 %v7538_v29  ;;  %1327 = vmatmul.mubr.bf16.vlgmr.msra.gmra.mrb[16].mxu1 %v831_v27  ;;  %v7599_v27 = vld [vmem:[#allocation12 + $0x168] ss:$16 sps:$4 sm:$0xff]  }
 0x166   :  { %1835 = vmatpush1.bf16.msra.mxu1 %v7533_v47  ;;  %1336 = vmatprep.mubr.bf16.mxu1 %v834_v34  ;;  %v7605_v29 = vld [vmem:[#allocation12 + $0x188] ss:$16 sps:$4 sm:$0xff]   ;;  %v1363_v34 = vld [vmem:[#allocation8] sm:$0xff] }
 0x167   :  { %1836 = vmatprep.subr.bf16.mxu1 %v7541_v48  ;;  %v7632_v47 = vld [vmem:[#allocation15 + $0x20] ss:$16 sps:$4 sm:$0xff]  }
 0x168   :  { %1784 = vmatpush1.bf16.msra.mxu0 %v7536_v35  ;;  %v1365_v35 = vld [vmem:[#allocation8 + $0x10] sm:$0xff]  ;;  %v1367_v48 = vld [vmem:[#allocation8 + $0x20] sm:$0xff] }
 0x169   :  { %1785 = vmatprep.subr.bf16.mxu0 %v7544_v38  ;;  %v1370_v38 = vld [vmem:[#allocation8 + $0x38] sm:$0xff] }
 0x16a   :  { %1837 = vmatpush1.bf16.msra.mxu1 %v7539_v51  ;;  %v1374_v43 = vpack.c.bf16 %v1370_v38, %v1368_v37  ;;  %v7623_v51 = vld [vmem:[#allocation12 + $0x1e8] ss:$16 sps:$4 sm:$0xff]   ;;  %v7703_v37 = vld [vmem:[#allocation15 + $0x18c] ss:$16 sps:$4 sm:$0xff]   ;;  %v7710_v38 = vld [vmem:[#allocation15 + $0x1c0] ss:$16 sps:$4 sm:$0xff]  }
 0x16b   :  { %1284 = vmatmul.mubr.bf16.gmra.mrb[20].mxu0 %v833_v41  ;;  %1838 = vmatprep.subr.bf16.mxu1 %v7547_v52  ;;  %v7631_v52 = vld [vmem:[#allocation15 + $0xc] ss:$16 sps:$4 sm:$0xff]  }
 0x16c   :  { %1786 = vmatpush1.bf16.msra.mxu0 %v7542_v42  ;;  %1813 = vmatprep.mubr.bf16.mxu0 %v1372_v46  ;;  %v7626_v42 = vld [vmem:[#allocation15] ss:$16 sps:$4 sm:$0xff]  }
 0x16d   :  { %1787 = vmatprep.subr.bf16.mxu0 %v7550_v45  ;;  %1337 = vmatmul.mubr.bf16.gmra.mrb[20].mxu1 %v833_v41  ;;  %v1371_v41 = vpack.c.bf16 %v1365_v35, %v1363_v34  ;;  %v7634_v45 = vld [vmem:[#allocation15 + $0x24] ss:$16 sps:$4 sm:$0xff]   ;;  %v7704_v34 = vld [vmem:[#allocation15 + $0x1a0] ss:$16 sps:$4 sm:$0xff]   ;;  %v7695_v35 = vld [vmem:[#allocation15 + $0x168] ss:$16 sps:$4 sm:$0xff]  }
 0x16e   :  { %1839 = vmatpush1.bf16.msra.mxu1 %v7545_v55  ;;  %1866 = vmatprep.mubr.bf16.mxu1 %v1372_v46  ;;  %v7625_v46 = vld [vmem:[#allocation12 + $0x1ec] ss:$16 sps:$4 sm:$0xff]   ;;  %v7646_v55 = vld [vmem:[#allocation15 + $0x64] ss:$16 sps:$4 sm:$0xff]  }
 0x16f   :  { %1840 = vmatprep.subr.bf16.mxu1 %v7553_v56  ;;  %v7629_v56 = vld [vmem:[#allocation15 + $0x8] ss:$16 sps:$4 sm:$0xff]  }
 0x170   :  { %1788 = vmatpush1.bf16.msra.mxu0 %v7548_v49  ;;  %v1369_v49 = vld [vmem:[#allocation8 + $0x30] sm:$0xff] }
 0x171   :  { %1789 = vmatprep.subr.bf16.mxu0 %v7556_v50  ;;  %v7640_v50 = vld [vmem:[#allocation15 + $0x44] ss:$16 sps:$4 sm:$0xff]  }
 0x172   :  { %1841 = vmatpush1.bf16.msra.mxu1 %v7551_v59  ;;  %v7652_v59 = vld [vmem:[#allocation15 + $0x84] ss:$16 sps:$4 sm:$0xff]  }
 0x173   :  { %1842 = vmatprep.subr.bf16.mxu1 %v7559_v60  ;;  %v7635_v60 = vld [vmem:[#allocation15 + $0x28] ss:$16 sps:$4 sm:$0xff]  }
 0x174   :  { %1790 = vmatpush1.bf16.msra.mxu0 %v7554_v53  ;;  %v1373_v53 = vpack.c.bf16 %v1369_v49, %v1367_v48  ;;  %v305_v48 = vlaneseq  ;;  %v7719_v49 = vld [vmem:[#allocation15 + $0x1e8] ss:$16 sps:$4 sm:$0xff]  }
 0x175   :  { %1791 = vmatprep.subr.bf16.mxu0 %v7562_v54  ;;  %v7638_v54 = vld [vmem:[#allocation15 + $0x40] ss:$16 sps:$4 sm:$0xff]  }
 0x176   :  { %1843 = vmatpush1.bf16.msra.mxu1 %v7557_v63  ;;  %v7658_v63 = vld [vmem:[#allocation15 + $0xa4] ss:$16 sps:$4 sm:$0xff]  }
 0x177   :  { %1844 = vmatprep.subr.bf16.mxu1 %v7565_v0  ;;  %v7641_v0 = vld [vmem:[#allocation15 + $0x48] ss:$16 sps:$4 sm:$0xff]  }
 0x178   :  { %1792 = vmatpush1.bf16.msra.mxu0 %v7560_v57  ;;  %v7637_v57 = vld [vmem:[#allocation15 + $0x2c] ss:$16 sps:$4 sm:$0xff]  }
 0x179   :  { %1793 = vmatprep.subr.bf16.mxu0 %v7568_v58  ;;  %v7644_v58 = vld [vmem:[#allocation15 + $0x60] ss:$16 sps:$4 sm:$0xff]  }
 0x17a   :  { %1845 = vmatpush1.bf16.msra.mxu1 %v7563_v3  ;;  %v7664_v3 = vld [vmem:[#allocation15 + $0xc4] ss:$16 sps:$4 sm:$0xff]  }
 0x17b   :  { %1846 = vmatprep.subr.bf16.mxu1 %v7571_v4  ;;  %v7647_v4 = vld [vmem:[#allocation15 + $0x68] ss:$16 sps:$4 sm:$0xff]  }
 0x17c   :  { %1794 = vmatpush1.bf16.msra.mxu0 %v7566_v61  ;;  %v7643_v61 = vld [vmem:[#allocation15 + $0x4c] ss:$16 sps:$4 sm:$0xff]  }
 0x17d   :  { %1795 = vmatprep.subr.bf16.mxu0 %v7574_v62  ;;  %v7650_v62 = vld [vmem:[#allocation15 + $0x80] ss:$16 sps:$4 sm:$0xff]  }
 0x17e   :  { %1847 = vmatpush1.bf16.msra.mxu1 %v7569_v7  ;;  %v7670_v7 = vld [vmem:[#allocation15 + $0xe4] ss:$16 sps:$4 sm:$0xff]  }
 0x17f   :  { %1848 = vmatprep.subr.bf16.mxu1 %v7577_v8  ;;  %v7653_v8 = vld [vmem:[#allocation15 + $0x88] ss:$16 sps:$4 sm:$0xff]  }
 0x180   :  { %1796 = vmatpush1.bf16.msra.mxu0 %v7572_v1  ;;  %v7649_v1 = vld [vmem:[#allocation15 + $0x6c] ss:$16 sps:$4 sm:$0xff]  }
 0x181   :  { %1797 = vmatprep.subr.bf16.mxu0 %v7580_v2  ;;  %v7656_v2 = vld [vmem:[#allocation15 + $0xa0] ss:$16 sps:$4 sm:$0xff]  }
 0x182   :  { %1849 = vmatpush1.bf16.msra.mxu1 %v7575_v11  ;;  %v7676_v11 = vld [vmem:[#allocation15 + $0x104] ss:$16 sps:$4 sm:$0xff]  }
 0x183   :  { %1850 = vmatprep.subr.bf16.mxu1 %v7583_v12  ;;  %v7659_v12 = vld [vmem:[#allocation15 + $0xa8] ss:$16 sps:$4 sm:$0xff]  }
 0x184   :  { %1798 = vmatpush1.bf16.msra.mxu0 %v7578_v5  ;;  %v7655_v5 = vld [vmem:[#allocation15 + $0x8c] ss:$16 sps:$4 sm:$0xff]  }
 0x185   :  { %1799 = vmatprep.subr.bf16.mxu0 %v7586_v6  ;;  %v7662_v6 = vld [vmem:[#allocation15 + $0xc0] ss:$16 sps:$4 sm:$0xff]  }
 0x186   :  { %1851 = vmatpush1.bf16.msra.mxu1 %v7581_v15  ;;  %v7682_v15 = vld [vmem:[#allocation15 + $0x124] ss:$16 sps:$4 sm:$0xff]  }
 0x187   :  { %1852 = vmatprep.subr.bf16.mxu1 %v7589_v16  ;;  %v7665_v16 = vld [vmem:[#allocation15 + $0xc8] ss:$16 sps:$4 sm:$0xff]  }
 0x188   :  { %1800 = vmatpush1.bf16.msra.mxu0 %v7584_v9  ;;  %v7661_v9 = vld [vmem:[#allocation15 + $0xac] ss:$16 sps:$4 sm:$0xff]  }
 0x189   :  { %1801 = vmatprep.subr.bf16.mxu0 %v7592_v10  ;;  %v7668_v10 = vld [vmem:[#allocation15 + $0xe0] ss:$16 sps:$4 sm:$0xff]  }
 0x18a   :  { %1853 = vmatpush1.bf16.msra.mxu1 %v7587_v19  ;;  %v7688_v19 = vld [vmem:[#allocation15 + $0x144] ss:$16 sps:$4 sm:$0xff]  }
 0x18b   :  { %1854 = vmatprep.subr.bf16.mxu1 %v7595_v20  ;;  %v7671_v20 = vld [vmem:[#allocation15 + $0xe8] ss:$16 sps:$4 sm:$0xff]  }
 0x18c   :  { %1802 = vmatpush1.bf16.msra.mxu0 %v7590_v13  ;;  %v7667_v13 = vld [vmem:[#allocation15 + $0xcc] ss:$16 sps:$4 sm:$0xff]  }
 0x18d   :  { %1803 = vmatprep.subr.bf16.mxu0 %v7598_v14  ;;  %v7674_v14 = vld [vmem:[#allocation15 + $0x100] ss:$16 sps:$4 sm:$0xff]  }
 0x18e   :  { %1855 = vmatpush1.bf16.msra.mxu1 %v7593_v23  ;;  %v7694_v23 = vld [vmem:[#allocation15 + $0x164] ss:$16 sps:$4 sm:$0xff]  }
 0x18f   :  { %1856 = vmatprep.subr.bf16.mxu1 %v7601_v24  ;;  %v7677_v24 = vld [vmem:[#allocation15 + $0x108] ss:$16 sps:$4 sm:$0xff]  }
 0x190   :  { %1804 = vmatpush1.bf16.msra.mxu0 %v7596_v17  ;;  %v7673_v17 = vld [vmem:[#allocation15 + $0xec] ss:$16 sps:$4 sm:$0xff]  }
 0x191   :  { %1805 = vmatprep.subr.bf16.mxu0 %v7604_v18  ;;  %v7680_v18 = vld [vmem:[#allocation15 + $0x120] ss:$16 sps:$4 sm:$0xff]  }
 0x192   :  { %1857 = vmatpush1.bf16.msra.mxu1 %v7599_v27  ;;  %v7700_v27 = vld [vmem:[#allocation15 + $0x184] ss:$16 sps:$4 sm:$0xff]  }
 0x193   :  { %1858 = vmatprep.subr.bf16.mxu1 %v7607_v28  ;;  %v7683_v28 = vld [vmem:[#allocation15 + $0x128] ss:$16 sps:$4 sm:$0xff]  }
 0x194   :  { %1806 = vmatpush1.bf16.msra.mxu0 %v7602_v21  ;;  %v7679_v21 = vld [vmem:[#allocation15 + $0x10c] ss:$16 sps:$4 sm:$0xff]  }
 0x195   :  { %1807 = vmatprep.subr.bf16.mxu0 %v7610_v22  ;;  %v7686_v22 = vld [vmem:[#allocation15 + $0x140] ss:$16 sps:$4 sm:$0xff]  }
 0x196   :  { %1859 = vmatpush1.bf16.msra.mxu1 %v7605_v29  ;;  %v7691_v29 = vld [vmem:[#allocation15 + $0x14c] ss:$16 sps:$4 sm:$0xff]  }
 0x197   :  { %1860 = vmatprep.subr.bf16.mxu1 %v7613_v31  ;;  %v7689_v31 = vld [vmem:[#allocation15 + $0x148] ss:$16 sps:$4 sm:$0xff]  }
 0x198   :  { %1808 = vmatpush1.bf16.msra.mxu0 %v7608_v25  ;;  %v7685_v25 = vld [vmem:[#allocation15 + $0x12c] ss:$16 sps:$4 sm:$0xff]  }
 0x199   :  { %1809 = vmatprep.subr.bf16.mxu0 %v7616_v26  ;;  %v7692_v26 = vld [vmem:[#allocation15 + $0x160] ss:$16 sps:$4 sm:$0xff]  }
 0x19a   :  { %1861 = vmatpush1.bf16.msra.mxu1 %v7611_v39  ;;  %v7701_v39 = vld [vmem:[#allocation15 + $0x188] ss:$16 sps:$4 sm:$0xff]  }
 0x19b   :  { %1862 = vmatprep.subr.bf16.mxu1 %v7619_v40  ;;  %v7718_v40 = vld [vmem:[#allocation15 + $0x1e4] ss:$16 sps:$4 sm:$0xff]  }
 0x19c   :  { %1810 = vmatpush1.bf16.msra.mxu0 %v7614_v30  ;;  %v7698_v30 = vld [vmem:[#allocation15 + $0x180] ss:$16 sps:$4 sm:$0xff]  }
 0x19d   :  { %1811 = vmatprep.subr.bf16.mxu0 %v7622_v32  ;;  %v7706_v32 = vld [vmem:[#allocation15 + $0x1a4] ss:$16 sps:$4 sm:$0xff]  }
 0x19e   :  { %1863 = vmatpush1.bf16.msra.mxu1 %v7617_v44  ;;  %v7707_v44 = vld [vmem:[#allocation15 + $0x1a8] ss:$16 sps:$4 sm:$0xff]  }
 0x19f   :  { %1864 = vmatprep.subr.bf16.mxu1 %v7625_v46  ;;  %v7713_v46 = vld [vmem:[#allocation15 + $0x1c8] ss:$16 sps:$4 sm:$0xff]  }
 0x1a0   :  { %1812 = vmatpush1.bf16.msra.mxu0 %v7620_v33  ;;  %v7697_v33 = vld [vmem:[#allocation15 + $0x16c] ss:$16 sps:$4 sm:$0xff]  }
 0x1a1   :  { %2815 = vmatprep.subr.bf16.mxu0 %v7628_v36  ;;  %v7712_v36 = vld [vmem:[#allocation15 + $0x1c4] ss:$16 sps:$4 sm:$0xff]  }
 0x1a2   :  { %1865 = vmatpush1.bf16.msra.mxu1 %v7623_v51  ;;  %v8995_v51 = vshrl.u32 %v305_v48, 7 }
 0x1a3   :  { %1814 = vmatmul.mubr.bf16.vlgmr.msra.gmra.mrb[24].mxu0 %v1371_v41  ;;  %2921 = vmatprep.subr.bf16.mxu1 %v7631_v52  ;;  %v303_v52 = vld [vmem:[%s9368_s0] sm:$0xf] }
 0x1a4   :  { %2816 = vmatpush1.bf16.msra.mxu0 %v7626_v42  ;;  %1823 = vmatprep.mubr.bf16.mxu0 %v1374_v43  ;;  %v7716_v42 = vld [vmem:[#allocation15 + $0x1e0] ss:$16 sps:$4 sm:$0xff]  }
 0x1a5   :  { %2817 = vmatprep.subr.bf16.mxu0 %v7634_v45  ;;  %1867 = vmatmul.mubr.bf16.vlgmr.msra.gmra.mrb[24].mxu1 %v1371_v41  ;;  %v7709_v41 = vld [vmem:[#allocation15 + $0x1ac] ss:$16 sps:$4 sm:$0xff]  }
 0x1a6   :  { %2922 = vmatpush1.bf16.msra.mxu1 %v7629_v56  ;;  %1876 = vmatprep.mubr.bf16.mxu1 %v1374_v43  ;;  %v7724_v43 = vld [vmem:[#allocation15 + $0x204] ss:$16 sps:$4 sm:$0xff]   ;;  %v7715_v45 = vld [vmem:[#allocation15 + $0x1cc] ss:$16 sps:$4 sm:$0xff]  }
 0x1a7   :  { %2923 = vmatprep.subr.bf16.mxu1 %v7637_v57 }
 0x1a8   :  { %2818 = vmatpush1.bf16.msra.mxu0 %v7632_v47  ;;  %v7721_v47 = vld [vmem:[#allocation15 + $0x1ec] ss:$16 sps:$4 sm:$0xff]  }
 0x1a9   :  { %2819 = vmatprep.subr.bf16.mxu0 %v7640_v50  ;;  %v7727_v50 = vld [vmem:[#allocation15 + $0x20c] ss:$16 sps:$4 sm:$0xff]  }
 0x1aa   :  { %2924 = vmatpush1.bf16.msra.mxu1 %v7635_v60 }
 0x1ab   :  { %1824 = vmatmul.mubr.bf16.gmra.mrb[28].mxu0 %v1373_v53  ;;  %2925 = vmatprep.subr.bf16.mxu1 %v7643_v61 }
 0x1ac   :  { %2820 = vmatpush1.bf16.msra.mxu0 %v7638_v54  ;;  %v9004_v54 = vsub.s32 1, %v8995_v51 }
 0x1ad   :  { %2821 = vmatprep.subr.bf16.mxu0 %v7646_v55  ;;  %1877 = vmatmul.mubr.bf16.gmra.mrb[28].mxu1 %v1373_v53  ;;  %v9001_v53 = vsub.s32 0, %v8995_v51 }
 0x1ae   :  { %2926 = vmatpush1.bf16.msra.mxu1 %v7641_v0  ;;  %v9010_v56 = vrot.slane %v303_v52, %v9004_v54 }
 0x1af   :  { %2927 = vmatprep.subr.bf16.mxu1 %v7649_v1  ;;  %v9007_v55 = vrot.slane %v303_v52, %v9001_v53  ;;  %v9017_v1 = vsub.s32 2, %v8995_v51 }
 0x1b0   :  { %2822 = vmatpush1.bf16.msra.mxu0 %v7644_v58 }
 0x1b1   :  { %2823 = vmatprep.subr.bf16.mxu0 %v7652_v59 }
 0x1b2   :  { %2928 = vmatpush1.bf16.msra.mxu1 %v7647_v4  ;;  %v9020_v4 = vsub.s32 3, %v8995_v51 }
 0x1b3   :  { %2929 = vmatprep.subr.bf16.mxu1 %v7655_v5 }
 0x1b4   :  { %2824 = vmatpush1.bf16.msra.mxu0 %v7650_v62 }
 0x1b5   :  { %2825 = vmatprep.subr.bf16.mxu0 %v7658_v63 }
 0x1b6   :  { %2930 = vmatpush1.bf16.msra.mxu1 %v7653_v8  ;;  %v7725_v8 = vld [vmem:[#allocation15 + $0x208] ss:$16 sps:$4 sm:$0xff]  }
 0x1b7   :  { %2931 = vmatprep.subr.bf16.mxu1 %v7661_v9 }
 0x1b8   :  { %2826 = vmatpush1.bf16.msra.mxu0 %v7656_v2 }
 0x1b9   :  { %2827 = vmatprep.subr.bf16.mxu0 %v7664_v3 }
 0x1ba   :  { %2932 = vmatpush1.bf16.msra.mxu1 %v7659_v12  ;;  %v9023_v12 = vrot.slane %v303_v52, %v9017_v1 }
 0x1bb   :  { %2933 = vmatprep.subr.bf16.mxu1 %v7667_v13  ;;  %v7730_v13 = vld [vmem:[#allocation15 + $0x224] ss:$16 sps:$4 sm:$0xff]  }
 0x1bc   :  { %2828 = vmatpush1.bf16.msra.mxu0 %v7662_v6 }
 0x1bd   :  { %2829 = vmatprep.subr.bf16.mxu0 %v7670_v7  ;;  %v7722_v7 = vld [vmem:[#allocation15 + $0x200] ss:$16 sps:$4 sm:$0xff]  }
 0x1be   :  { %2934 = vmatpush1.bf16.msra.mxu1 %v7665_v16 }
 0x1bf   :  { %2935 = vmatprep.subr.bf16.mxu1 %v7673_v17  ;;  %v9027_v17 = vrot.slane %v303_v52, %v9020_v4 }
 0x1c0   :  { %2830 = vmatpush1.bf16.msra.mxu0 %v7668_v10 }
 0x1c1   :  { %2831 = vmatprep.subr.bf16.mxu0 %v7676_v11 }
 0x1c2   :  { %2936 = vmatpush1.bf16.msra.mxu1 %v7671_v20 }
 0x1c3   :  { %2937 = vmatprep.subr.bf16.mxu1 %v7679_v21 }
 0x1c4   :  { %2832 = vmatpush1.bf16.msra.mxu0 %v7674_v14  ;;  %v7733_v14 = vld [vmem:[#allocation15 + $0x22c] ss:$16 sps:$4 sm:$0xff]  }
 0x1c5   :  { %2833 = vmatprep.subr.bf16.mxu0 %v7682_v15 }
 0x1c6   :  { %2938 = vmatpush1.bf16.msra.mxu1 %v7677_v24 }
 0x1c7   :  { %2939 = vmatprep.subr.bf16.mxu1 %v7685_v25 }
 0x1c8   :  { %2834 = vmatpush1.bf16.msra.mxu0 %v7680_v18  ;;  %v7728_v18 = vld [vmem:[#allocation15 + $0x220] ss:$16 sps:$4 sm:$0xff]  }
 0x1c9   :  { %2835 = vmatprep.subr.bf16.mxu0 %v7688_v19  ;;  %v7731_v19 = vld [vmem:[#allocation15 + $0x228] ss:$16 sps:$4 sm:$0xff]  }
 0x1ca   :  { %2940 = vmatpush1.bf16.msra.mxu1 %v7683_v28 }
 0x1cb   :  { %2941 = vmatprep.subr.bf16.mxu1 %v7691_v29 }
 0x1cc   :  { %2836 = vmatpush1.bf16.msra.mxu0 %v7686_v22 }
 0x1cd   :  { %2837 = vmatprep.subr.bf16.mxu0 %v7694_v23 }
 0x1ce   :  { %2942 = vmatpush1.bf16.msra.mxu1 %v7689_v31  ;;  %v7739_v31 = vld [vmem:[#allocation15 + $0x24c] ss:$16 sps:$4 sm:$0xff]  }
 0x1cf   :  { %2943 = vmatprep.subr.bf16.mxu1 %v7697_v33 }
 0x1d0   :  { %2838 = vmatpush1.bf16.msra.mxu0 %v7692_v26 }
 0x1d1   :  { %2839 = vmatprep.subr.bf16.mxu0 %v7700_v27 }
 0x1d2   :  { %2944 = vmatpush1.bf16.msra.mxu1 %v7695_v35  ;;  %v7734_v35 = vld [vmem:[#allocation15 + $0x240] ss:$16 sps:$4 sm:$0xff]  }
 0x1d3   :  { %2945 = vmatprep.subr.bf16.mxu1 %v7703_v37 }
 0x1d4   :  { %2840 = vmatpush1.bf16.msra.mxu0 %v7698_v30  ;;  %v7736_v30 = vld [vmem:[#allocation15 + $0x244] ss:$16 sps:$4 sm:$0xff]  }
 0x1d5   :  { %2841 = vmatprep.subr.bf16.mxu0 %v7706_v32 }
 0x1d6   :  { %2946 = vmatpush1.bf16.msra.mxu1 %v7701_v39 }
 0x1d7   :  { %2947 = vmatprep.subr.bf16.mxu1 %v7709_v41  ;;  %v7742_v41 = vld [vmem:[#allocation15 + $0x264] ss:$16 sps:$4 sm:$0xff]  }
 0x1d8   :  { %2842 = vmatpush1.bf16.msra.mxu0 %v7704_v34 }
 0x1d9   :  { %2843 = vmatprep.subr.bf16.mxu0 %v7712_v36  ;;  %v7737_v36 = vld [vmem:[#allocation15 + $0x248] ss:$16 sps:$4 sm:$0xff]  }
 0x1da   :  { %2948 = vmatpush1.bf16.msra.mxu1 %v7707_v44 }
 0x1db   :  { %2949 = vmatprep.subr.bf16.mxu1 %v7715_v45 }
 0x1dc   :  { %2844 = vmatpush1.bf16.msra.mxu0 %v7710_v38 }
 0x1dd   :  { %2845 = vmatprep.subr.bf16.mxu0 %v7718_v40 }
 0x1de   :  { %2950 = vmatpush1.bf16.msra.mxu1 %v7713_v46 }
 0x1df   :  { %2951 = vmatprep.subr.bf16.mxu1 %v7721_v47 }
 0x1e0   :  { %2846 = vmatpush1.bf16.msra.mxu0 %v7716_v42  ;;  %v7745_v42 = vld [vmem:[#allocation15 + $0x26c] ss:$16 sps:$4 sm:$0xff]  }
 0x1e1   :  { %2868 = vmatprep.subr.bf16.mxu0 %v7724_v43 }
 0x1e2   :  { %2952 = vmatpush1.bf16.msra.mxu1 %v7719_v49 }
 0x1e3   :  { %2974 = vmatprep.subr.bf16.mxu1 %v7727_v50 }
 0x1f6   :  { %v679_v57 = vpop.f32.mrb[0].mxu0  ;;  %v752_v24 = vpop.f32.mrb[0].mxu1 }
 0x1f7   :  { %v680_v58 = vadd.f32 %v679_v57, %v9007_v55  ;;  %v681_v59 = vpop.f32.mrb[1].mxu0  ;;  %v753_v27 = vadd.f32 %v752_v24, %v9023_v12  ;;  %v754_v29 = vpop.f32.mrb[1].mxu1 }
 0x1f8   :  { %v682_v60 = vadd.f32 %v681_v59, %v9010_v56  ;;  %v683_v61 = vpop.f32.mrb[2].mxu0  ;;  %v755_v33 = vadd.f32 %v754_v29, %v9027_v17  ;;  %v756_v34 = vpop.f32.mrb[2].mxu1  ;;  %v7754_v29 = vld [vmem:[#allocation15 + $0x2a4] ss:$16 sps:$4 sm:$0xff]  }
 0x1f9   :  { %v684_v62 = vadd.f32 %v683_v61, %v9007_v55  ;;  %v685_v63 = vpop.f32.mrb[3].mxu0  ;;  %v791_v2 = vmax.f32 %v680_v58, 0.0  ;;  %v793_v37 = vmax.f32 %v753_v27, 0.0  ;;  %v757_v39 = vadd.f32 %v756_v34, %v9023_v12  ;;  %v758_v40 = vpop.f32.mrb[3].mxu1  ;;  %v7740_v61 = vld [vmem:[#allocation15 + $0x260] ss:$16 sps:$4 sm:$0xff]  }
 0x1fa   :  { %v686_v0 = vadd.f32 %v685_v63, %v9010_v56  ;;  %v792_v5 = vmax.f32 %v682_v60, 0.0  ;;  %v794_v44 = vmax.f32 %v755_v33, 0.0  ;;  %v759_v45 = vadd.f32 %v758_v40, %v9027_v17  ;;  %v7752_v34 = vld [vmem:[#allocation15 + $0x2a0] ss:$16 sps:$4 sm:$0xff]  }
 0x1fb   :  { %v795_v3 = vmax.f32 %v684_v62, 0.0  ;;  %v797_v47 = vmax.f32 %v757_v39, 0.0 }
 0x1fc   :  { %v796_v6 = vmax.f32 %v686_v0, 0.0  ;;  %v798_v50 = vmax.f32 %v759_v45, 0.0 }
 0x1fd   :  { %v2039_v9 = vpack.c.bf16 %v795_v3, %v791_v2  ;;  %v9037_v58 = vpack.c.bf16 %v797_v47, %v793_v37 }
 0x1fe   :  { %v2040_v10 = vpack.c.bf16 %v796_v6, %v792_v5  ;;  %v689_v11 = vpop.f32.mrb[4].mxu0  ;;  %v2042_v62 = vpack.c.bf16 %v798_v50, %v794_v44  ;;  %v762_v63 = vpop.f32.mrb[4].mxu1  ;;  %v7743_v5 = vld [vmem:[#allocation15 + $0x268] ss:$16 sps:$4 sm:$0xff]   ;;  %v7763_v50 = vld [vmem:[#allocation15 + $0x2cc] ss:$16 sps:$4 sm:$0xff]  }
 0x1ff   :  { %v690_v15 = vadd.f32 %v689_v11, %v9007_v55  ;;  %v691_v16 = vpop.f32.mrb[5].mxu0  ;;  %v763_v6 = vadd.f32 %v762_v63, %v9023_v12  ;;  %v7751_v11 = vld [vmem:[#allocation15 + $0x28c] ss:$16 sps:$4 sm:$0xff]  }
 0x200   :  { %2847 = vmatprep.mubr.bf16.mxu0 %v2040_v10  ;;  %2953 = vmatprep.mubr.bf16.mxu1 %v2040_v10  ;;  %v692_v20 = vadd.f32 %v691_v16, %v9010_v56  ;;  %v693_v21 = vpop.f32.mrb[6].mxu0  ;;  %v7748_v10 = vld [vmem:[#allocation15 + $0x284] ss:$16 sps:$4 sm:$0xff]   ;;  %v7746_v16 = vld [vmem:[#allocation15 + $0x280] ss:$16 sps:$4 sm:$0xff]  }
 0x201   :  { %2848 = vmatmul.mubr.bf16.vlgmr.msra.gmra.mrb[32].mxu0 %v2039_v9  ;;  %2954 = vmatmul.mubr.bf16.vlgmr.msra.gmra.mrb[32].mxu1 %v2039_v9  ;;  %v799_v22 = vmax.f32 %v690_v15, 0.0  ;;  %v694_v23 = vadd.f32 %v693_v21, %v9007_v55  ;;  %v695_v25 = vpop.f32.mrb[7].mxu0 }
 0x202   :  { %2869 = vmatpush1.bf16.msra.mxu0 %v7722_v7  ;;  %2975 = vmatpush1.bf16.msra.mxu1 %v7725_v8  ;;  %v800_v26 = vmax.f32 %v692_v20, 0.0  ;;  %v696_v28 = vadd.f32 %v695_v25, %v9010_v56  ;;  %v764_v7 = vpop.f32.mrb[5].mxu1 }
 0x203   :  { %2870 = vmatprep.subr.bf16.mxu0 %v7730_v13  ;;  %2976 = vmatprep.subr.bf16.mxu1 %v7733_v14  ;;  %v803_v32 = vmax.f32 %v694_v23, 0.0  ;;  %v765_v13 = vadd.f32 %v764_v7, %v9027_v17  ;;  %v766_v14 = vpop.f32.mrb[6].mxu1  ;;  %v7766_v7 = vld [vmem:[#allocation15 + $0x2e4] ss:$16 sps:$4 sm:$0xff]  }
 0x204   :  { %v804_v38 = vmax.f32 %v696_v28, 0.0  ;;  %v768_v20 = vpop.f32.mrb[7].mxu1 }
 0x205   :  { %v2043_v43 = vpack.c.bf16 %v803_v32, %v799_v22  ;;  %v7749_v22 = vld [vmem:[#allocation15 + $0x288] ss:$16 sps:$4 sm:$0xff]   ;;  %v802_v23 = vmax.f32 %v765_v13, 0.0  ;;  %v769_v24 = vadd.f32 %v768_v20, %v9027_v17  ;;  %v7775_v20 = vld [vmem:[#allocation15 + $0x30c] ss:$16 sps:$4 sm:$0xff]  }
 0x206   :  { %2871 = vmatpush1.bf16.msra.mxu0 %v7728_v18  ;;  %2977 = vmatpush1.bf16.msra.mxu1 %v7731_v19  ;;  %v2044_v46 = vpack.c.bf16 %v804_v38, %v800_v26  ;;  %v699_v49 = vpop.f32.mrb[8].mxu0  ;;  %v801_v18 = vmax.f32 %v763_v6, 0.0  ;;  %v767_v19 = vadd.f32 %v766_v14, %v9023_v12  ;;  %v7755_v38 = vld [vmem:[#allocation15 + $0x2a8] ss:$16 sps:$4 sm:$0xff]   ;;  %v772_v40 = vpop.f32.mrb[8].mxu1 }
 0x207   :  { %2872 = vmatprep.subr.bf16.mxu0 %v7736_v30  ;;  %2978 = vmatprep.subr.bf16.mxu1 %v7739_v31  ;;  %v700_v52 = vadd.f32 %v699_v49, %v9007_v55  ;;  %v701_v57 = vpop.f32.mrb[9].mxu0  ;;  %v7757_v30 = vld [vmem:[#allocation15 + $0x2ac] ss:$16 sps:$4 sm:$0xff]   ;;  %v806_v31 = vmax.f32 %v769_v24, 0.0  ;;  %v773_v44 = vadd.f32 %v772_v40, %v9023_v12  ;;  %v774_v45 = vpop.f32.mrb[9].mxu1 }
 0x208   :  { %2857 = vmatprep.mubr.bf16.mxu0 %v2044_v46  ;;  %2963 = vmatprep.mubr.bf16.mxu1 %v2044_v46  ;;  %v702_v59 = vadd.f32 %v701_v57, %v9010_v56  ;;  %v703_v60 = vpop.f32.mrb[10].mxu0  ;;  %v805_v26 = vmax.f32 %v767_v19, 0.0  ;;  %v7760_v49 = vld [vmem:[#allocation15 + $0x2c4] ss:$16 sps:$4 sm:$0xff]   ;;  %v776_v57 = vpop.f32.mrb[10].mxu1 }
 0x209   :  { %2858 = vmatmul.mubr.bf16.gmra.mrb[36].mxu0 %v2043_v43  ;;  %2964 = vmatmul.mubr.bf16.gmra.mrb[36].mxu1 %v2043_v43  ;;  %v807_v0 = vmax.f32 %v700_v52, 0.0  ;;  %v704_v2 = vadd.f32 %v703_v60, %v9007_v55  ;;  %v705_v3 = vpop.f32.mrb[11].mxu0  ;;  %v9054_v39 = vpack.c.bf16 %v806_v31, %v802_v23  ;;  %v775_v52 = vadd.f32 %v774_v45, %v9027_v17  ;;  %v7758_v60 = vld [vmem:[#allocation15 + $0x2c0] ss:$16 sps:$4 sm:$0xff]   ;;  %v7772_v19 = vld [vmem:[#allocation15 + $0x304] ss:$16 sps:$4 sm:$0xff]  }
 0x20a   :  { %2873 = vmatpush1.bf16.msra.mxu0 %v7734_v35  ;;  %2979 = vmatpush1.bf16.msra.mxu1 %v7737_v36  ;;  %v808_v8 = vmax.f32 %v702_v59, 0.0  ;;  %v706_v9 = vadd.f32 %v705_v3, %v9010_v56  ;;  %v9051_v35 = vpack.c.bf16 %v805_v26, %v801_v18  ;;  %v7770_v23 = vld [vmem:[#allocation15 + $0x300] ss:$16 sps:$4 sm:$0xff]   ;;  %v7773_v24 = vld [vmem:[#allocation15 + $0x308] ss:$16 sps:$4 sm:$0xff]  }
 0x20b   :  { %2874 = vmatprep.subr.bf16.mxu0 %v7742_v41  ;;  %2980 = vmatprep.subr.bf16.mxu1 %v7745_v42  ;;  %v811_v15 = vmax.f32 %v704_v2, 0.0  ;;  %v810_v2 = vmax.f32 %v775_v52, 0.0  ;;  %v7793_v45 = vld [vmem:[#allocation15 + $0x36c] ss:$16 sps:$4 sm:$0xff]   ;;  %v7794_v52 = vld [vmem:[#allocation15 + $0x380] ss:$16 sps:$4 sm:$0xff]  }
 0x20c   :  { %2900 = vmatprep.mubr.bf16.mxu0 %v2042_v62  ;;  %3006 = vmatprep.mubr.bf16.mxu1 %v2042_v62  ;;  %v812_v21 = vmax.f32 %v706_v9, 0.0  ;;  %v778_v62 = vpop.f32.mrb[11].mxu1 }
 0x20d   :  { %v9046_v25 = vpack.c.bf16 %v811_v15, %v807_v0  ;;  %v7761_v0 = vld [vmem:[#allocation15 + $0x2c8] ss:$16 sps:$4 sm:$0xff]   ;;  %v779_v3 = vadd.f32 %v778_v62, %v9027_v17  ;;  %v899_v62 = vld [vmem:[%s9337_s6] sm:$0xf] }
 0x20e   :  { %2875 = vmatpush1.bf16.msra.mxu0 %v7740_v61  ;;  %2981 = vmatpush1.bf16.msra.mxu1 %v7743_v5  ;;  %v9048_v27 = vpack.c.bf16 %v812_v21, %v808_v8  ;;  %v709_v28 = vpop.f32.mrb[12].mxu0  ;;  %v809_v61 = vmax.f32 %v773_v44, 0.0  ;;  %v7769_v8 = vld [vmem:[#allocation15 + $0x2ec] ss:$16 sps:$4 sm:$0xff]   ;;  %v782_v15 = vpop.f32.mrb[12].mxu1 }
 0x20f   :  { %2876 = vmatprep.subr.bf16.mxu0 %v7748_v10  ;;  %2982 = vmatprep.subr.bf16.mxu1 %v7751_v11  ;;  %v710_v32 = vadd.f32 %v709_v28, %v9007_v55  ;;  %v711_v33 = vpop.f32.mrb[13].mxu0  ;;  %v814_v9 = vmax.f32 %v779_v3, 0.0  ;;  %v7764_v10 = vld [vmem:[#allocation15 + $0x2e0] ss:$16 sps:$4 sm:$0xff]   ;;  %v7767_v11 = vld [vmem:[#allocation15 + $0x2e8] ss:$16 sps:$4 sm:$0xff]  }
 0x210   :  { %v712_v36 = vadd.f32 %v711_v33, %v9010_v56  ;;  %v713_v37 = vpop.f32.mrb[14].mxu0  ;;  %v784_v18 = vpop.f32.mrb[13].mxu1  ;;  %v7778_v33 = vld [vmem:[#allocation15 + $0x324] ss:$16 sps:$4 sm:$0xff]   ;;  %v7809_v3 = vld [vmem:[#allocation15 + $0x3c8] ss:$16 sps:$4 sm:$0xff]  }
 0x211   :  { %v815_v41 = vmax.f32 %v710_v32, 0.0  ;;  %v714_v42 = vadd.f32 %v713_v37, %v9007_v55  ;;  %v715_v43 = vpop.f32.mrb[15].mxu0  ;;  %v777_v55 = vadd.f32 %v776_v57, %v9023_v12  ;;  %v9068_v14 = vpack.c.bf16 %v814_v9, %v810_v2  ;;  %v7776_v37 = vld [vmem:[#allocation15 + $0x320] ss:$16 sps:$4 sm:$0xff]   ;;  %v7790_v44 = vld [vmem:[#allocation15 + $0x364] ss:$16 sps:$4 sm:$0xff]  }
 0x212   :  { %2877 = vmatpush1.bf16.msra.mxu0 %v7746_v16  ;;  %2983 = vmatpush1.bf16.msra.mxu1 %v7749_v22  ;;  %v816_v46 = vmax.f32 %v712_v36, 0.0  ;;  %v716_v47 = vadd.f32 %v715_v43, %v9010_v56  ;;  %v783_v16 = vadd.f32 %v782_v15, %v9023_v12  ;;  %v785_v21 = vadd.f32 %v784_v18, %v9027_v17  ;;  %v786_v22 = vpop.f32.mrb[14].mxu1  ;;  %v7785_v43 = vld [vmem:[#allocation15 + $0x348] ss:$16 sps:$4 sm:$0xff]   ;;  %v7806_v2 = vld [vmem:[#allocation15 + $0x3c0] ss:$16 sps:$4 sm:$0xff]  }
 0x213   :  { %2878 = vmatprep.subr.bf16.mxu0 %v7754_v29  ;;  %2984 = vmatprep.subr.bf16.mxu1 %v7757_v30  ;;  %v819_v59 = vmax.f32 %v714_v42, 0.0  ;;  %v813_v56 = vmax.f32 %v777_v55, 0.0  ;;  %v787_v28 = vadd.f32 %v786_v22, %v9023_v12  ;;  %v788_v29 = vpop.f32.mrb[15].mxu1  ;;  %v7784_v12 = vld [vmem:[#allocation15 + $0x344] ss:$16 sps:$4 sm:$0xff]  }
 0x214   :  { %v820_v63 = vmax.f32 %v716_v47, 0.0  ;;  %v817_v26 = vmax.f32 %v783_v16, 0.0  ;;  %v818_v30 = vmax.f32 %v785_v21, 0.0  ;;  %v789_v31 = vadd.f32 %v788_v29, %v9027_v17  ;;  %v7787_v17 = vld [vmem:[#allocation15 + $0x34c] ss:$16 sps:$4 sm:$0xff]  }
 0x215   :  { %v9062_v5 = vpack.c.bf16 %v819_v59, %v815_v41  ;;  %v9066_v13 = vpack.c.bf16 %v813_v56, %v809_v61  ;;  %v821_v32 = vmax.f32 %v787_v28, 0.0  ;;  %v7782_v42 = vld [vmem:[#allocation15 + $0x340] ss:$16 sps:$4 sm:$0xff]   ;;  %v7791_v47 = vld [vmem:[#allocation15 + $0x368] ss:$16 sps:$4 sm:$0xff]   ;;  %v904_v56 = vrot.slane %v899_v62, %v9001_v53 }
 0x216   :  { %2879 = vmatpush1.bf16.msra.mxu0 %v7752_v34  ;;  %2985 = vmatpush1.bf16.msra.mxu1 %v7755_v38  ;;  %v9064_v6 = vpack.c.bf16 %v820_v63, %v816_v46  ;;  %v7781_v34 = vld [vmem:[#allocation15 + $0x32c] ss:$16 sps:$4 sm:$0xff]   ;;  %v822_v36 = vmax.f32 %v789_v31, 0.0  ;;  %v7779_v38 = vld [vmem:[#allocation15 + $0x328] ss:$16 sps:$4 sm:$0xff]  }
 0x217   :  { %2880 = vmatprep.subr.bf16.mxu0 %v7760_v49  ;;  %2986 = vmatprep.subr.bf16.mxu1 %v7763_v50  ;;  %v9074_v40 = vpack.c.bf16 %v821_v32, %v817_v26  ;;  %v7788_v46 = vld [vmem:[#allocation15 + $0x360] ss:$16 sps:$4 sm:$0xff]   ;;  %v7796_v49 = vld [vmem:[#allocation15 + $0x384] ss:$16 sps:$4 sm:$0xff]   ;;  %v7799_v50 = vld [vmem:[#allocation15 + $0x38c] ss:$16 sps:$4 sm:$0xff]  }
 0x218   :  { %v9076_v41 = vpack.c.bf16 %v822_v36, %v818_v30  ;;  %v7797_v57 = vld [vmem:[#allocation15 + $0x388] ss:$16 sps:$4 sm:$0xff]   ;;  %v7802_v59 = vld [vmem:[#allocation15 + $0x3a4] ss:$16 sps:$4 sm:$0xff]   ;;  %v7800_v61 = vld [vmem:[#allocation15 + $0x3a0] ss:$16 sps:$4 sm:$0xff]  }
 0x219   :  { %v7803_v55 = vld [vmem:[#allocation15 + $0x3a8] ss:$16 sps:$4 sm:$0xff]   ;;  %v7808_v63 = vld [vmem:[#allocation15 + $0x3c4] ss:$16 sps:$4 sm:$0xff]   ;;  %v7817_v9 = vld [vmem:[#allocation15 + $0x3ec] ss:$16 sps:$4 sm:$0xff]  }
 0x21a   :  { %2881 = vmatpush1.bf16.msra.mxu0 %v7758_v60  ;;  %2987 = vmatpush1.bf16.msra.mxu1 %v7761_v0  ;;  %v7805_v60 = vld [vmem:[#allocation15 + $0x3ac] ss:$16 sps:$4 sm:$0xff]   ;;  %v7815_v15 = vld [vmem:[#allocation15 + $0x3e8] ss:$16 sps:$4 sm:$0xff]   ;;  %v7818_v30 = vld [vmem:[#allocation14] ss:$16 sps:$4 sm:$0xff]  }
 0x21b   :  { %2882 = vmatprep.subr.bf16.mxu0 %v7766_v7  ;;  %2988 = vmatprep.subr.bf16.mxu1 %v7769_v8  ;;  %v7811_v0 = vld [vmem:[#allocation15 + $0x3cc] ss:$16 sps:$4 sm:$0xff]   ;;  %v9083_v7 = vrot.slane %v899_v62, %v9004_v54  ;;  %v7814_v8 = vld [vmem:[#allocation15 + $0x3e4] ss:$16 sps:$4 sm:$0xff]   ;;  %v7821_v31 = vld [vmem:[#allocation14 + $0x8] ss:$16 sps:$4 sm:$0xff]  }
 0x21c   :  { %v7823_v26 = vld [vmem:[#allocation14 + $0xc] ss:$16 sps:$4 sm:$0xff]  }
 0x21e   :  { %2883 = vmatpush1.bf16.msra.mxu0 %v7764_v10  ;;  %2989 = vmatpush1.bf16.msra.mxu1 %v7767_v11  ;;  %v7812_v11 = vld [vmem:[#allocation15 + $0x3e0] ss:$16 sps:$4 sm:$0xff]  }
 0x21f   :  { %2884 = vmatprep.subr.bf16.mxu0 %v7772_v19  ;;  %2990 = vmatprep.subr.bf16.mxu1 %v7775_v20 }
 0x222   :  { %2885 = vmatpush1.bf16.msra.mxu0 %v7770_v23  ;;  %2991 = vmatpush1.bf16.msra.mxu1 %v7773_v24  ;;  %v7820_v24 = vld [vmem:[#allocation14 + $0x4] ss:$16 sps:$4 sm:$0xff]  }
 0x223   :  { %2886 = vmatprep.subr.bf16.mxu0 %v7778_v33  ;;  %2992 = vmatprep.subr.bf16.mxu1 %v7781_v34  ;;  %v7826_v33 = vld [vmem:[#allocation14 + $0x24] ss:$16 sps:$4 sm:$0xff]   ;;  %v7829_v34 = vld [vmem:[#allocation14 + $0x2c] ss:$16 sps:$4 sm:$0xff]  }
 0x226   :  { %2887 = vmatpush1.bf16.msra.mxu0 %v7776_v37  ;;  %2993 = vmatpush1.bf16.msra.mxu1 %v7779_v38  ;;  %v9090_v38 = vrot.slane %v899_v62, %v9017_v1 }
 0x227   :  { %2888 = vmatprep.subr.bf16.mxu0 %v7784_v12  ;;  %2994 = vmatprep.subr.bf16.mxu1 %v7787_v17  ;;  %v9095_v17 = vrot.slane %v899_v62, %v9020_v4 }
 0x22a   :  { %2889 = vmatpush1.bf16.msra.mxu0 %v7782_v42  ;;  %2995 = vmatpush1.bf16.msra.mxu1 %v7785_v43  ;;  %v7824_v43 = vld [vmem:[#allocation14 + $0x20] ss:$16 sps:$4 sm:$0xff]  }
 0x22b   :  { %2890 = vmatprep.subr.bf16.mxu0 %v7790_v44  ;;  %2996 = vmatprep.subr.bf16.mxu1 %v7793_v45  ;;  %v7827_v44 = vld [vmem:[#allocation14 + $0x28] ss:$16 sps:$4 sm:$0xff]  }
 0x22e   :  { %2891 = vmatpush1.bf16.msra.mxu0 %v7788_v46  ;;  %2997 = vmatpush1.bf16.msra.mxu1 %v7791_v47  ;;  %v7832_v47 = vld [vmem:[#allocation14 + $0x44] ss:$16 sps:$4 sm:$0xff]  }
 0x22f   :  { %2892 = vmatprep.subr.bf16.mxu0 %v7796_v49  ;;  %2998 = vmatprep.subr.bf16.mxu1 %v7799_v50  ;;  %v7835_v49 = vld [vmem:[#allocation14 + $0x4c] ss:$16 sps:$4 sm:$0xff]  }
 0x232   :  { %2893 = vmatpush1.bf16.msra.mxu0 %v7794_v52  ;;  %2999 = vmatpush1.bf16.msra.mxu1 %v7797_v57 }
 0x233   :  { %2894 = vmatprep.subr.bf16.mxu0 %v7802_v59  ;;  %3000 = vmatprep.subr.bf16.mxu1 %v7805_v60 }
 0x236   :  { %2895 = vmatpush1.bf16.msra.mxu0 %v7800_v61  ;;  %3001 = vmatpush1.bf16.msra.mxu1 %v7803_v55  ;;  %v1275_v10 = vpop.f32.mrb[16].mxu0 }
 0x237   :  { %2896 = vmatprep.subr.bf16.mxu0 %v7808_v63  ;;  %3002 = vmatprep.subr.bf16.mxu1 %v7811_v0  ;;  %v1276_v16 = vadd.f32 %v1275_v10, %v904_v56  ;;  %v1277_v18 = vpop.f32.mrb[17].mxu0 }
 0x238   :  { %v1278_v19 = vadd.f32 %v1277_v18, %v9083_v7  ;;  %v1279_v20 = vpop.f32.mrb[18].mxu0  ;;  %v1328_v50 = vpop.f32.mrb[16].mxu1 }
 0x239   :  { %v1347_v21 = vmax.f32 %v1276_v16, 0.0  ;;  %v1280_v22 = vadd.f32 %v1279_v20, %v904_v56  ;;  %v1281_v23 = vpop.f32.mrb[19].mxu0  ;;  %v1329_v59 = vadd.f32 %v1328_v50, %v9090_v38  ;;  %v1330_v60 = vpop.f32.mrb[17].mxu1  ;;  %v7841_v20 = vld [vmem:[#allocation14 + $0x6c] ss:$16 sps:$4 sm:$0xff]  }
 0x23a   :  { %2897 = vmatpush1.bf16.msra.mxu0 %v7806_v2  ;;  %3003 = vmatpush1.bf16.msra.mxu1 %v7809_v3  ;;  %v1348_v28 = vmax.f32 %v1278_v19, 0.0  ;;  %v1282_v29 = vadd.f32 %v1281_v23, %v9083_v7  ;;  %v1331_v63 = vadd.f32 %v1330_v60, %v9095_v17  ;;  %v1332_v0 = vpop.f32.mrb[18].mxu1  ;;  %v7838_v19 = vld [vmem:[#allocation14 + $0x64] ss:$16 sps:$4 sm:$0xff]  }
 0x23b   :  { %2898 = vmatprep.subr.bf16.mxu0 %v7814_v8  ;;  %3004 = vmatprep.subr.bf16.mxu1 %v7817_v9  ;;  %v1351_v32 = vmax.f32 %v1280_v22, 0.0  ;;  %v1349_v3 = vmax.f32 %v1329_v59, 0.0  ;;  %v1333_v8 = vadd.f32 %v1332_v0, %v9090_v38  ;;  %v1334_v9 = vpop.f32.mrb[19].mxu1  ;;  %v7851_v59 = vld [vmem:[#allocation14 + $0xa8] ss:$16 sps:$4 sm:$0xff]  }
 0x23c   :  { %v1352_v36 = vmax.f32 %v1282_v29, 0.0  ;;  %v1335_v16 = vadd.f32 %v1334_v9, %v9095_v17  ;;  %v7865_v0 = vld [vmem:[#allocation14 + $0xec] ss:$16 sps:$4 sm:$0xff]   ;;  %v7866_v9 = vld [vmem:[#allocation14 + $0x100] ss:$16 sps:$4 sm:$0xff]  }
 0x23d   :  { %v9087_v37 = vpack.c.bf16 %v1351_v32, %v1347_v21 }
 0x23e   :  { %2899 = vmatpush1.bf16.msra.mxu0 %v7812_v11  ;;  %3005 = vmatpush1.bf16.msra.mxu1 %v7815_v15  ;;  %v9092_v12 = vpack.c.bf16 %v1352_v36, %v1348_v28  ;;  %v1285_v42 = vpop.f32.mrb[20].mxu0  ;;  %v7830_v11 = vld [vmem:[#allocation14 + $0x40] ss:$16 sps:$4 sm:$0xff]   ;;  %v1350_v15 = vmax.f32 %v1331_v63, 0.0  ;;  %v7862_v63 = vld [vmem:[#allocation14 + $0xe4] ss:$16 sps:$4 sm:$0xff]  }
 0x23f   :  { %3667 = vmatprep.subr.bf16.mxu0 %v7820_v24  ;;  %3773 = vmatprep.subr.bf16.mxu1 %v7823_v26  ;;  %v1286_v45 = vadd.f32 %v1285_v42, %v904_v56  ;;  %v1287_v46 = vpop.f32.mrb[21].mxu0  ;;  %v7836_v24 = vld [vmem:[#allocation14 + $0x60] ss:$16 sps:$4 sm:$0xff]   ;;  %v7839_v26 = vld [vmem:[#allocation14 + $0x68] ss:$16 sps:$4 sm:$0xff]  }
 0x240   :  { %v1288_v52 = vadd.f32 %v1287_v46, %v9083_v7  ;;  %v1289_v57 = vpop.f32.mrb[22].mxu0  ;;  %v1338_v29 = vpop.f32.mrb[20].mxu1  ;;  %v7845_v42 = vld [vmem:[#allocation14 + $0x88] ss:$16 sps:$4 sm:$0xff]   ;;  %v7850_v46 = vld [vmem:[#allocation14 + $0xa4] ss:$16 sps:$4 sm:$0xff]  }
 0x241   :  { %2901 = vmatmul.mubr.bf16.vlgmr.msra.gmra.mrb[32].mxu0 %v9037_v58  ;;  %3007 = vmatmul.mubr.bf16.vlgmr.msra.gmra.mrb[32].mxu1 %v9037_v58  ;;  %v1355_v61 = vmax.f32 %v1286_v45, 0.0  ;;  %v1290_v55 = vadd.f32 %v1289_v57, %v904_v56  ;;  %v1291_v62 = vpop.f32.mrb[23].mxu0  ;;  %v7833_v56 = vld [vmem:[#allocation14 + $0x48] ss:$16 sps:$4 sm:$0xff]   ;;  %v1339_v32 = vadd.f32 %v1338_v29, %v9090_v38  ;;  %v7848_v57 = vld [vmem:[#allocation14 + $0xa0] ss:$16 sps:$4 sm:$0xff]  }
 0x242   :  { %3668 = vmatpush1.bf16.msra.mxu0 %v7818_v30  ;;  %3774 = vmatpush1.bf16.msra.mxu1 %v7821_v31  ;;  %v1356_v58 = vmax.f32 %v1288_v52, 0.0  ;;  %v1292_v2 = vadd.f32 %v1291_v62, %v9083_v7  ;;  %v1353_v7 = vmax.f32 %v1333_v8, 0.0  ;;  %v7844_v30 = vld [vmem:[#allocation14 + $0x84] ss:$16 sps:$4 sm:$0xff]   ;;  %v7847_v31 = vld [vmem:[#allocation14 + $0x8c] ss:$16 sps:$4 sm:$0xff]  }
 0x243   :  { %3669 = vmatprep.subr.bf16.mxu0 %v7826_v33  ;;  %3775 = vmatprep.subr.bf16.mxu1 %v7829_v34  ;;  %v1359_v10 = vmax.f32 %v1290_v55, 0.0  ;;  %v1340_v33 = vpop.f32.mrb[21].mxu1  ;;  %v7859_v55 = vld [vmem:[#allocation14 + $0xcc] ss:$16 sps:$4 sm:$0xff]   ;;  %v7887_v29 = vld [vmem:[#allocation14 + $0x168] ss:$16 sps:$4 sm:$0xff]  }
 0x244   :  { %2910 = vmatprep.mubr.bf16.mxu0 %v9054_v39  ;;  %3016 = vmatprep.mubr.bf16.mxu1 %v9054_v39  ;;  %v1360_v18 = vmax.f32 %v1292_v2, 0.0  ;;  %v1354_v39 = vmax.f32 %v1335_v16, 0.0  ;;  %v9111_v23 = vpack.c.bf16 %v1353_v7, %v1349_v3  ;;  %v1341_v34 = vadd.f32 %v1340_v33, %v9095_v17  ;;  %v1342_v36 = vpop.f32.mrb[22].mxu1  ;;  %v7863_v2 = vld [vmem:[#allocation14 + $0xe8] ss:$16 sps:$4 sm:$0xff]  }
 0x245   :  { %v9107_v21 = vpack.c.bf16 %v1359_v10, %v1355_v61  ;;  %v1344_v45 = vpop.f32.mrb[23].mxu1  ;;  %v7856_v61 = vld [vmem:[#allocation14 + $0xc4] ss:$16 sps:$4 sm:$0xff]   ;;  %v7871_v8 = vld [vmem:[#allocation14 + $0x10c] ss:$16 sps:$4 sm:$0xff]  }
 0x246   :  { %3670 = vmatpush1.bf16.msra.mxu0 %v7824_v43  ;;  %3776 = vmatpush1.bf16.msra.mxu1 %v7827_v44  ;;  %v9109_v22 = vpack.c.bf16 %v1360_v18, %v1356_v58  ;;  %v9115_v28 = vpack.c.bf16 %v1354_v39, %v1350_v15  ;;  %v1357_v43 = vmax.f32 %v1339_v32, 0.0  ;;  %v1343_v44 = vadd.f32 %v1342_v36, %v9090_v38  ;;  %v7854_v38 = vld [vmem:[#allocation14 + $0xc0] ss:$16 sps:$4 sm:$0xff]   ;;  %v7868_v3 = vld [vmem:[#allocation14 + $0x104] ss:$16 sps:$4 sm:$0xff]  }
 0x247   :  { %3671 = vmatprep.subr.bf16.mxu0 %v7832_v47  ;;  %3777 = vmatprep.subr.bf16.mxu1 %v7835_v49  ;;  %v7853_v47 = vld [vmem:[#allocation14 + $0xac] ss:$16 sps:$4 sm:$0xff]   ;;  %v1358_v49 = vmax.f32 %v1341_v34, 0.0  ;;  %v1345_v50 = vadd.f32 %v1344_v45, %v9095_v17  ;;  %v7857_v17 = vld [vmem:[#allocation14 + $0xc8] ss:$16 sps:$4 sm:$0xff]  }
 0x248   :  { %v1361_v52 = vmax.f32 %v1343_v44, 0.0  ;;  %v7860_v58 = vld [vmem:[#allocation14 + $0xe0] ss:$16 sps:$4 sm:$0xff]   ;;  %v7869_v10 = vld [vmem:[#allocation14 + $0x108] ss:$16 sps:$4 sm:$0xff]  }
 0x249   :  { %2911 = vmatmul.mubr.bf16.gmra.mrb[36].mxu0 %v9051_v35  ;;  %3017 = vmatmul.mubr.bf16.gmra.mrb[36].mxu1 %v9051_v35  ;;  %v7842_v35 = vld [vmem:[#allocation14 + $0x80] ss:$16 sps:$4 sm:$0xff]   ;;  %v7875_v16 = vld [vmem:[#allocation14 + $0x128] ss:$16 sps:$4 sm:$0xff]   ;;  %v7880_v18 = vld [vmem:[#allocation14 + $0x144] ss:$16 sps:$4 sm:$0xff]  }
 0x24a   :  { %3672 = vmatpush1.bf16.msra.mxu0 %v7830_v11  ;;  %3778 = vmatpush1.bf16.msra.mxu1 %v7833_v56  ;;  %v9123_v60 = vpack.c.bf16 %v1361_v52, %v1357_v43  ;;  %v7874_v11 = vld [vmem:[#allocation14 + $0x124] ss:$16 sps:$4 sm:$0xff]   ;;  %v7877_v56 = vld [vmem:[#allocation14 + $0x12c] ss:$16 sps:$4 sm:$0xff]   ;;  %v7872_v15 = vld [vmem:[#allocation14 + $0x120] ss:$16 sps:$4 sm:$0xff]  }
 0x24b   :  { %3699 = vmatprep.mubr.bf16.mxu0 %v9048_v27  ;;  %3805 = vmatprep.mubr.bf16.mxu1 %v9048_v27  ;;  %v1362_v27 = vmax.f32 %v1345_v50, 0.0  ;;  %v7881_v7 = vld [vmem:[#allocation14 + $0x148] ss:$16 sps:$4 sm:$0xff]   ;;  %v7886_v39 = vld [vmem:[#allocation14 + $0x164] ss:$16 sps:$4 sm:$0xff]  }
 0x24c   :  { %3673 = vmatprep.subr.bf16.mxu0 %v7838_v19  ;;  %3779 = vmatprep.subr.bf16.mxu1 %v7841_v20  ;;  %v7883_v19 = vld [vmem:[#allocation14 + $0x14c] ss:$16 sps:$4 sm:$0xff]   ;;  %v7878_v20 = vld [vmem:[#allocation14 + $0x140] ss:$16 sps:$4 sm:$0xff]   ;;  %v7893_v33 = vld [vmem:[#allocation14 + $0x188] ss:$16 sps:$4 sm:$0xff]  }
 0x24d   :  { %v9125_v62 = vpack.c.bf16 %v1362_v27, %v1358_v49  ;;  %v7890_v32 = vld [vmem:[#allocation14 + $0x180] ss:$16 sps:$4 sm:$0xff]   ;;  %v7898_v34 = vld [vmem:[#allocation14 + $0x1a4] ss:$16 sps:$4 sm:$0xff]   ;;  %v7901_v36 = vld [vmem:[#allocation14 + $0x1ac] ss:$16 sps:$4 sm:$0xff]  }
 0x24e   :  { %3674 = vmatpush1.bf16.msra.mxu0 %v7836_v24  ;;  %3780 = vmatpush1.bf16.msra.mxu1 %v7839_v26  ;;  %v7889_v24 = vld [vmem:[#allocation14 + $0x16c] ss:$16 sps:$4 sm:$0xff]   ;;  %v7884_v26 = vld [vmem:[#allocation14 + $0x160] ss:$16 sps:$4 sm:$0xff]   ;;  %v7904_v43 = vld [vmem:[#allocation14 + $0x1c4] ss:$16 sps:$4 sm:$0xff]  }
 0x24f   :  { %3675 = vmatprep.subr.bf16.mxu0 %v7844_v30  ;;  %3781 = vmatprep.subr.bf16.mxu1 %v7847_v31  ;;  %v7892_v30 = vld [vmem:[#allocation14 + $0x184] ss:$16 sps:$4 sm:$0xff]   ;;  %v7895_v31 = vld [vmem:[#allocation14 + $0x18c] ss:$16 sps:$4 sm:$0xff]   ;;  %v1439_v45 = vld [vmem:[%s9339_s8] sm:$0xf] }
 0x250   :  { %v7907_v44 = vld [vmem:[#allocation14 + $0x1cc] ss:$16 sps:$4 sm:$0xff]   ;;  %v1444_v49 = vrot.slane %v1439_v45, %v9001_v53  ;;  %v7910_v50 = vld [vmem:[#allocation14 + $0x1e4] ss:$16 sps:$4 sm:$0xff]   ;;  %v1448_v27 = vrot.slane %v1439_v45, %v9004_v54 }
 0x251   :  { %v7913_v52 = vld [vmem:[#allocation14 + $0x1ec] ss:$16 sps:$4 sm:$0xff]  }
 0x252   :  { %3676 = vmatpush1.bf16.msra.mxu0 %v7842_v35  ;;  %3782 = vmatpush1.bf16.msra.mxu1 %v7845_v42  ;;  %v7896_v35 = vld [vmem:[#allocation14 + $0x1a0] ss:$16 sps:$4 sm:$0xff]   ;;  %v7899_v42 = vld [vmem:[#allocation14 + $0x1a8] ss:$16 sps:$4 sm:$0xff]  }
 0x253   :  { %3677 = vmatprep.subr.bf16.mxu0 %v7850_v46  ;;  %3783 = vmatprep.subr.bf16.mxu1 %v7853_v47  ;;  %v7902_v46 = vld [vmem:[#allocation14 + $0x1c0] ss:$16 sps:$4 sm:$0xff]   ;;  %v7905_v47 = vld [vmem:[#allocation14 + $0x1c8] ss:$16 sps:$4 sm:$0xff]  }
 0x256   :  { %3678 = vmatpush1.bf16.msra.mxu0 %v7848_v57  ;;  %3784 = vmatpush1.bf16.msra.mxu1 %v7851_v59  ;;  %v7908_v59 = vld [vmem:[#allocation14 + $0x1e0] ss:$16 sps:$4 sm:$0xff]  }
 0x257   :  { %3679 = vmatprep.subr.bf16.mxu0 %v7856_v61  ;;  %3785 = vmatprep.subr.bf16.mxu1 %v7859_v55  ;;  %v7911_v61 = vld [vmem:[#allocation14 + $0x1e8] ss:$16 sps:$4 sm:$0xff]  }
 0x25a   :  { %3680 = vmatpush1.bf16.msra.mxu0 %v7854_v38  ;;  %3786 = vmatpush1.bf16.msra.mxu1 %v7857_v17  ;;  %v7916_v17 = vld [vmem:[#allocation14 + $0x204] ss:$16 sps:$4 sm:$0xff]  }
 0x25b   :  { %3681 = vmatprep.subr.bf16.mxu0 %v7862_v63  ;;  %3787 = vmatprep.subr.bf16.mxu1 %v7865_v0  ;;  %v7919_v63 = vld [vmem:[#allocation14 + $0x20c] ss:$16 sps:$4 sm:$0xff]  }
 0x25e   :  { %3682 = vmatpush1.bf16.msra.mxu0 %v7860_v58  ;;  %3788 = vmatpush1.bf16.msra.mxu1 %v7863_v2 }
 0x25f   :  { %3683 = vmatprep.subr.bf16.mxu0 %v7868_v3  ;;  %3789 = vmatprep.subr.bf16.mxu1 %v7871_v8 }
 0x262   :  { %3684 = vmatpush1.bf16.msra.mxu0 %v7866_v9  ;;  %3790 = vmatpush1.bf16.msra.mxu1 %v7869_v10 }
 0x263   :  { %3685 = vmatprep.subr.bf16.mxu0 %v7874_v11  ;;  %3791 = vmatprep.subr.bf16.mxu1 %v7877_v56  ;;  %v7914_v56 = vld [vmem:[#allocation14 + $0x200] ss:$16 sps:$4 sm:$0xff]  }
 0x266   :  { %3686 = vmatpush1.bf16.msra.mxu0 %v7872_v15  ;;  %3792 = vmatpush1.bf16.msra.mxu1 %v7875_v16  ;;  %v7917_v15 = vld [vmem:[#allocation14 + $0x208] ss:$16 sps:$4 sm:$0xff]  }
 0x267   :  { %3687 = vmatprep.subr.bf16.mxu0 %v7880_v18  ;;  %3793 = vmatprep.subr.bf16.mxu1 %v7883_v19  ;;  %v7922_v18 = vld [vmem:[#allocation14 + $0x224] ss:$16 sps:$4 sm:$0xff]   ;;  %v7925_v19 = vld [vmem:[#allocation14 + $0x22c] ss:$16 sps:$4 sm:$0xff]  }
 0x26a   :  { %3688 = vmatpush1.bf16.msra.mxu0 %v7878_v20  ;;  %3794 = vmatpush1.bf16.msra.mxu1 %v7881_v7  ;;  %v9135_v7 = vrot.slane %v1439_v45, %v9017_v1 }
 0x26b   :  { %3689 = vmatprep.subr.bf16.mxu0 %v7886_v39  ;;  %3795 = vmatprep.subr.bf16.mxu1 %v7889_v24  ;;  %v9140_v24 = vrot.slane %v1439_v45, %v9020_v4 }
 0x26e   :  { %3690 = vmatpush1.bf16.msra.mxu0 %v7884_v26  ;;  %3796 = vmatpush1.bf16.msra.mxu1 %v7887_v29 }
 0x26f   :  { %3691 = vmatprep.subr.bf16.mxu0 %v7892_v30  ;;  %3797 = vmatprep.subr.bf16.mxu1 %v7895_v31  ;;  %v7920_v31 = vld [vmem:[#allocation14 + $0x220] ss:$16 sps:$4 sm:$0xff]  }
 0x272   :  { %3692 = vmatpush1.bf16.msra.mxu0 %v7890_v32  ;;  %3798 = vmatpush1.bf16.msra.mxu1 %v7893_v33  ;;  %v7923_v32 = vld [vmem:[#allocation14 + $0x228] ss:$16 sps:$4 sm:$0xff]  }
 0x273   :  { %3693 = vmatprep.subr.bf16.mxu0 %v7898_v34  ;;  %3799 = vmatprep.subr.bf16.mxu1 %v7901_v36 }
 0x276   :  { %3694 = vmatpush1.bf16.msra.mxu0 %v7896_v35  ;;  %3800 = vmatpush1.bf16.msra.mxu1 %v7899_v42  ;;  %v1815_v57 = vpop.f32.mrb[24].mxu0  ;;  %v7928_v35 = vld [vmem:[#allocation14 + $0x244] ss:$16 sps:$4 sm:$0xff]  }
 0x277   :  { %3695 = vmatprep.subr.bf16.mxu0 %v7904_v43  ;;  %3801 = vmatprep.subr.bf16.mxu1 %v7907_v44  ;;  %v1816_v55 = vadd.f32 %v1815_v57, %v1444_v49  ;;  %v1817_v38 = vpop.f32.mrb[25].mxu0 }
 0x278   :  { %v1818_v0 = vadd.f32 %v1817_v38, %v1448_v27  ;;  %v1819_v58 = vpop.f32.mrb[26].mxu0  ;;  %v1868_v33 = vpop.f32.mrb[24].mxu1 }
 0x279   :  { %v1887_v2 = vmax.f32 %v1816_v55, 0.0  ;;  %v1820_v3 = vadd.f32 %v1819_v58, %v1444_v49  ;;  %v1821_v8 = vpop.f32.mrb[27].mxu0  ;;  %v1869_v42 = vadd.f32 %v1868_v33, %v9135_v7  ;;  %v1870_v43 = vpop.f32.mrb[25].mxu1  ;;  %v7934_v58 = vld [vmem:[#allocation14 + $0x264] ss:$16 sps:$4 sm:$0xff]  }
 0x27a   :  { %3696 = vmatpush1.bf16.msra.mxu0 %v7902_v46  ;;  %3802 = vmatpush1.bf16.msra.mxu1 %v7905_v47  ;;  %v1888_v9 = vmax.f32 %v1818_v0, 0.0  ;;  %v1822_v10 = vadd.f32 %v1821_v8, %v1448_v27  ;;  %v7931_v47 = vld [vmem:[#allocation14 + $0x24c] ss:$16 sps:$4 sm:$0xff]  }
 0x27b   :  { %3697 = vmatprep.subr.bf16.mxu0 %v7910_v50  ;;  %3803 = vmatprep.subr.bf16.mxu1 %v7913_v52  ;;  %v1891_v11 = vmax.f32 %v1820_v3, 0.0  ;;  %v1872_v50 = vpop.f32.mrb[26].mxu1 }
 0x27c   :  { %v1892_v16 = vmax.f32 %v1822_v10, 0.0  ;;  %v1874_v55 = vpop.f32.mrb[27].mxu1 }
 0x27d   :  { %v9132_v20 = vpack.c.bf16 %v1891_v11, %v1887_v2  ;;  %v1875_v0 = vadd.f32 %v1874_v55, %v9140_v24  ;;  %v7937_v2 = vld [vmem:[#allocation14 + $0x26c] ss:$16 sps:$4 sm:$0xff]   ;;  %v7956_v55 = vld [vmem:[#allocation14 + $0x2e0] ss:$16 sps:$4 sm:$0xff]  }
 0x27e   :  { %3698 = vmatpush1.bf16.msra.mxu0 %v7908_v59  ;;  %3804 = vmatpush1.bf16.msra.mxu1 %v7911_v61  ;;  %v9137_v39 = vpack.c.bf16 %v1892_v16, %v1888_v9  ;;  %v1825_v26 = vpop.f32.mrb[28].mxu0  ;;  %v1889_v59 = vmax.f32 %v1869_v42, 0.0  ;;  %v1873_v61 = vadd.f32 %v1872_v50, %v9135_v7  ;;  %v7955_v50 = vld [vmem:[#allocation14 + $0x2cc] ss:$16 sps:$4 sm:$0xff]  }
 0x27f   :  { %3720 = vmatprep.subr.bf16.mxu0 %v7916_v17  ;;  %3826 = vmatprep.subr.bf16.mxu1 %v7919_v63  ;;  %v1826_v29 = vadd.f32 %v1825_v26, %v1444_v49  ;;  %v1827_v30 = vpop.f32.mrb[29].mxu0  ;;  %v7926_v17 = vld [vmem:[#allocation14 + $0x240] ss:$16 sps:$4 sm:$0xff]   ;;  %v7929_v63 = vld [vmem:[#allocation14 + $0x248] ss:$16 sps:$4 sm:$0xff]  }
 0x280   :  { %v1828_v34 = vadd.f32 %v1827_v30, %v1448_v27  ;;  %v1829_v36 = vpop.f32.mrb[30].mxu0  ;;  %v1893_v3 = vmax.f32 %v1873_v61, 0.0  ;;  %v7940_v26 = vld [vmem:[#allocation14 + $0x284] ss:$16 sps:$4 sm:$0xff]   ;;  %v7961_v61 = vld [vmem:[#allocation14 + $0x2ec] ss:$16 sps:$4 sm:$0xff]  }
 0x281   :  { %3700 = vmatmul.mubr.bf16.vlgmr.msra.gmra.mrb[32].mxu0 %v9046_v25  ;;  %3806 = vmatmul.mubr.bf16.vlgmr.msra.gmra.mrb[32].mxu1 %v9046_v25  ;;  %v1895_v44 = vmax.f32 %v1826_v29, 0.0  ;;  %v1830_v45 = vadd.f32 %v1829_v36, %v1444_v49  ;;  %v1831_v46 = vpop.f32.mrb[31].mxu0  ;;  %v1871_v25 = vadd.f32 %v1870_v43, %v9140_v24  ;;  %v7946_v43 = vld [vmem:[#allocation14 + $0x2a4] ss:$16 sps:$4 sm:$0xff]  }
 0x282   :  { %3709 = vmatprep.mubr.bf16.mxu0 %v9064_v6  ;;  %3721 = vmatpush1.bf16.msra.mxu0 %v7914_v56  ;;  %v1896_v52 = vmax.f32 %v1828_v34, 0.0  ;;  %v1832_v57 = vadd.f32 %v1831_v46, %v1448_v27  ;;  %v1894_v27 = vmax.f32 %v1875_v0, 0.0  ;;  %v9154_v10 = vpack.c.bf16 %v1893_v3, %v1889_v59  ;;  %v1878_v56 = vpop.f32.mrb[28].mxu1  ;;  %v7958_v59 = vld [vmem:[#allocation14 + $0x2e4] ss:$16 sps:$4 sm:$0xff]  }
 0x283   :  { %3815 = vmatprep.mubr.bf16.mxu1 %v9064_v6  ;;  %3827 = vmatpush1.bf16.msra.mxu1 %v7917_v15  ;;  %v1899_v38 = vmax.f32 %v1830_v45, 0.0  ;;  %v1890_v49 = vmax.f32 %v1871_v25, 0.0  ;;  %v7932_v15 = vld [vmem:[#allocation14 + $0x260] ss:$16 sps:$4 sm:$0xff]   ;;  %v1879_v16 = vadd.f32 %v1878_v56, %v9135_v7  ;;  %v7949_v45 = vld [vmem:[#allocation14 + $0x2ac] ss:$16 sps:$4 sm:$0xff]  }
 0x284   :  { %3722 = vmatprep.subr.bf16.mxu0 %v7922_v18  ;;  %3828 = vmatprep.subr.bf16.mxu1 %v7925_v19  ;;  %v1900_v6 = vmax.f32 %v1832_v57, 0.0  ;;  %v1880_v18 = vpop.f32.mrb[29].mxu1  ;;  %v7935_v19 = vld [vmem:[#allocation14 + $0x268] ss:$16 sps:$4 sm:$0xff]   ;;  %v7979_v56 = vld [vmem:[#allocation14 + $0x34c] ss:$16 sps:$4 sm:$0xff]  }
 0x285   :  { %v9150_v8 = vpack.c.bf16 %v1899_v38, %v1895_v44  ;;  %v9158_v11 = vpack.c.bf16 %v1894_v27, %v1890_v49  ;;  %v1881_v29 = vadd.f32 %v1880_v18, %v9140_v24  ;;  %v1882_v30 = vpop.f32.mrb[30].mxu1  ;;  %v7947_v25 = vld [vmem:[#allocation14 + $0x2a8] ss:$16 sps:$4 sm:$0xff]   ;;  %v7962_v49 = vld [vmem:[#allocation14 + $0x300] ss:$16 sps:$4 sm:$0xff]  }
 0x286   :  { %3723 = vmatpush1.bf16.msra.mxu0 %v7920_v31  ;;  %v9152_v9 = vpack.c.bf16 %v1900_v6, %v1896_v52  ;;  %v1897_v31 = vmax.f32 %v1879_v16, 0.0  ;;  %v1884_v33 = vpop.f32.mrb[31].mxu1  ;;  %v7950_v52 = vld [vmem:[#allocation14 + $0x2c0] ss:$16 sps:$4 sm:$0xff]   ;;  %v7953_v57 = vld [vmem:[#allocation14 + $0x2c8] ss:$16 sps:$4 sm:$0xff]  }
 0x287   :  { %3829 = vmatpush1.bf16.msra.mxu1 %v7923_v32  ;;  %3724 = vmatprep.subr.bf16.mxu0 %v7928_v35  ;;  %v1883_v32 = vadd.f32 %v1882_v30, %v9135_v7  ;;  %v1898_v34 = vmax.f32 %v1881_v29, 0.0  ;;  %v1885_v36 = vadd.f32 %v1884_v33, %v9140_v24  ;;  %v7938_v35 = vld [vmem:[#allocation14 + $0x280] ss:$16 sps:$4 sm:$0xff]   ;;  %v7952_v24 = vld [vmem:[#allocation14 + $0x2c4] ss:$16 sps:$4 sm:$0xff]  }
 0x288   :  { %3830 = vmatprep.subr.bf16.mxu1 %v7931_v47  ;;  %v7944_v7 = vld [vmem:[#allocation14 + $0x2a0] ss:$16 sps:$4 sm:$0xff]   ;;  %v7959_v38 = vld [vmem:[#allocation14 + $0x2e8] ss:$16 sps:$4 sm:$0xff]   ;;  %v7970_v6 = vld [vmem:[#allocation14 + $0x324] ss:$16 sps:$4 sm:$0xff]  }
 0x289   :  { %3710 = vmatmul.mubr.bf16.gmra.mrb[36].mxu0 %v9062_v5  ;;  %3816 = vmatmul.mubr.bf16.gmra.mrb[36].mxu1 %v9062_v5  ;;  %v7943_v5 = vld [vmem:[#allocation14 + $0x28c] ss:$16 sps:$4 sm:$0xff]   ;;  %v1901_v42 = vmax.f32 %v1883_v32, 0.0  ;;  %v1902_v44 = vmax.f32 %v1885_v36, 0.0  ;;  %v7965_v0 = vld [vmem:[#allocation14 + $0x308] ss:$16 sps:$4 sm:$0xff]  }
 0x28a   :  { %3725 = vmatpush1.bf16.msra.mxu0 %v7926_v17  ;;  %3752 = vmatprep.mubr.bf16.mxu0 %v9068_v14  ;;  %v7964_v17 = vld [vmem:[#allocation14 + $0x304] ss:$16 sps:$4 sm:$0xff]   ;;  %v7971_v3 = vld [vmem:[#allocation14 + $0x328] ss:$16 sps:$4 sm:$0xff]   ;;  %v7992_v36 = vld [vmem:[#allocation14 + $0x3a0] ss:$16 sps:$4 sm:$0xff]  }
 0x28b   :  { %3831 = vmatpush1.bf16.msra.mxu1 %v7929_v63  ;;  %3858 = vmatprep.mubr.bf16.mxu1 %v9068_v14  ;;  %v7941_v14 = vld [vmem:[#allocation14 + $0x288] ss:$16 sps:$4 sm:$0xff]   ;;  %v9166_v46 = vpack.c.bf16 %v1901_v42, %v1897_v31  ;;  %v9168_v47 = vpack.c.bf16 %v1902_v44, %v1898_v34  ;;  %v7967_v63 = vld [vmem:[#allocation14 + $0x30c] ss:$16 sps:$4 sm:$0xff]   ;;  %v7976_v27 = vld [vmem:[#allocation14 + $0x344] ss:$16 sps:$4 sm:$0xff]  }
 0x28c   :  { %3726 = vmatprep.subr.bf16.mxu0 %v7934_v58  ;;  %3832 = vmatprep.subr.bf16.mxu1 %v7937_v2  ;;  %v7973_v58 = vld [vmem:[#allocation14 + $0x32c] ss:$16 sps:$4 sm:$0xff]   ;;  %v7968_v2 = vld [vmem:[#allocation14 + $0x320] ss:$16 sps:$4 sm:$0xff]   ;;  %v7977_v16 = vld [vmem:[#allocation14 + $0x348] ss:$16 sps:$4 sm:$0xff]  }
 0x28d   :  { %v7982_v18 = vld [vmem:[#allocation14 + $0x364] ss:$16 sps:$4 sm:$0xff]   ;;  %v7983_v29 = vld [vmem:[#allocation14 + $0x368] ss:$16 sps:$4 sm:$0xff]   ;;  %v7986_v31 = vld [vmem:[#allocation14 + $0x380] ss:$16 sps:$4 sm:$0xff]  }
 0x28e   :  { %3727 = vmatpush1.bf16.msra.mxu0 %v7932_v15  ;;  %v7974_v15 = vld [vmem:[#allocation14 + $0x340] ss:$16 sps:$4 sm:$0xff]   ;;  %v7988_v30 = vld [vmem:[#allocation14 + $0x384] ss:$16 sps:$4 sm:$0xff]   ;;  %v7989_v32 = vld [vmem:[#allocation14 + $0x388] ss:$16 sps:$4 sm:$0xff]  }
 0x28f   :  { %3833 = vmatpush1.bf16.msra.mxu1 %v7935_v19  ;;  %3728 = vmatprep.subr.bf16.mxu0 %v7940_v26  ;;  %v7985_v19 = vld [vmem:[#allocation14 + $0x36c] ss:$16 sps:$4 sm:$0xff]   ;;  %v7980_v26 = vld [vmem:[#allocation14 + $0x360] ss:$16 sps:$4 sm:$0xff]   ;;  %v7994_v33 = vld [vmem:[#allocation14 + $0x3a4] ss:$16 sps:$4 sm:$0xff]  }
 0x290   :  { %3834 = vmatprep.subr.bf16.mxu1 %v7943_v5  ;;  %v7991_v5 = vld [vmem:[#allocation14 + $0x38c] ss:$16 sps:$4 sm:$0xff]   ;;  %v8000_v42 = vld [vmem:[#allocation14 + $0x3c4] ss:$16 sps:$4 sm:$0xff]   ;;  %v8001_v44 = vld [vmem:[#allocation14 + $0x3c8] ss:$16 sps:$4 sm:$0xff]  }
 0x291   :  { %v7997_v34 = vld [vmem:[#allocation14 + $0x3ac] ss:$16 sps:$4 sm:$0xff]  }
 0x292   :  { %3729 = vmatpush1.bf16.msra.mxu0 %v7938_v35  ;;  %v7995_v35 = vld [vmem:[#allocation14 + $0x3a8] ss:$16 sps:$4 sm:$0xff]  }
 0x293   :  { %3835 = vmatpush1.bf16.msra.mxu1 %v7941_v14  ;;  %3730 = vmatprep.subr.bf16.mxu0 %v7946_v43  ;;  %v8003_v14 = vld [vmem:[#allocation14 + $0x3cc] ss:$16 sps:$4 sm:$0xff]   ;;  %v7998_v43 = vld [vmem:[#allocation14 + $0x3c0] ss:$16 sps:$4 sm:$0xff]  }
 0x294   :  { %3836 = vmatprep.subr.bf16.mxu1 %v7949_v45  ;;  %v8006_v45 = vld [vmem:[#allocation14 + $0x3e4] ss:$16 sps:$4 sm:$0xff]  }
 0x296   :  { %3731 = vmatpush1.bf16.msra.mxu0 %v7944_v7  ;;  %v8009_v7 = vld [vmem:[#allocation14 + $0x3ec] ss:$16 sps:$4 sm:$0xff]  }
 0x297   :  { %3837 = vmatpush1.bf16.msra.mxu1 %v7947_v25  ;;  %3732 = vmatprep.subr.bf16.mxu0 %v7952_v24  ;;  %v8004_v25 = vld [vmem:[#allocation14 + $0x3e0] ss:$16 sps:$4 sm:$0xff]   ;;  %v8007_v24 = vld [vmem:[#allocation14 + $0x3e8] ss:$16 sps:$4 sm:$0xff]  }
 0x298   :  { %3838 = vmatprep.subr.bf16.mxu1 %v7955_v50  ;;  %v8012_v50 = vld [vmem:[#allocation17 + $0x4] ss:$16 sps:$4 sm:$0xff]  }
 0x29a   :  { %3733 = vmatpush1.bf16.msra.mxu0 %v7950_v52  ;;  %v8015_v52 = vld [vmem:[#allocation17 + $0xc] ss:$16 sps:$4 sm:$0xff]  }
 0x29b   :  { %3839 = vmatpush1.bf16.msra.mxu1 %v7953_v57  ;;  %3734 = vmatprep.subr.bf16.mxu0 %v7958_v59  ;;  %v8010_v57 = vld [vmem:[#allocation17] ss:$16 sps:$4 sm:$0xff]   ;;  %v8013_v59 = vld [vmem:[#allocation17 + $0x8] ss:$16 sps:$4 sm:$0xff]  }
 0x29c   :  { %3840 = vmatprep.subr.bf16.mxu1 %v7961_v61  ;;  %v8018_v61 = vld [vmem:[#allocation17 + $0x24] ss:$16 sps:$4 sm:$0xff]  }
 0x29e   :  { %3735 = vmatpush1.bf16.msra.mxu0 %v7956_v55  ;;  %v8021_v55 = vld [vmem:[#allocation17 + $0x2c] ss:$16 sps:$4 sm:$0xff]  }
 0x29f   :  { %3841 = vmatpush1.bf16.msra.mxu1 %v7959_v38  ;;  %3736 = vmatprep.subr.bf16.mxu0 %v7964_v17  ;;  %v8016_v38 = vld [vmem:[#allocation17 + $0x20] ss:$16 sps:$4 sm:$0xff]   ;;  %v8019_v17 = vld [vmem:[#allocation17 + $0x28] ss:$16 sps:$4 sm:$0xff]  }
 0x2a0   :  { %3842 = vmatprep.subr.bf16.mxu1 %v7967_v63  ;;  %v8024_v63 = vld [vmem:[#allocation17 + $0x44] ss:$16 sps:$4 sm:$0xff]  }
 0x2a2   :  { %3737 = vmatpush1.bf16.msra.mxu0 %v7962_v49  ;;  %v8027_v49 = vld [vmem:[#allocation17 + $0x4c] ss:$16 sps:$4 sm:$0xff]  }
 0x2a3   :  { %3843 = vmatpush1.bf16.msra.mxu1 %v7965_v0  ;;  %3738 = vmatprep.subr.bf16.mxu0 %v7970_v6  ;;  %v8022_v0 = vld [vmem:[#allocation17 + $0x40] ss:$16 sps:$4 sm:$0xff]   ;;  %v8025_v6 = vld [vmem:[#allocation17 + $0x48] ss:$16 sps:$4 sm:$0xff]  }
 0x2a4   :  { %3844 = vmatprep.subr.bf16.mxu1 %v7973_v58  ;;  %v8030_v58 = vld [vmem:[#allocation17 + $0x64] ss:$16 sps:$4 sm:$0xff]  }
 0x2a6   :  { %3739 = vmatpush1.bf16.msra.mxu0 %v7968_v2  ;;  %v8031_v2 = vld [vmem:[#allocation17 + $0x68] ss:$16 sps:$4 sm:$0xff]  }
 0x2a7   :  { %3845 = vmatpush1.bf16.msra.mxu1 %v7971_v3  ;;  %3740 = vmatprep.subr.bf16.mxu0 %v7976_v27  ;;  %v8036_v3 = vld [vmem:[#allocation17 + $0x84] ss:$16 sps:$4 sm:$0xff]   ;;  %v8039_v27 = vld [vmem:[#allocation17 + $0x8c] ss:$16 sps:$4 sm:$0xff]  }
 0x2a8   :  { %3846 = vmatprep.subr.bf16.mxu1 %v7979_v56  ;;  %v8034_v56 = vld [vmem:[#allocation17 + $0x80] ss:$16 sps:$4 sm:$0xff]  }
 0x2aa   :  { %3741 = vmatpush1.bf16.msra.mxu0 %v7974_v15  ;;  %v8037_v15 = vld [vmem:[#allocation17 + $0x88] ss:$16 sps:$4 sm:$0xff]  }
 0x2ab   :  { %3847 = vmatpush1.bf16.msra.mxu1 %v7977_v16  ;;  %3742 = vmatprep.subr.bf16.mxu0 %v7982_v18  ;;  %v8042_v16 = vld [vmem:[#allocation17 + $0xa4] ss:$16 sps:$4 sm:$0xff]   ;;  %v8040_v18 = vld [vmem:[#allocation17 + $0xa0] ss:$16 sps:$4 sm:$0xff]  }
 0x2ac   :  { %3848 = vmatprep.subr.bf16.mxu1 %v7985_v19  ;;  %v8048_v19 = vld [vmem:[#allocation17 + $0xc4] ss:$16 sps:$4 sm:$0xff]  }
 0x2ae   :  { %3743 = vmatpush1.bf16.msra.mxu0 %v7980_v26  ;;  %v8051_v26 = vld [vmem:[#allocation17 + $0xcc] ss:$16 sps:$4 sm:$0xff]  }
 0x2af   :  { %3849 = vmatpush1.bf16.msra.mxu1 %v7983_v29  ;;  %3744 = vmatprep.subr.bf16.mxu0 %v7988_v30  ;;  %v8046_v29 = vld [vmem:[#allocation17 + $0xc0] ss:$16 sps:$4 sm:$0xff]   ;;  %v8049_v30 = vld [vmem:[#allocation17 + $0xc8] ss:$16 sps:$4 sm:$0xff]  }
 0x2b0   :  { %3850 = vmatprep.subr.bf16.mxu1 %v7991_v5  ;;  %v8054_v5 = vld [vmem:[#allocation17 + $0xe4] ss:$16 sps:$4 sm:$0xff]  }
 0x2b2   :  { %3745 = vmatpush1.bf16.msra.mxu0 %v7986_v31  ;;  %v8057_v31 = vld [vmem:[#allocation17 + $0xec] ss:$16 sps:$4 sm:$0xff]  }
 0x2b3   :  { %3851 = vmatpush1.bf16.msra.mxu1 %v7989_v32  ;;  %3746 = vmatprep.subr.bf16.mxu0 %v7994_v33  ;;  %v8052_v32 = vld [vmem:[#allocation17 + $0xe0] ss:$16 sps:$4 sm:$0xff]   ;;  %v8055_v33 = vld [vmem:[#allocation17 + $0xe8] ss:$16 sps:$4 sm:$0xff]  }
 0x2b4   :  { %3852 = vmatprep.subr.bf16.mxu1 %v7997_v34  ;;  %v8060_v34 = vld [vmem:[#allocation17 + $0x104] ss:$16 sps:$4 sm:$0xff]  }
 0x2b6   :  { %3747 = vmatpush1.bf16.msra.mxu0 %v7992_v36  ;;  %v8063_v36 = vld [vmem:[#allocation17 + $0x10c] ss:$16 sps:$4 sm:$0xff]  }
 0x2b7   :  { %3853 = vmatpush1.bf16.msra.mxu1 %v7995_v35  ;;  %3748 = vmatprep.subr.bf16.mxu0 %v8000_v42  ;;  %v8058_v35 = vld [vmem:[#allocation17 + $0x100] ss:$16 sps:$4 sm:$0xff]   ;;  %v8061_v42 = vld [vmem:[#allocation17 + $0x108] ss:$16 sps:$4 sm:$0xff]  }
 0x2b8   :  { %3854 = vmatprep.subr.bf16.mxu1 %v8003_v14  ;;  %v8066_v14 = vld [vmem:[#allocation17 + $0x124] ss:$16 sps:$4 sm:$0xff]  }
 0x2ba   :  { %3749 = vmatpush1.bf16.msra.mxu0 %v7998_v43  ;;  %v8069_v43 = vld [vmem:[#allocation17 + $0x12c] ss:$16 sps:$4 sm:$0xff]  }
 0x2bb   :  { %3855 = vmatpush1.bf16.msra.mxu1 %v8001_v44  ;;  %3750 = vmatprep.subr.bf16.mxu0 %v8006_v45  ;;  %v8064_v44 = vld [vmem:[#allocation17 + $0x120] ss:$16 sps:$4 sm:$0xff]   ;;  %v8067_v45 = vld [vmem:[#allocation17 + $0x128] ss:$16 sps:$4 sm:$0xff]  }
 0x2bc   :  { %3856 = vmatprep.subr.bf16.mxu1 %v8009_v7  ;;  %v8072_v7 = vld [vmem:[#allocation17 + $0x144] ss:$16 sps:$4 sm:$0xff]  }
 0x2be   :  { %3751 = vmatpush1.bf16.msra.mxu0 %v8004_v25  ;;  %v8075_v25 = vld [vmem:[#allocation17 + $0x14c] ss:$16 sps:$4 sm:$0xff]  }
 0x2bf   :  { %3857 = vmatpush1.bf16.msra.mxu1 %v8007_v24  ;;  %4795 = vmatprep.subr.bf16.mxu0 %v8012_v50  ;;  %v8070_v24 = vld [vmem:[#allocation17 + $0x140] ss:$16 sps:$4 sm:$0xff]   ;;  %v8073_v50 = vld [vmem:[#allocation17 + $0x148] ss:$16 sps:$4 sm:$0xff]  }
 0x2c0   :  { %4901 = vmatprep.subr.bf16.mxu1 %v8015_v52  ;;  %v8078_v52 = vld [vmem:[#allocation17 + $0x164] ss:$16 sps:$4 sm:$0xff]  }
 0x2c1   :  { %3753 = vmatmul.mubr.bf16.vlgmr.msra.gmra.mrb[32].mxu0 %v9066_v13 }
 0x2c2   :  { %3859 = vmatmul.mubr.bf16.vlgmr.msra.gmra.mrb[32].mxu1 %v9066_v13  ;;  %3762 = vmatprep.mubr.bf16.mxu0 %v9076_v41  ;;  %v8033_v13 = vld [vmem:[#allocation17 + $0x6c] ss:$16 sps:$4 sm:$0xff]  }
 0x2c3   :  { %3868 = vmatprep.mubr.bf16.mxu1 %v9076_v41  ;;  %4796 = vmatpush1.bf16.msra.mxu0 %v8010_v57  ;;  %v8028_v41 = vld [vmem:[#allocation17 + $0x60] ss:$16 sps:$4 sm:$0xff]   ;;  %v8081_v57 = vld [vmem:[#allocation17 + $0x16c] ss:$16 sps:$4 sm:$0xff]  }
 0x2c4   :  { %4902 = vmatpush1.bf16.msra.mxu1 %v8013_v59  ;;  %4797 = vmatprep.subr.bf16.mxu0 %v8018_v61  ;;  %v8076_v59 = vld [vmem:[#allocation17 + $0x160] ss:$16 sps:$4 sm:$0xff]   ;;  %v8079_v61 = vld [vmem:[#allocation17 + $0x168] ss:$16 sps:$4 sm:$0xff]  }
 0x2c5   :  { %4903 = vmatprep.subr.bf16.mxu1 %v8021_v55  ;;  %v8084_v55 = vld [vmem:[#allocation17 + $0x184] ss:$16 sps:$4 sm:$0xff]  }
 0x2c7   :  { %4798 = vmatpush1.bf16.msra.mxu0 %v8016_v38  ;;  %v8087_v38 = vld [vmem:[#allocation17 + $0x18c] ss:$16 sps:$4 sm:$0xff]  }
 0x2c8   :  { %4904 = vmatpush1.bf16.msra.mxu1 %v8019_v17  ;;  %4799 = vmatprep.subr.bf16.mxu0 %v8024_v63  ;;  %v8082_v17 = vld [vmem:[#allocation17 + $0x180] ss:$16 sps:$4 sm:$0xff]   ;;  %v8085_v63 = vld [vmem:[#allocation17 + $0x188] ss:$16 sps:$4 sm:$0xff]  }
 0x2c9   :  { %3763 = vmatmul.mubr.bf16.gmra.mrb[36].mxu0 %v9074_v40  ;;  %4905 = vmatprep.subr.bf16.mxu1 %v8027_v49  ;;  %v8090_v49 = vld [vmem:[#allocation17 + $0x1a4] ss:$16 sps:$4 sm:$0xff]  }
 0x2ca   :  { %3869 = vmatmul.mubr.bf16.gmra.mrb[36].mxu1 %v9074_v40  ;;  %4827 = vmatprep.mubr.bf16.mxu0 %v9092_v12  ;;  %v8045_v40 = vld [vmem:[#allocation17 + $0xac] ss:$16 sps:$4 sm:$0xff]  }
 0x2cb   :  { %4800 = vmatpush1.bf16.msra.mxu0 %v8022_v0  ;;  %4933 = vmatprep.mubr.bf16.mxu1 %v9092_v12  ;;  %v8043_v12 = vld [vmem:[#allocation17 + $0xa8] ss:$16 sps:$4 sm:$0xff]   ;;  %v8093_v0 = vld [vmem:[#allocation17 + $0x1ac] ss:$16 sps:$4 sm:$0xff]  }
 0x2cc   :  { %4906 = vmatpush1.bf16.msra.mxu1 %v8025_v6  ;;  %4801 = vmatprep.subr.bf16.mxu0 %v8030_v58  ;;  %v8088_v6 = vld [vmem:[#allocation17 + $0x1a0] ss:$16 sps:$4 sm:$0xff]   ;;  %v8091_v58 = vld [vmem:[#allocation17 + $0x1a8] ss:$16 sps:$4 sm:$0xff]  }
 0x2cd   :  { %4907 = vmatprep.subr.bf16.mxu1 %v8033_v13  ;;  %v8096_v13 = vld [vmem:[#allocation17 + $0x1c4] ss:$16 sps:$4 sm:$0xff]  }
 0x2cf   :  { %4802 = vmatpush1.bf16.msra.mxu0 %v8028_v41  ;;  %v8099_v41 = vld [vmem:[#allocation17 + $0x1cc] ss:$16 sps:$4 sm:$0xff]  }
 0x2d0   :  { %4908 = vmatpush1.bf16.msra.mxu1 %v8031_v2  ;;  %4803 = vmatprep.subr.bf16.mxu0 %v8036_v3  ;;  %v8094_v2 = vld [vmem:[#allocation17 + $0x1c0] ss:$16 sps:$4 sm:$0xff]   ;;  %v8097_v3 = vld [vmem:[#allocation17 + $0x1c8] ss:$16 sps:$4 sm:$0xff]  }
 0x2d1   :  { %4909 = vmatprep.subr.bf16.mxu1 %v8039_v27  ;;  %v8102_v27 = vld [vmem:[#allocation17 + $0x1e4] ss:$16 sps:$4 sm:$0xff]  }
 0x2d3   :  { %4804 = vmatpush1.bf16.msra.mxu0 %v8034_v56  ;;  %v8105_v56 = vld [vmem:[#allocation17 + $0x1ec] ss:$16 sps:$4 sm:$0xff]  }
 0x2d4   :  { %4910 = vmatpush1.bf16.msra.mxu1 %v8037_v15  ;;  %4805 = vmatprep.subr.bf16.mxu0 %v8042_v16  ;;  %v8100_v15 = vld [vmem:[#allocation17 + $0x1e0] ss:$16 sps:$4 sm:$0xff]   ;;  %v8103_v16 = vld [vmem:[#allocation17 + $0x1e8] ss:$16 sps:$4 sm:$0xff]  }
 0x2d5   :  { %4911 = vmatprep.subr.bf16.mxu1 %v8045_v40  ;;  %v8108_v40 = vld [vmem:[#allocation17 + $0x204] ss:$16 sps:$4 sm:$0xff]  }
 0x2d7   :  { %4806 = vmatpush1.bf16.msra.mxu0 %v8040_v18  ;;  %v8111_v18 = vld [vmem:[#allocation17 + $0x20c] ss:$16 sps:$4 sm:$0xff]  }
 0x2d8   :  { %4912 = vmatpush1.bf16.msra.mxu1 %v8043_v12  ;;  %4807 = vmatprep.subr.bf16.mxu0 %v8048_v19  ;;  %v8106_v12 = vld [vmem:[#allocation17 + $0x200] ss:$16 sps:$4 sm:$0xff]   ;;  %v8109_v19 = vld [vmem:[#allocation17 + $0x208] ss:$16 sps:$4 sm:$0xff]  }
 0x2d9   :  { %4913 = vmatprep.subr.bf16.mxu1 %v8051_v26  ;;  %v8114_v26 = vld [vmem:[#allocation17 + $0x224] ss:$16 sps:$4 sm:$0xff]  }
 0x2db   :  { %4808 = vmatpush1.bf16.msra.mxu0 %v8046_v29  ;;  %v8117_v29 = vld [vmem:[#allocation17 + $0x22c] ss:$16 sps:$4 sm:$0xff]  }
 0x2dc   :  { %4914 = vmatpush1.bf16.msra.mxu1 %v8049_v30  ;;  %4809 = vmatprep.subr.bf16.mxu0 %v8054_v5  ;;  %v8112_v30 = vld [vmem:[#allocation17 + $0x220] ss:$16 sps:$4 sm:$0xff]   ;;  %v8115_v5 = vld [vmem:[#allocation17 + $0x228] ss:$16 sps:$4 sm:$0xff]  }
 0x2dd   :  { %4915 = vmatprep.subr.bf16.mxu1 %v8057_v31  ;;  %v8120_v31 = vld [vmem:[#allocation17 + $0x244] ss:$16 sps:$4 sm:$0xff]  }
 0x2df   :  { %4810 = vmatpush1.bf16.msra.mxu0 %v8052_v32  ;;  %v8123_v32 = vld [vmem:[#allocation17 + $0x24c] ss:$16 sps:$4 sm:$0xff]  }
 0x2e0   :  { %4916 = vmatpush1.bf16.msra.mxu1 %v8055_v33  ;;  %4811 = vmatprep.subr.bf16.mxu0 %v8060_v34  ;;  %v8118_v33 = vld [vmem:[#allocation17 + $0x240] ss:$16 sps:$4 sm:$0xff]   ;;  %v8121_v34 = vld [vmem:[#allocation17 + $0x248] ss:$16 sps:$4 sm:$0xff]  }
 0x2e1   :  { %4917 = vmatprep.subr.bf16.mxu1 %v8063_v36  ;;  %v8126_v36 = vld [vmem:[#allocation17 + $0x264] ss:$16 sps:$4 sm:$0xff]  }
 0x2e3   :  { %4812 = vmatpush1.bf16.msra.mxu0 %v8058_v35  ;;  %v8127_v35 = vld [vmem:[#allocation17 + $0x268] ss:$16 sps:$4 sm:$0xff]  }
 0x2e4   :  { %4918 = vmatpush1.bf16.msra.mxu1 %v8061_v42  ;;  %4813 = vmatprep.subr.bf16.mxu0 %v8066_v14  ;;  %v8132_v42 = vld [vmem:[#allocation17 + $0x284] ss:$16 sps:$4 sm:$0xff]   ;;  %v8135_v14 = vld [vmem:[#allocation17 + $0x28c] ss:$16 sps:$4 sm:$0xff]  }
 0x2e5   :  { %4919 = vmatprep.subr.bf16.mxu1 %v8069_v43  ;;  %v8130_v43 = vld [vmem:[#allocation17 + $0x280] ss:$16 sps:$4 sm:$0xff]  }
 0x2e7   :  { %4814 = vmatpush1.bf16.msra.mxu0 %v8064_v44  ;;  %v8133_v44 = vld [vmem:[#allocation17 + $0x288] ss:$16 sps:$4 sm:$0xff]  }
 0x2e8   :  { %4920 = vmatpush1.bf16.msra.mxu1 %v8067_v45  ;;  %4815 = vmatprep.subr.bf16.mxu0 %v8072_v7  ;;  %v8138_v45 = vld [vmem:[#allocation17 + $0x2a4] ss:$16 sps:$4 sm:$0xff]   ;;  %v8136_v7 = vld [vmem:[#allocation17 + $0x2a0] ss:$16 sps:$4 sm:$0xff]  }
 0x2e9   :  { %4921 = vmatprep.subr.bf16.mxu1 %v8075_v25  ;;  %v8144_v25 = vld [vmem:[#allocation17 + $0x2c4] ss:$16 sps:$4 sm:$0xff]  }
 0x2eb   :  { %4816 = vmatpush1.bf16.msra.mxu0 %v8070_v24  ;;  %v8147_v24 = vld [vmem:[#allocation17 + $0x2cc] ss:$16 sps:$4 sm:$0xff]  }
 0x2ec   :  { %4922 = vmatpush1.bf16.msra.mxu1 %v8073_v50  ;;  %4817 = vmatprep.subr.bf16.mxu0 %v8078_v52  ;;  %v8142_v50 = vld [vmem:[#allocation17 + $0x2c0] ss:$16 sps:$4 sm:$0xff]   ;;  %v8145_v52 = vld [vmem:[#allocation17 + $0x2c8] ss:$16 sps:$4 sm:$0xff]  }
 0x2ed   :  { %4923 = vmatprep.subr.bf16.mxu1 %v8081_v57  ;;  %v8150_v57 = vld [vmem:[#allocation17 + $0x2e4] ss:$16 sps:$4 sm:$0xff]  }
 0x2ef   :  { %4818 = vmatpush1.bf16.msra.mxu0 %v8076_v59  ;;  %v8153_v59 = vld [vmem:[#allocation17 + $0x2ec] ss:$16 sps:$4 sm:$0xff]  }
 0x2f0   :  { %4924 = vmatpush1.bf16.msra.mxu1 %v8079_v61  ;;  %4819 = vmatprep.subr.bf16.mxu0 %v8084_v55  ;;  %v8148_v61 = vld [vmem:[#allocation17 + $0x2e0] ss:$16 sps:$4 sm:$0xff]   ;;  %v8151_v55 = vld [vmem:[#allocation17 + $0x2e8] ss:$16 sps:$4 sm:$0xff]  }
 0x2f1   :  { %4925 = vmatprep.subr.bf16.mxu1 %v8087_v38  ;;  %v8156_v38 = vld [vmem:[#allocation17 + $0x304] ss:$16 sps:$4 sm:$0xff]  }
 0x2f3   :  { %4820 = vmatpush1.bf16.msra.mxu0 %v8082_v17  ;;  %v8159_v17 = vld [vmem:[#allocation17 + $0x30c] ss:$16 sps:$4 sm:$0xff]  }
 0x2f4   :  { %4926 = vmatpush1.bf16.msra.mxu1 %v8085_v63  ;;  %4821 = vmatprep.subr.bf16.mxu0 %v8090_v49  ;;  %v8154_v63 = vld [vmem:[#allocation17 + $0x300] ss:$16 sps:$4 sm:$0xff]   ;;  %v8157_v49 = vld [vmem:[#allocation17 + $0x308] ss:$16 sps:$4 sm:$0xff]  }
 0x2f5   :  { %4927 = vmatprep.subr.bf16.mxu1 %v8093_v0  ;;  %v8162_v0 = vld [vmem:[#allocation17 + $0x324] ss:$16 sps:$4 sm:$0xff]  }
 0x2f7   :  { %4822 = vmatpush1.bf16.msra.mxu0 %v8088_v6  ;;  %v8165_v6 = vld [vmem:[#allocation17 + $0x32c] ss:$16 sps:$4 sm:$0xff]  }
 0x2f8   :  { %4928 = vmatpush1.bf16.msra.mxu1 %v8091_v58  ;;  %4823 = vmatprep.subr.bf16.mxu0 %v8096_v13  ;;  %v8160_v58 = vld [vmem:[#allocation17 + $0x320] ss:$16 sps:$4 sm:$0xff]   ;;  %v8163_v13 = vld [vmem:[#allocation17 + $0x328] ss:$16 sps:$4 sm:$0xff]  }
 0x2f9   :  { %4929 = vmatprep.subr.bf16.mxu1 %v8099_v41  ;;  %v8168_v41 = vld [vmem:[#allocation17 + $0x344] ss:$16 sps:$4 sm:$0xff]  }
 0x2fb   :  { %4824 = vmatpush1.bf16.msra.mxu0 %v8094_v2  ;;  %v8171_v2 = vld [vmem:[#allocation17 + $0x34c] ss:$16 sps:$4 sm:$0xff]  }
 0x2fc   :  { %4930 = vmatpush1.bf16.msra.mxu1 %v8097_v3  ;;  %4825 = vmatprep.subr.bf16.mxu0 %v8102_v27  ;;  %v8166_v3 = vld [vmem:[#allocation17 + $0x340] ss:$16 sps:$4 sm:$0xff]   ;;  %v8169_v27 = vld [vmem:[#allocation17 + $0x348] ss:$16 sps:$4 sm:$0xff]  }
 0x2fd   :  { %4931 = vmatprep.subr.bf16.mxu1 %v8105_v56  ;;  %v8174_v56 = vld [vmem:[#allocation17 + $0x364] ss:$16 sps:$4 sm:$0xff]  }
 0x2ff   :  { %4826 = vmatpush1.bf16.msra.mxu0 %v8100_v15  ;;  %v8177_v15 = vld [vmem:[#allocation17 + $0x36c] ss:$16 sps:$4 sm:$0xff]  }
 0x300   :  { %4932 = vmatpush1.bf16.msra.mxu1 %v8103_v16  ;;  %4848 = vmatprep.subr.bf16.mxu0 %v8108_v40  ;;  %v8172_v16 = vld [vmem:[#allocation17 + $0x360] ss:$16 sps:$4 sm:$0xff]   ;;  %v8175_v40 = vld [vmem:[#allocation17 + $0x368] ss:$16 sps:$4 sm:$0xff]  }
 0x301   :  { %4954 = vmatprep.subr.bf16.mxu1 %v8111_v18  ;;  %v8180_v18 = vld [vmem:[#allocation17 + $0x384] ss:$16 sps:$4 sm:$0xff]  }
 0x302   :  { %4828 = vmatmul.mubr.bf16.vlgmr.msra.gmra.mrb[40].mxu0 %v9087_v37 }
 0x303   :  { %4934 = vmatmul.mubr.bf16.vlgmr.msra.gmra.mrb[40].mxu1 %v9087_v37  ;;  %4837 = vmatprep.mubr.bf16.mxu0 %v9109_v22  ;;  %v8129_v37 = vld [vmem:[#allocation17 + $0x26c] ss:$16 sps:$4 sm:$0xff]  }
 0x304   :  { %4849 = vmatpush1.bf16.msra.mxu0 %v8106_v12  ;;  %4943 = vmatprep.mubr.bf16.mxu1 %v9109_v22  ;;  %v8124_v22 = vld [vmem:[#allocation17 + $0x260] ss:$16 sps:$4 sm:$0xff]   ;;  %v8183_v12 = vld [vmem:[#allocation17 + $0x38c] ss:$16 sps:$4 sm:$0xff]  }
 0x305   :  { %4955 = vmatpush1.bf16.msra.mxu1 %v8109_v19  ;;  %4850 = vmatprep.subr.bf16.mxu0 %v8114_v26  ;;  %v8178_v19 = vld [vmem:[#allocation17 + $0x380] ss:$16 sps:$4 sm:$0xff]   ;;  %v8181_v26 = vld [vmem:[#allocation17 + $0x388] ss:$16 sps:$4 sm:$0xff]  }
 0x306   :  { %4956 = vmatprep.subr.bf16.mxu1 %v8117_v29  ;;  %v8186_v29 = vld [vmem:[#allocation17 + $0x3a4] ss:$16 sps:$4 sm:$0xff]  }
 0x308   :  { %4851 = vmatpush1.bf16.msra.mxu0 %v8112_v30  ;;  %v8189_v30 = vld [vmem:[#allocation17 + $0x3ac] ss:$16 sps:$4 sm:$0xff]  }
 0x309   :  { %4957 = vmatpush1.bf16.msra.mxu1 %v8115_v5  ;;  %4852 = vmatprep.subr.bf16.mxu0 %v8120_v31  ;;  %v8184_v5 = vld [vmem:[#allocation17 + $0x3a0] ss:$16 sps:$4 sm:$0xff]   ;;  %v8187_v31 = vld [vmem:[#allocation17 + $0x3a8] ss:$16 sps:$4 sm:$0xff]  }
 0x30a   :  { %4838 = vmatmul.mubr.bf16.gmra.mrb[44].mxu0 %v9107_v21  ;;  %4958 = vmatprep.subr.bf16.mxu1 %v8123_v32  ;;  %v8192_v32 = vld [vmem:[#allocation17 + $0x3c4] ss:$16 sps:$4 sm:$0xff]  }
 0x30b   :  { %4944 = vmatmul.mubr.bf16.gmra.mrb[44].mxu1 %v9107_v21  ;;  %4880 = vmatprep.mubr.bf16.mxu0 %v9115_v28  ;;  %v8141_v21 = vld [vmem:[#allocation17 + $0x2ac] ss:$16 sps:$4 sm:$0xff]  }
 0x30c   :  { %4853 = vmatpush1.bf16.msra.mxu0 %v8118_v33  ;;  %4986 = vmatprep.mubr.bf16.mxu1 %v9115_v28  ;;  %v8139_v28 = vld [vmem:[#allocation17 + $0x2a8] ss:$16 sps:$4 sm:$0xff]   ;;  %v8195_v33 = vld [vmem:[#allocation17 + $0x3cc] ss:$16 sps:$4 sm:$0xff]  }
 0x30d   :  { %4959 = vmatpush1.bf16.msra.mxu1 %v8121_v34  ;;  %4854 = vmatprep.subr.bf16.mxu0 %v8126_v36  ;;  %v8190_v34 = vld [vmem:[#allocation17 + $0x3c0] ss:$16 sps:$4 sm:$0xff]   ;;  %v8193_v36 = vld [vmem:[#allocation17 + $0x3c8] ss:$16 sps:$4 sm:$0xff]  }
 0x30e   :  { %4960 = vmatprep.subr.bf16.mxu1 %v8129_v37  ;;  %v8198_v37 = vld [vmem:[#allocation17 + $0x3e4] ss:$16 sps:$4 sm:$0xff]  }
 0x310   :  { %4855 = vmatpush1.bf16.msra.mxu0 %v8124_v22  ;;  %v8201_v22 = vld [vmem:[#allocation17 + $0x3ec] ss:$16 sps:$4 sm:$0xff]  }
 0x311   :  { %4961 = vmatpush1.bf16.msra.mxu1 %v8127_v35  ;;  %4856 = vmatprep.subr.bf16.mxu0 %v8132_v42  ;;  %v8196_v35 = vld [vmem:[#allocation17 + $0x3e0] ss:$16 sps:$4 sm:$0xff]   ;;  %v8199_v42 = vld [vmem:[#allocation17 + $0x3e8] ss:$16 sps:$4 sm:$0xff]  }
 0x312   :  { %4962 = vmatprep.subr.bf16.mxu1 %v8135_v14  ;;  %v8204_v14 = vld [vmem:[#allocation18 + $0x4] ss:$16 sps:$4 sm:$0xff]  }
 0x314   :  { %4857 = vmatpush1.bf16.msra.mxu0 %v8130_v43  ;;  %v8207_v43 = vld [vmem:[#allocation18 + $0xc] ss:$16 sps:$4 sm:$0xff]  }
 0x315   :  { %4963 = vmatpush1.bf16.msra.mxu1 %v8133_v44  ;;  %4858 = vmatprep.subr.bf16.mxu0 %v8138_v45  ;;  %v8202_v44 = vld [vmem:[#allocation18] ss:$16 sps:$4 sm:$0xff]   ;;  %v8205_v45 = vld [vmem:[#allocation18 + $0x8] ss:$16 sps:$4 sm:$0xff]  }
 0x316   :  { %4964 = vmatprep.subr.bf16.mxu1 %v8141_v21  ;;  %v8210_v21 = vld [vmem:[#allocation18 + $0x24] ss:$16 sps:$4 sm:$0xff]  }
 0x318   :  { %4859 = vmatpush1.bf16.msra.mxu0 %v8136_v7  ;;  %v8213_v7 = vld [vmem:[#allocation18 + $0x2c] ss:$16 sps:$4 sm:$0xff]  }
 0x319   :  { %4965 = vmatpush1.bf16.msra.mxu1 %v8139_v28  ;;  %4860 = vmatprep.subr.bf16.mxu0 %v8144_v25  ;;  %v8208_v28 = vld [vmem:[#allocation18 + $0x20] ss:$16 sps:$4 sm:$0xff]   ;;  %v8211_v25 = vld [vmem:[#allocation18 + $0x28] ss:$16 sps:$4 sm:$0xff]  }
 0x31a   :  { %4966 = vmatprep.subr.bf16.mxu1 %v8147_v24  ;;  %v8216_v24 = vld [vmem:[#allocation18 + $0x44] ss:$16 sps:$4 sm:$0xff]  }
 0x31c   :  { %4861 = vmatpush1.bf16.msra.mxu0 %v8142_v50  ;;  %v8219_v50 = vld [vmem:[#allocation18 + $0x4c] ss:$16 sps:$4 sm:$0xff]  }
 0x31d   :  { %4967 = vmatpush1.bf16.msra.mxu1 %v8145_v52  ;;  %4862 = vmatprep.subr.bf16.mxu0 %v8150_v57  ;;  %v8214_v52 = vld [vmem:[#allocation18 + $0x40] ss:$16 sps:$4 sm:$0xff]   ;;  %v8217_v57 = vld [vmem:[#allocation18 + $0x48] ss:$16 sps:$4 sm:$0xff]  }
 0x31e   :  { %4968 = vmatprep.subr.bf16.mxu1 %v8153_v59  ;;  %v8222_v59 = vld [vmem:[#allocation18 + $0x64] ss:$16 sps:$4 sm:$0xff]  }
 0x320   :  { %4863 = vmatpush1.bf16.msra.mxu0 %v8148_v61  ;;  %v8223_v61 = vld [vmem:[#allocation18 + $0x68] ss:$16 sps:$4 sm:$0xff]  }
 0x321   :  { %4969 = vmatpush1.bf16.msra.mxu1 %v8151_v55  ;;  %4864 = vmatprep.subr.bf16.mxu0 %v8156_v38  ;;  %v8228_v55 = vld [vmem:[#allocation18 + $0x84] ss:$16 sps:$4 sm:$0xff]   ;;  %v8231_v38 = vld [vmem:[#allocation18 + $0x8c] ss:$16 sps:$4 sm:$0xff]  }
 0x322   :  { %4970 = vmatprep.subr.bf16.mxu1 %v8159_v17  ;;  %v8226_v17 = vld [vmem:[#allocation18 + $0x80] ss:$16 sps:$4 sm:$0xff]  }
 0x324   :  { %4865 = vmatpush1.bf16.msra.mxu0 %v8154_v63  ;;  %v8229_v63 = vld [vmem:[#allocation18 + $0x88] ss:$16 sps:$4 sm:$0xff]  }
 0x325   :  { %4971 = vmatpush1.bf16.msra.mxu1 %v8157_v49  ;;  %4866 = vmatprep.subr.bf16.mxu0 %v8162_v0  ;;  %v8234_v49 = vld [vmem:[#allocation18 + $0xa4] ss:$16 sps:$4 sm:$0xff]   ;;  %v8232_v0 = vld [vmem:[#allocation18 + $0xa0] ss:$16 sps:$4 sm:$0xff]  }
 0x326   :  { %4972 = vmatprep.subr.bf16.mxu1 %v8165_v6  ;;  %v8240_v6 = vld [vmem:[#allocation18 + $0xc4] ss:$16 sps:$4 sm:$0xff]  }
 0x328   :  { %4867 = vmatpush1.bf16.msra.mxu0 %v8160_v58  ;;  %v8243_v58 = vld [vmem:[#allocation18 + $0xcc] ss:$16 sps:$4 sm:$0xff]  }
 0x329   :  { %4973 = vmatpush1.bf16.msra.mxu1 %v8163_v13  ;;  %4868 = vmatprep.subr.bf16.mxu0 %v8168_v41  ;;  %v8238_v13 = vld [vmem:[#allocation18 + $0xc0] ss:$16 sps:$4 sm:$0xff]   ;;  %v8241_v41 = vld [vmem:[#allocation18 + $0xc8] ss:$16 sps:$4 sm:$0xff]  }
 0x32a   :  { %4974 = vmatprep.subr.bf16.mxu1 %v8171_v2  ;;  %v8246_v2 = vld [vmem:[#allocation18 + $0xe4] ss:$16 sps:$4 sm:$0xff]  }
 0x32c   :  { %4869 = vmatpush1.bf16.msra.mxu0 %v8166_v3  ;;  %v8249_v3 = vld [vmem:[#allocation18 + $0xec] ss:$16 sps:$4 sm:$0xff]  }
 0x32d   :  { %4975 = vmatpush1.bf16.msra.mxu1 %v8169_v27  ;;  %4870 = vmatprep.subr.bf16.mxu0 %v8174_v56  ;;  %v8244_v27 = vld [vmem:[#allocation18 + $0xe0] ss:$16 sps:$4 sm:$0xff]   ;;  %v8247_v56 = vld [vmem:[#allocation18 + $0xe8] ss:$16 sps:$4 sm:$0xff]  }
 0x32e   :  { %4976 = vmatprep.subr.bf16.mxu1 %v8177_v15  ;;  %v8252_v15 = vld [vmem:[#allocation18 + $0x104] ss:$16 sps:$4 sm:$0xff]  }
 0x330   :  { %4871 = vmatpush1.bf16.msra.mxu0 %v8172_v16  ;;  %v8255_v16 = vld [vmem:[#allocation18 + $0x10c] ss:$16 sps:$4 sm:$0xff]  }
 0x331   :  { %4977 = vmatpush1.bf16.msra.mxu1 %v8175_v40  ;;  %4872 = vmatprep.subr.bf16.mxu0 %v8180_v18  ;;  %v8250_v40 = vld [vmem:[#allocation18 + $0x100] ss:$16 sps:$4 sm:$0xff]   ;;  %v8253_v18 = vld [vmem:[#allocation18 + $0x108] ss:$16 sps:$4 sm:$0xff]  }
 0x332   :  { %4978 = vmatprep.subr.bf16.mxu1 %v8183_v12  ;;  %v8258_v12 = vld [vmem:[#allocation18 + $0x124] ss:$16 sps:$4 sm:$0xff]  }
 0x334   :  { %4873 = vmatpush1.bf16.msra.mxu0 %v8178_v19  ;;  %v8261_v19 = vld [vmem:[#allocation18 + $0x12c] ss:$16 sps:$4 sm:$0xff]  }
 0x335   :  { %4979 = vmatpush1.bf16.msra.mxu1 %v8181_v26  ;;  %4874 = vmatprep.subr.bf16.mxu0 %v8186_v29  ;;  %v8256_v26 = vld [vmem:[#allocation18 + $0x120] ss:$16 sps:$4 sm:$0xff]   ;;  %v8259_v29 = vld [vmem:[#allocation18 + $0x128] ss:$16 sps:$4 sm:$0xff]  }
 0x336   :  { %4980 = vmatprep.subr.bf16.mxu1 %v8189_v30  ;;  %v8264_v30 = vld [vmem:[#allocation18 + $0x144] ss:$16 sps:$4 sm:$0xff]  }
 0x338   :  { %4875 = vmatpush1.bf16.msra.mxu0 %v8184_v5  ;;  %v8267_v5 = vld [vmem:[#allocation18 + $0x14c] ss:$16 sps:$4 sm:$0xff]  }
 0x339   :  { %4981 = vmatpush1.bf16.msra.mxu1 %v8187_v31  ;;  %4876 = vmatprep.subr.bf16.mxu0 %v8192_v32  ;;  %v8262_v31 = vld [vmem:[#allocation18 + $0x140] ss:$16 sps:$4 sm:$0xff]   ;;  %v8265_v32 = vld [vmem:[#allocation18 + $0x148] ss:$16 sps:$4 sm:$0xff]  }
 0x33a   :  { %4982 = vmatprep.subr.bf16.mxu1 %v8195_v33  ;;  %v8270_v33 = vld [vmem:[#allocation18 + $0x164] ss:$16 sps:$4 sm:$0xff]  }
 0x33c   :  { %4877 = vmatpush1.bf16.msra.mxu0 %v8190_v34  ;;  %v8273_v34 = vld [vmem:[#allocation18 + $0x16c] ss:$16 sps:$4 sm:$0xff]  }
 0x33d   :  { %4983 = vmatpush1.bf16.msra.mxu1 %v8193_v36  ;;  %4878 = vmatprep.subr.bf16.mxu0 %v8198_v37  ;;  %v8268_v36 = vld [vmem:[#allocation18 + $0x160] ss:$16 sps:$4 sm:$0xff]   ;;  %v8271_v37 = vld [vmem:[#allocation18 + $0x168] ss:$16 sps:$4 sm:$0xff]  }
 0x33e   :  { %4984 = vmatprep.subr.bf16.mxu1 %v8201_v22  ;;  %v8276_v22 = vld [vmem:[#allocation18 + $0x184] ss:$16 sps:$4 sm:$0xff]  }
 0x340   :  { %4879 = vmatpush1.bf16.msra.mxu0 %v8196_v35  ;;  %v8279_v35 = vld [vmem:[#allocation18 + $0x18c] ss:$16 sps:$4 sm:$0xff]  }
 0x341   :  { %4985 = vmatpush1.bf16.msra.mxu1 %v8199_v42  ;;  %5885 = vmatprep.subr.bf16.mxu0 %v8204_v14  ;;  %v8274_v42 = vld [vmem:[#allocation18 + $0x180] ss:$16 sps:$4 sm:$0xff]   ;;  %v8277_v14 = vld [vmem:[#allocation18 + $0x188] ss:$16 sps:$4 sm:$0xff]  }
 0x342   :  { %5991 = vmatprep.subr.bf16.mxu1 %v8207_v43  ;;  %v8282_v43 = vld [vmem:[#allocation18 + $0x1a4] ss:$16 sps:$4 sm:$0xff]  }
 0x343   :  { %4881 = vmatmul.mubr.bf16.vlgmr.msra.gmra.mrb[40].mxu0 %v9111_v23 }
 0x344   :  { %4987 = vmatmul.mubr.bf16.vlgmr.msra.gmra.mrb[40].mxu1 %v9111_v23  ;;  %4890 = vmatprep.mubr.bf16.mxu0 %v9125_v62  ;;  %v8225_v23 = vld [vmem:[#allocation18 + $0x6c] ss:$16 sps:$4 sm:$0xff]  }
 0x345   :  { %4996 = vmatprep.mubr.bf16.mxu1 %v9125_v62  ;;  %5886 = vmatpush1.bf16.msra.mxu0 %v8202_v44  ;;  %v8220_v62 = vld [vmem:[#allocation18 + $0x60] ss:$16 sps:$4 sm:$0xff]   ;;  %v8285_v44 = vld [vmem:[#allocation18 + $0x1ac] ss:$16 sps:$4 sm:$0xff]  }
 0x346   :  { %5992 = vmatpush1.bf16.msra.mxu1 %v8205_v45  ;;  %5887 = vmatprep.subr.bf16.mxu0 %v8210_v21  ;;  %v8280_v45 = vld [vmem:[#allocation18 + $0x1a0] ss:$16 sps:$4 sm:$0xff]   ;;  %v8283_v21 = vld [vmem:[#allocation18 + $0x1a8] ss:$16 sps:$4 sm:$0xff]  }
 0x347   :  { %5993 = vmatprep.subr.bf16.mxu1 %v8213_v7  ;;  %v8288_v7 = vld [vmem:[#allocation18 + $0x1c4] ss:$16 sps:$4 sm:$0xff]  }
 0x349   :  { %5888 = vmatpush1.bf16.msra.mxu0 %v8208_v28  ;;  %v8291_v28 = vld [vmem:[#allocation18 + $0x1cc] ss:$16 sps:$4 sm:$0xff]  }
 0x34a   :  { %5994 = vmatpush1.bf16.msra.mxu1 %v8211_v25  ;;  %5889 = vmatprep.subr.bf16.mxu0 %v8216_v24  ;;  %v8286_v25 = vld [vmem:[#allocation18 + $0x1c0] ss:$16 sps:$4 sm:$0xff]   ;;  %v8289_v24 = vld [vmem:[#allocation18 + $0x1c8] ss:$16 sps:$4 sm:$0xff]  }
 0x34b   :  { %4891 = vmatmul.mubr.bf16.gmra.mrb[44].mxu0 %v9123_v60  ;;  %5995 = vmatprep.subr.bf16.mxu1 %v8219_v50  ;;  %v8294_v50 = vld [vmem:[#allocation18 + $0x1e4] ss:$16 sps:$4 sm:$0xff]  }
 0x34c   :  { %4997 = vmatmul.mubr.bf16.gmra.mrb[44].mxu1 %v9123_v60  ;;  %5917 = vmatprep.mubr.bf16.mxu0 %v9137_v39  ;;  %v8237_v60 = vld [vmem:[#allocation18 + $0xac] ss:$16 sps:$4 sm:$0xff]  }
 0x34d   :  { %5890 = vmatpush1.bf16.msra.mxu0 %v8214_v52  ;;  %6023 = vmatprep.mubr.bf16.mxu1 %v9137_v39  ;;  %v8235_v39 = vld [vmem:[#allocation18 + $0xa8] ss:$16 sps:$4 sm:$0xff]   ;;  %v8297_v52 = vld [vmem:[#allocation18 + $0x1ec] ss:$16 sps:$4 sm:$0xff]  }
 0x34e   :  { %5996 = vmatpush1.bf16.msra.mxu1 %v8217_v57  ;;  %5891 = vmatprep.subr.bf16.mxu0 %v8222_v59  ;;  %v8292_v57 = vld [vmem:[#allocation18 + $0x1e0] ss:$16 sps:$4 sm:$0xff]   ;;  %v8295_v59 = vld [vmem:[#allocation18 + $0x1e8] ss:$16 sps:$4 sm:$0xff]  }
 0x34f   :  { %5997 = vmatprep.subr.bf16.mxu1 %v8225_v23  ;;  %v8300_v23 = vld [vmem:[#allocation18 + $0x204] ss:$16 sps:$4 sm:$0xff]  }
 0x351   :  { %5892 = vmatpush1.bf16.msra.mxu0 %v8220_v62  ;;  %v8303_v62 = vld [vmem:[#allocation18 + $0x20c] ss:$16 sps:$4 sm:$0xff]  }
 0x352   :  { %5998 = vmatpush1.bf16.msra.mxu1 %v8223_v61  ;;  %5893 = vmatprep.subr.bf16.mxu0 %v8228_v55  ;;  %v8298_v61 = vld [vmem:[#allocation18 + $0x200] ss:$16 sps:$4 sm:$0xff]   ;;  %v8301_v55 = vld [vmem:[#allocation18 + $0x208] ss:$16 sps:$4 sm:$0xff]  }
 0x353   :  { %5999 = vmatprep.subr.bf16.mxu1 %v8231_v38  ;;  %v8306_v38 = vld [vmem:[#allocation18 + $0x224] ss:$16 sps:$4 sm:$0xff]  }
 0x355   :  { %5894 = vmatpush1.bf16.msra.mxu0 %v8226_v17  ;;  %v8309_v17 = vld [vmem:[#allocation18 + $0x22c] ss:$16 sps:$4 sm:$0xff]  }
 0x356   :  { %6000 = vmatpush1.bf16.msra.mxu1 %v8229_v63  ;;  %5895 = vmatprep.subr.bf16.mxu0 %v8234_v49  ;;  %v8304_v63 = vld [vmem:[#allocation18 + $0x220] ss:$16 sps:$4 sm:$0xff]   ;;  %v8307_v49 = vld [vmem:[#allocation18 + $0x228] ss:$16 sps:$4 sm:$0xff]  }
 0x357   :  { %6001 = vmatprep.subr.bf16.mxu1 %v8237_v60  ;;  %v8312_v60 = vld [vmem:[#allocation18 + $0x244] ss:$16 sps:$4 sm:$0xff]  }
 0x359   :  { %5896 = vmatpush1.bf16.msra.mxu0 %v8232_v0  ;;  %v8315_v0 = vld [vmem:[#allocation18 + $0x24c] ss:$16 sps:$4 sm:$0xff]  }
 0x35a   :  { %6002 = vmatpush1.bf16.msra.mxu1 %v8235_v39  ;;  %5897 = vmatprep.subr.bf16.mxu0 %v8240_v6  ;;  %v8310_v39 = vld [vmem:[#allocation18 + $0x240] ss:$16 sps:$4 sm:$0xff]   ;;  %v8313_v6 = vld [vmem:[#allocation18 + $0x248] ss:$16 sps:$4 sm:$0xff]  }
 0x35b   :  { %6003 = vmatprep.subr.bf16.mxu1 %v8243_v58  ;;  %v8318_v58 = vld [vmem:[#allocation18 + $0x264] ss:$16 sps:$4 sm:$0xff]  }
 0x35d   :  { %5898 = vmatpush1.bf16.msra.mxu0 %v8238_v13  ;;  %v3879_v13 = vld [vmem:[%s9342_s11] sm:$0xf] }
 0x35e   :  { %6004 = vmatpush1.bf16.msra.mxu1 %v8241_v41  ;;  %5899 = vmatprep.subr.bf16.mxu0 %v8246_v2  ;;  %v8319_v41 = vld [vmem:[#allocation18 + $0x268] ss:$16 sps:$4 sm:$0xff]   ;;  %v8324_v2 = vld [vmem:[#allocation18 + $0x284] ss:$16 sps:$4 sm:$0xff]  }
 0x35f   :  { %6005 = vmatprep.subr.bf16.mxu1 %v8249_v3  ;;  %v8327_v3 = vld [vmem:[#allocation18 + $0x28c] ss:$16 sps:$4 sm:$0xff]  }
 0x361   :  { %5900 = vmatpush1.bf16.msra.mxu0 %v8244_v27  ;;  %v9206_v27 = vrot.slane %v3879_v13, %v9001_v53 }
 0x362   :  { %6006 = vmatpush1.bf16.msra.mxu1 %v8247_v56  ;;  %5901 = vmatprep.subr.bf16.mxu0 %v8252_v15  ;;  %v9212_v56 = vrot.slane %v3879_v13, %v9017_v1  ;;  %v9215_v15 = vrot.slane %v3879_v13, %v9004_v54 }
 0x363   :  { %6007 = vmatprep.subr.bf16.mxu1 %v8255_v16  ;;  %v8325_v16 = vld [vmem:[#allocation18 + $0x288] ss:$16 sps:$4 sm:$0xff]  }
 0x365   :  { %5902 = vmatpush1.bf16.msra.mxu0 %v8250_v40  ;;  %v9218_v40 = vrot.slane %v3879_v13, %v9020_v4 }
 0x366   :  { %6008 = vmatpush1.bf16.msra.mxu1 %v8253_v18  ;;  %5903 = vmatprep.subr.bf16.mxu0 %v8258_v12  ;;  %v8330_v18 = vld [vmem:[#allocation18 + $0x2a4] ss:$16 sps:$4 sm:$0xff]  }
 0x367   :  { %6009 = vmatprep.subr.bf16.mxu1 %v8261_v19  ;;  %v8333_v19 = vld [vmem:[#allocation18 + $0x2ac] ss:$16 sps:$4 sm:$0xff]  }
 0x369   :  { %5904 = vmatpush1.bf16.msra.mxu0 %v8256_v26 }
 0x36a   :  { %6010 = vmatpush1.bf16.msra.mxu1 %v8259_v29  ;;  %5905 = vmatprep.subr.bf16.mxu0 %v8264_v30 }
 0x36b   :  { %6011 = vmatprep.subr.bf16.mxu1 %v8267_v5 }
 0x36d   :  { %5906 = vmatpush1.bf16.msra.mxu0 %v8262_v31 }
 0x36e   :  { %6012 = vmatpush1.bf16.msra.mxu1 %v8265_v32  ;;  %5907 = vmatprep.subr.bf16.mxu0 %v8270_v33 }
 0x36f   :  { %6013 = vmatprep.subr.bf16.mxu1 %v8273_v34 }
 0x371   :  { %5908 = vmatpush1.bf16.msra.mxu0 %v8268_v36 }
 0x372   :  { %6014 = vmatpush1.bf16.msra.mxu1 %v8271_v37  ;;  %5909 = vmatprep.subr.bf16.mxu0 %v8276_v22  ;;  %v8328_v37 = vld [vmem:[#allocation18 + $0x2a0] ss:$16 sps:$4 sm:$0xff]   ;;  %v8331_v22 = vld [vmem:[#allocation18 + $0x2a8] ss:$16 sps:$4 sm:$0xff]  }
 0x373   :  { %6015 = vmatprep.subr.bf16.mxu1 %v8279_v35 }
 0x375   :  { %5910 = vmatpush1.bf16.msra.mxu0 %v8274_v42 }
 0x376   :  { %6016 = vmatpush1.bf16.msra.mxu1 %v8277_v14  ;;  %5911 = vmatprep.subr.bf16.mxu0 %v8282_v43 }
 0x377   :  { %6017 = vmatprep.subr.bf16.mxu1 %v8285_v44 }
 0x379   :  { %5912 = vmatpush1.bf16.msra.mxu0 %v8280_v45 }
 0x37a   :  { %6018 = vmatpush1.bf16.msra.mxu1 %v8283_v21  ;;  %5913 = vmatprep.subr.bf16.mxu0 %v8288_v7  ;;  %v8336_v7 = vld [vmem:[#allocation18 + $0x2c4] ss:$16 sps:$4 sm:$0xff]  }
 0x37b   :  { %6019 = vmatprep.subr.bf16.mxu1 %v8291_v28 }
 0x37d   :  { %5914 = vmatpush1.bf16.msra.mxu0 %v8286_v25 }
 0x37e   :  { %6020 = vmatpush1.bf16.msra.mxu1 %v8289_v24  ;;  %5915 = vmatprep.subr.bf16.mxu0 %v8294_v50 }
 0x37f   :  { %6021 = vmatprep.subr.bf16.mxu1 %v8297_v52 }
 0x381   :  { %5916 = vmatpush1.bf16.msra.mxu0 %v8292_v57  ;;  %v8339_v57 = vld [vmem:[#allocation18 + $0x2cc] ss:$16 sps:$4 sm:$0xff]  }
 0x382   :  { %6022 = vmatpush1.bf16.msra.mxu1 %v8295_v59  ;;  %5938 = vmatprep.subr.bf16.mxu0 %v8300_v23 }
 0x383   :  { %6044 = vmatprep.subr.bf16.mxu1 %v8303_v62 }
 0x384   :  { %5918 = vmatmul.mubr.bf16.vlgmr.msra.gmra.mrb[48].mxu0 %v9132_v20 }
 0x385   :  { %6024 = vmatmul.mubr.bf16.vlgmr.msra.gmra.mrb[48].mxu1 %v9132_v20  ;;  %5927 = vmatprep.mubr.bf16.mxu0 %v9152_v9  ;;  %v8321_v20 = vld [vmem:[#allocation18 + $0x26c] ss:$16 sps:$4 sm:$0xff]  }
 0x386   :  { %5939 = vmatpush1.bf16.msra.mxu0 %v8298_v61  ;;  %6033 = vmatprep.mubr.bf16.mxu1 %v9152_v9  ;;  %v8316_v9 = vld [vmem:[#allocation18 + $0x260] ss:$16 sps:$4 sm:$0xff]  }
 0x387   :  { %6045 = vmatpush1.bf16.msra.mxu1 %v8301_v55  ;;  %5940 = vmatprep.subr.bf16.mxu0 %v8306_v38 }
 0x388   :  { %6046 = vmatprep.subr.bf16.mxu1 %v8309_v17  ;;  %v8334_v17 = vld [vmem:[#allocation18 + $0x2c0] ss:$16 sps:$4 sm:$0xff]  }
 0x38a   :  { %5941 = vmatpush1.bf16.msra.mxu0 %v8304_v63 }
 0x38b   :  { %6047 = vmatpush1.bf16.msra.mxu1 %v8307_v49  ;;  %5942 = vmatprep.subr.bf16.mxu0 %v8312_v60  ;;  %v8337_v60 = vld [vmem:[#allocation18 + $0x2c8] ss:$16 sps:$4 sm:$0xff]  }
 0x38c   :  { %5928 = vmatmul.mubr.bf16.gmra.mrb[52].mxu0 %v9150_v8  ;;  %6048 = vmatprep.subr.bf16.mxu1 %v8315_v0  ;;  %v8342_v0 = vld [vmem:[#allocation18 + $0x2e4] ss:$16 sps:$4 sm:$0xff]  }
 0x38d   :  { %6034 = vmatmul.mubr.bf16.gmra.mrb[52].mxu1 %v9150_v8  ;;  %5970 = vmatprep.mubr.bf16.mxu0 %v9158_v11  ;;  %v8322_v8 = vld [vmem:[#allocation18 + $0x280] ss:$16 sps:$4 sm:$0xff]  }
 0x38e   :  { %5943 = vmatpush1.bf16.msra.mxu0 %v8310_v39  ;;  %6076 = vmatprep.mubr.bf16.mxu1 %v9158_v11  ;;  %v3933_v11 = vld [vmem:[%s9343_s12] sm:$0xf] }
 0x38f   :  { %6049 = vmatpush1.bf16.msra.mxu1 %v8313_v6  ;;  %5944 = vmatprep.subr.bf16.mxu0 %v8318_v58  ;;  %v9222_v29 = vrot.slane %v3933_v11, %v9001_v53  ;;  %v9226_v32 = vrot.slane %v3933_v11, %v9017_v1  ;;  %v9230_v34 = vrot.slane %v3933_v11, %v9004_v54 }
 0x390   :  { %6050 = vmatprep.subr.bf16.mxu1 %v8321_v20  ;;  %v9235_v21 = vrot.slane %v3933_v11, %v9020_v4  ;;  %v8345_v20 = vld [vmem:[#allocation18 + $0x2ec] ss:$16 sps:$4 sm:$0xff]  }
 0x392   :  { %5945 = vmatpush1.bf16.msra.mxu0 %v8316_v9 }
 0x393   :  { %6051 = vmatpush1.bf16.msra.mxu1 %v8319_v41  ;;  %5946 = vmatprep.subr.bf16.mxu0 %v8324_v2 }
 0x394   :  { %6052 = vmatprep.subr.bf16.mxu1 %v8327_v3  ;;  %v3754_v12 = vpop.f32.mrb[32].mxu0 }
 0x395   :  { %v3901_v26 = vadd.f32 %v9206_v27, %v3754_v12  ;;  %v3860_v30 = vpop.f32.mrb[32].mxu1  ;;  %v3756_v5 = vpop.f32.mrb[33].mxu0 }
 0x396   :  { %5947 = vmatpush1.bf16.msra.mxu0 %v8322_v8  ;;  %v3903_v31 = vadd.f32 %v9212_v56, %v3860_v30  ;;  %v3902_v33 = vadd.f32 %v9215_v15, %v3756_v5  ;;  %v3862_v36 = vpop.f32.mrb[33].mxu1  ;;  %v3758_v35 = vpop.f32.mrb[34].mxu0 }
 0x397   :  { %6053 = vmatpush1.bf16.msra.mxu1 %v8325_v16  ;;  %v3917_v42 = vmax.f32 %v3901_v26, 0.0  ;;  %v3904_v14 = vadd.f32 %v9218_v40, %v3862_v36  ;;  %5948 = vmatprep.subr.bf16.mxu0 %v8330_v18  ;;  %v3905_v43 = vadd.f32 %v9206_v27, %v3758_v35  ;;  %v3864_v44 = vpop.f32.mrb[34].mxu1  ;;  %v3760_v45 = vpop.f32.mrb[35].mxu0  ;;  %v8343_v26 = vld [vmem:[#allocation18 + $0x2e8] ss:$16 sps:$4 sm:$0xff]  }
 0x398   :  { %v3919_v28 = vmax.f32 %v3903_v31, 0.0  ;;  %v3918_v25 = vmax.f32 %v3902_v33, 0.0  ;;  %6054 = vmatprep.subr.bf16.mxu1 %v8333_v19  ;;  %v3907_v24 = vadd.f32 %v9212_v56, %v3864_v44  ;;  %v3906_v50 = vadd.f32 %v9215_v15, %v3760_v45  ;;  %v3866_v52 = vpop.f32.mrb[35].mxu1  ;;  %v8340_v19 = vld [vmem:[#allocation18 + $0x2e0] ss:$16 sps:$4 sm:$0xff]  }
 0x399   :  { %v3955_v59 = vmul.f32 %v9222_v29, %v3917_v42  ;;  %v3920_v23 = vmax.f32 %v3904_v14, 0.0  ;;  %v3921_v62 = vmax.f32 %v3905_v43, 0.0  ;;  %v3908_v61 = vadd.f32 %v9218_v40, %v3866_v52  ;;  %v8348_v42 = vld [vmem:[#allocation18 + $0x304] ss:$16 sps:$4 sm:$0xff]  }
 0x39a   :  { %v3956_v55 = vmul.f32 %v9230_v34, %v3918_v25  ;;  %5949 = vmatpush1.bf16.msra.mxu0 %v8328_v37  ;;  %v3922_v38 = vmax.f32 %v3906_v50, 0.0  ;;  %v3923_v49 = vmax.f32 %v3907_v24, 0.0  ;;  %v3957_v39 = vmul.f32 %v9226_v32, %v3919_v28  ;;  %v8351_v28 = vld [vmem:[#allocation18 + $0x30c] ss:$16 sps:$4 sm:$0xff]  }
 0x39b   :  { %v3959_v63 = vmul.f32 %v9222_v29, %v3921_v62  ;;  %6055 = vmatpush1.bf16.msra.mxu1 %v8331_v22  ;;  %5950 = vmatprep.subr.bf16.mxu0 %v8336_v7  ;;  %v3924_v13 = vmax.f32 %v3908_v61, 0.0  ;;  %v3958_v8 = vmul.f32 %v9235_v21, %v3920_v23  ;;  %v8346_v62 = vld [vmem:[#allocation18 + $0x300] ss:$16 sps:$4 sm:$0xff]  }
 0x39c   :  { %v3960_v6 = vmul.f32 %v9230_v34, %v3922_v38  ;;  %6056 = vmatprep.subr.bf16.mxu1 %v8339_v57  ;;  %v3764_v58 = vpop.f32.mrb[36].mxu0  ;;  %v3971_v9 = vadd.f32 %v3956_v55, %v3955_v59  ;;  %v3961_v31 = vmul.f32 %v9226_v32, %v3923_v49  ;;  %v8354_v55 = vld [vmem:[#allocation18 + $0x324] ss:$16 sps:$4 sm:$0xff]   ;;  %v8357_v49 = vld [vmem:[#allocation18 + $0x32c] ss:$16 sps:$4 sm:$0xff]  }
 0x39d   :  { %v3909_v41 = vadd.f32 %v9206_v27, %v3764_v58  ;;  %v3870_v2 = vpop.f32.mrb[36].mxu1  ;;  %v3766_v3 = vpop.f32.mrb[37].mxu0  ;;  %v3962_v25 = vmul.f32 %v9235_v21, %v3924_v13  ;;  %v8360_v13 = vld [vmem:[#allocation18 + $0x344] ss:$16 sps:$4 sm:$0xff]  }
 0x39e   :  { %v3976_v11 = vadd.f32 %v3960_v6, %v3959_v63  ;;  %5951 = vmatpush1.bf16.msra.mxu0 %v8334_v17  ;;  %v3911_v16 = vadd.f32 %v9212_v56, %v3870_v2  ;;  %v3910_v18 = vadd.f32 %v9215_v15, %v3766_v3  ;;  %v3872_v12 = vpop.f32.mrb[37].mxu1  ;;  %v3768_v30 = vpop.f32.mrb[38].mxu0  ;;  %v3972_v5 = vadd.f32 %v3971_v9, %v3957_v39  ;;  %v8355_v9 = vld [vmem:[#allocation18 + $0x328] ss:$16 sps:$4 sm:$0xff]  }
 0x39f   :  { %6057 = vmatpush1.bf16.msra.mxu1 %v8337_v60  ;;  %v3925_v33 = vmax.f32 %v3909_v41, 0.0  ;;  %v3912_v36 = vadd.f32 %v9218_v40, %v3872_v12  ;;  %5952 = vmatprep.subr.bf16.mxu0 %v8342_v0  ;;  %v3913_v37 = vadd.f32 %v9206_v27, %v3768_v30  ;;  %v3874_v22 = vpop.f32.mrb[38].mxu1  ;;  %v3770_v35 = vpop.f32.mrb[39].mxu0  ;;  %v8363_v41 = vld [vmem:[#allocation18 + $0x34c] ss:$16 sps:$4 sm:$0xff]  }
 0x3a0   :  { %v3927_v14 = vmax.f32 %v3911_v16, 0.0  ;;  %v3926_v43 = vmax.f32 %v3910_v18, 0.0  ;;  %6058 = vmatprep.subr.bf16.mxu1 %v8345_v20  ;;  %v3915_v44 = vadd.f32 %v9212_v56, %v3874_v22  ;;  %v3914_v45 = vadd.f32 %v9215_v15, %v3770_v35  ;;  %v3876_v7 = vpop.f32.mrb[39].mxu1  ;;  %v8349_v15 = vld [vmem:[#allocation18 + $0x308] ss:$16 sps:$4 sm:$0xff]  }
 0x3a1   :  { %v3963_v24 = vmul.f32 %v9222_v29, %v3925_v33  ;;  %v3929_v50 = vmax.f32 %v3913_v37, 0.0  ;;  %v3916_v52 = vadd.f32 %v9218_v40, %v3876_v7  ;;  %v3928_v57 = vmax.f32 %v3912_v36, 0.0  ;;  %v8366_v16 = vld [vmem:[#allocation18 + $0x364] ss:$16 sps:$4 sm:$0xff]   ;;  %v8369_v18 = vld [vmem:[#allocation18 + $0x36c] ss:$16 sps:$4 sm:$0xff]  }
 0x3a2   :  { %v3964_v27 = vmul.f32 %v9230_v34, %v3926_v43  ;;  %v3931_v59 = vmax.f32 %v3915_v44, 0.0  ;;  %5953 = vmatpush1.bf16.msra.mxu0 %v8340_v19  ;;  %v3930_v23 = vmax.f32 %v3914_v45, 0.0  ;;  %v3973_v61 = vadd.f32 %v3972_v5, %v3958_v8  ;;  %v8358_v8 = vld [vmem:[#allocation18 + $0x340] ss:$16 sps:$4 sm:$0xff]   ;;  %v8372_v19 = vld [vmem:[#allocation18 + $0x384] ss:$16 sps:$4 sm:$0xff]  }
 0x3a3   :  { %v3967_v56 = vmul.f32 %v9222_v29, %v3929_v50  ;;  %6059 = vmatpush1.bf16.msra.mxu1 %v8343_v26  ;;  %5954 = vmatprep.subr.bf16.mxu0 %v8348_v42  ;;  %v3977_v38 = vadd.f32 %v3976_v11, %v3961_v31  ;;  %v3965_v17 = vmul.f32 %v9226_v32, %v3927_v14  ;;  %v3932_v40 = vmax.f32 %v3916_v52, 0.0  ;;  %v8352_v29 = vld [vmem:[#allocation18 + $0x320] ss:$16 sps:$4 sm:$0xff]   ;;  %v8361_v11 = vld [vmem:[#allocation18 + $0x348] ss:$16 sps:$4 sm:$0xff]  }
 0x3a4   :  { %v3968_v63 = vmul.f32 %v9230_v34, %v3930_v23  ;;  %6060 = vmatprep.subr.bf16.mxu1 %v8351_v28  ;;  %v3981_v60 = vadd.f32 %v3964_v27, %v3963_v24  ;;  %3974 = vadd.xlane.f32.xlu0 %v3973_v61  ;;  %v3969_v39 = vmul.f32 %v9226_v32, %v3931_v59  ;;  %v8364_v12 = vld [vmem:[#allocation18 + $0x360] ss:$16 sps:$4 sm:$0xff]   ;;  %v8375_v26 = vld [vmem:[#allocation18 + $0x38c] ss:$16 sps:$4 sm:$0xff]   ;;  %v8373_v5 = vld [vmem:[#allocation18 + $0x388] ss:$16 sps:$4 sm:$0xff]  }
 0x3a5   :  { %v3978_v0 = vadd.f32 %v3977_v38, %v3962_v25  ;;  %v3966_v58 = vmul.f32 %v9235_v21, %v3928_v57  ;;  %v3970_v34 = vmul.f32 %v9235_v21, %v3932_v40  ;;  %v8367_v21 = vld [vmem:[#allocation18 + $0x368] ss:$16 sps:$4 sm:$0xff]   ;;  %v8370_v30 = vld [vmem:[#allocation18 + $0x380] ss:$16 sps:$4 sm:$0xff]   ;;  %v8378_v31 = vld [vmem:[#allocation18 + $0x3a4] ss:$16 sps:$4 sm:$0xff]  }
 0x3a6   :  { %v3986_v6 = vadd.f32 %v3968_v63, %v3967_v56  ;;  %5955 = vmatpush1.bf16.msra.mxu0 %v8346_v62  ;;  %v3982_v20 = vadd.f32 %v3981_v60, %v3965_v17  ;;  %v8381_v33 = vld [vmem:[#allocation18 + $0x3ac] ss:$16 sps:$4 sm:$0xff]   ;;  %v8376_v36 = vld [vmem:[#allocation18 + $0x3a0] ss:$16 sps:$4 sm:$0xff]   ;;  %v8379_v37 = vld [vmem:[#allocation18 + $0x3a8] ss:$16 sps:$4 sm:$0xff]  }
 0x3a7   :  { %6061 = vmatpush1.bf16.msra.mxu1 %v8349_v15  ;;  %5956 = vmatprep.subr.bf16.mxu0 %v8354_v55  ;;  %v8384_v22 = vld [vmem:[#allocation18 + $0x3c4] ss:$16 sps:$4 sm:$0xff]   ;;  %v8387_v35 = vld [vmem:[#allocation18 + $0x3cc] ss:$16 sps:$4 sm:$0xff]   ;;  %v8382_v42 = vld [vmem:[#allocation18 + $0x3c0] ss:$16 sps:$4 sm:$0xff]  }
 0x3a8   :  { %6062 = vmatprep.subr.bf16.mxu1 %v8357_v49  ;;  %v3983_v2 = vadd.f32 %v3982_v20, %v3966_v58  ;;  %v3987_v3 = vadd.f32 %v3986_v6, %v3969_v39  ;;  %3979 = vadd.xlane.f32.xlu0 %v3978_v0  ;;  %v8385_v14 = vld [vmem:[#allocation18 + $0x3c8] ss:$16 sps:$4 sm:$0xff]   ;;  %v8390_v43 = vld [vmem:[#allocation18 + $0x3e4] ss:$16 sps:$4 sm:$0xff]   ;;  %v8393_v44 = vld [vmem:[#allocation18 + $0x3ec] ss:$16 sps:$4 sm:$0xff]  }
 0x3a9   :  { %v8388_v45 = vld [vmem:[#allocation18 + $0x3e0] ss:$16 sps:$4 sm:$0xff]   ;;  %v8391_v7 = vld [vmem:[#allocation18 + $0x3e8] ss:$16 sps:$4 sm:$0xff]  }
 0x3aa   :  { %5957 = vmatpush1.bf16.msra.mxu0 %v8352_v29  ;;  %3984 = vadd.xlane.f32.xlu1 %v3983_v2  ;;  %v3988_v32 = vadd.f32 %v3987_v3, %v3970_v34  ;;  %v4133_v28 = vld [vmem:[%s9345_s14] sm:$0xf] }
 0x3ab   :  { %6063 = vmatpush1.bf16.msra.mxu1 %v8355_v9  ;;  %5958 = vmatprep.subr.bf16.mxu0 %v8360_v13  ;;  %v4138_v25 = vrot.slane %v4133_v28, %v9001_v53  ;;  %v5023_v24 = vld [vmem:[%s9346_s15] sm:$0xf]  ;;  %v4142_v50 = vrot.slane %v4133_v28, %v9004_v54 }
 0x3ac   :  { %6064 = vmatprep.subr.bf16.mxu1 %v8363_v41  ;;  %v5032_v56 = vrot.slane %v5023_v24, %v9004_v54  ;;  %v5036_v38 = vrot.slane %v5023_v24, %v9017_v1  ;;  %v5040_v39 = vrot.slane %v5023_v24, %v9020_v4 }
 0x3ae   :  { %5959 = vmatpush1.bf16.msra.mxu0 %v8358_v8  ;;  %3989 = vadd.xlane.f32.xlu1 %v3988_v32 }
 0x3af   :  { %6065 = vmatpush1.bf16.msra.mxu1 %v8361_v11  ;;  %5960 = vmatprep.subr.bf16.mxu0 %v8366_v16 }
 0x3b0   :  { %6066 = vmatprep.subr.bf16.mxu1 %v8369_v18 }
 0x3b2   :  { %5961 = vmatpush1.bf16.msra.mxu0 %v8364_v12 }
 0x3b3   :  { %6067 = vmatpush1.bf16.msra.mxu1 %v8367_v21  ;;  %5962 = vmatprep.subr.bf16.mxu0 %v8372_v19 }
 0x3b4   :  { %6068 = vmatprep.subr.bf16.mxu1 %v8375_v26 }
 0x3b6   :  { %5963 = vmatpush1.bf16.msra.mxu0 %v8370_v30 }
 0x3b7   :  { %6069 = vmatpush1.bf16.msra.mxu1 %v8373_v5  ;;  %5964 = vmatprep.subr.bf16.mxu0 %v8378_v31 }
 0x3b8   :  { %6070 = vmatprep.subr.bf16.mxu1 %v8381_v33 }
 0x3ba   :  { %5965 = vmatpush1.bf16.msra.mxu0 %v8376_v36 }
 0x3bb   :  { %6071 = vmatpush1.bf16.msra.mxu1 %v8379_v37  ;;  %5966 = vmatprep.subr.bf16.mxu0 %v8384_v22 }
 0x3bc   :  { %6072 = vmatprep.subr.bf16.mxu1 %v8387_v35 }
 0x3be   :  { %5967 = vmatpush1.bf16.msra.mxu0 %v8382_v42 }
 0x3bf   :  { %6073 = vmatpush1.bf16.msra.mxu1 %v8385_v14  ;;  %5968 = vmatprep.subr.bf16.mxu0 %v8390_v43 }
 0x3c0   :  { %6074 = vmatprep.subr.bf16.mxu1 %v8393_v44 }
 0x3c2   :  { %5969 = vmatpush1.bf16.msra.mxu0 %v8388_v45 }
 0x3c3   :  { %6075 = vmatpush1.bf16.msra.mxu1 %v8391_v7 }
 0x3c5   :  { %5971 = vmatmul.mubr.bf16.vlgmr.msra.gmra.mrb[48].mxu0 %v9154_v10 }
 0x3c6   :  { %6077 = vmatmul.mubr.bf16.vlgmr.msra.gmra.mrb[48].mxu1 %v9154_v10  ;;  %5980 = vmatprep.mubr.bf16.mxu0 %v9168_v47  ;;  %v4146_v10 = vrot.slane %v4133_v28, %v9017_v1 }
 0x3c7   :  { %6086 = vmatprep.mubr.bf16.mxu1 %v9168_v47  ;;  %v4150_v47 = vrot.slane %v4133_v28, %v9020_v4 }
 0x3cd   :  { %5981 = vmatmul.mubr.bf16.gmra.mrb[52].mxu0 %v9166_v46 }
 0x3ce   :  { %6087 = vmatmul.mubr.bf16.gmra.mrb[52].mxu1 %v9166_v46  ;;  %v9281_v46 = vrot.slane %v5023_v24, %v9001_v53 }
 0x416   :  { %v4882_v52 = vpop.f32.mrb[40].mxu0 }
 0x417   :  { %v7203_v27 = vadd.f32 %v4882_v52, %v4138_v25  ;;  %v4988_v57 = vpop.f32.mrb[40].mxu1  ;;  %v4884_v59 = vpop.f32.mrb[41].mxu0 }
 0x418   :  { %v7211_v23 = vadd.f32 %v4988_v57, %v4146_v10  ;;  %v7204_v62 = vadd.f32 %v4884_v59, %v4142_v50  ;;  %v4990_v15 = vpop.f32.mrb[41].mxu1  ;;  %v4886_v61 = vpop.f32.mrb[42].mxu0 }
 0x419   :  { %v5007_v55 = vmax.f32 %v7203_v27, 0.0  ;;  %v7212_v17 = vadd.f32 %v4990_v15, %v4150_v47  ;;  %v7205_v63 = vadd.f32 %v4886_v61, %v4138_v25  ;;  %v4992_v40 = vpop.f32.mrb[42].mxu1  ;;  %v4888_v49 = vpop.f32.mrb[43].mxu0 }
 0x41a   :  { %v5009_v60 = vmax.f32 %v7211_v23, 0.0  ;;  %v5008_v0 = vmax.f32 %v7204_v62, 0.0  ;;  %v7206_v6 = vadd.f32 %v4888_v49, %v4142_v50  ;;  %v4994_v29 = vpop.f32.mrb[43].mxu1  ;;  %v7213_v13 = vadd.f32 %v4992_v40, %v4146_v10 }
 0x41b   :  { %v5045_v58 = vmul.f32 %v9281_v46, %v5007_v55  ;;  %v5010_v20 = vmax.f32 %v7212_v17, 0.0  ;;  %v5011_v9 = vmax.f32 %v7205_v63, 0.0  ;;  %v7214_v3 = vadd.f32 %v4994_v29, %v4150_v47 }
 0x41c   :  { %v5046_v34 = vmul.f32 %v5032_v56, %v5008_v0  ;;  %v5012_v41 = vmax.f32 %v7206_v6, 0.0  ;;  %v5047_v8 = vmul.f32 %v5036_v38, %v5009_v60  ;;  %v5013_v12 = vmax.f32 %v7213_v13, 0.0 }
 0x41d   :  { %v5049_v2 = vmul.f32 %v9281_v46, %v5011_v9  ;;  %v5048_v18 = vmul.f32 %v5040_v39, %v5010_v20  ;;  %v5014_v22 = vmax.f32 %v7214_v3, 0.0 }
 0x41e   :  { %v5061_v32 = vadd.f32 %v5046_v34, %v5045_v58  ;;  %v5050_v11 = vmul.f32 %v5032_v56, %v5012_v41  ;;  %v4892_v16 = vpop.f32.mrb[44].mxu0  ;;  %v5051_v62 = vmul.f32 %v5036_v38, %v5013_v12 }
 0x41f   :  { %v7207_v21 = vadd.f32 %v4892_v16, %v4138_v25  ;;  %v4998_v19 = vpop.f32.mrb[44].mxu1  ;;  %v4894_v26 = vpop.f32.mrb[45].mxu0  ;;  %v5052_v17 = vmul.f32 %v5040_v39, %v5014_v22 }
 0x420   :  { %v5066_v30 = vadd.f32 %v5050_v11, %v5049_v2  ;;  %v7215_v5 = vadd.f32 %v4998_v19, %v4146_v10  ;;  %v7208_v31 = vadd.f32 %v4894_v26, %v4142_v50  ;;  %v5000_v33 = vpop.f32.mrb[45].mxu1  ;;  %v4896_v36 = vpop.f32.mrb[46].mxu0  ;;  %v5062_v37 = vadd.f32 %v5061_v32, %v5047_v8 }
 0x421   :  { %v5015_v35 = vmax.f32 %v7207_v21, 0.0  ;;  %v7216_v42 = vadd.f32 %v5000_v33, %v4150_v47  ;;  %v7209_v14 = vadd.f32 %v4896_v36, %v4138_v25  ;;  %v5002_v43 = vpop.f32.mrb[46].mxu1  ;;  %v4898_v44 = vpop.f32.mrb[47].mxu0 }
 0x422   :  { %v5017_v45 = vmax.f32 %v7215_v5, 0.0  ;;  %v5016_v7 = vmax.f32 %v7208_v31, 0.0  ;;  %v7217_v28 = vadd.f32 %v5002_v43, %v4146_v10  ;;  %v7210_v24 = vadd.f32 %v4898_v44, %v4142_v50  ;;  %v5004_v52 = vpop.f32.mrb[47].mxu1 }
 0x423   :  { %v5053_v27 = vmul.f32 %v9281_v46, %v5015_v35  ;;  %v5018_v57 = vmax.f32 %v7216_v42, 0.0  ;;  %v5019_v59 = vmax.f32 %v7209_v14, 0.0  ;;  %v7218_v23 = vadd.f32 %v5004_v52, %v4150_v47 }
 0x424   :  { %v5054_v15 = vmul.f32 %v5032_v56, %v5016_v7  ;;  %v5021_v61 = vmax.f32 %v7217_v28, 0.0  ;;  %v5020_v55 = vmax.f32 %v7210_v24, 0.0  ;;  %v5055_v63 = vmul.f32 %v5036_v38, %v5017_v45 }
 0x425   :  { %v5057_v25 = vmul.f32 %v9281_v46, %v5019_v59  ;;  %v5063_v40 = vadd.f32 %v5062_v37, %v5048_v18  ;;  %v5022_v0 = vmax.f32 %v7218_v23, 0.0  ;;  %v5067_v10 = vadd.f32 %v5066_v30, %v5051_v62  ;;  %v5223_v46 = vld [vmem:[%s9348_s17] sm:$0xf]  ;;  %s7018_s17 = sld [smem:[#allocation20 + $0x1]] }
 0x426   :  { %v5071_v49 = vadd.f32 %v5054_v15, %v5053_v27  ;;  %v5058_v60 = vmul.f32 %v5032_v56, %v5020_v55  ;;  %v5056_v50 = vmul.f32 %v5040_v39, %v5018_v57  ;;  %v5059_v6 = vmul.f32 %v5036_v38, %v5021_v61  ;;  %v6113_v38 = vld [vmem:[%s9369_s28] sm:$0xf] }
 0x427   :  { %5064 = vadd.xlane.f32.xlu0 %v5063_v40  ;;  %v5068_v58 = vadd.f32 %v5067_v10, %v5052_v17  ;;  %v5060_v47 = vmul.f32 %v5040_v39, %v5022_v0  ;;  %v5228_v56 = vrot.slane %v5223_v46, %v9001_v53  ;;  %v5236_v41 = vrot.slane %v5223_v46, %v9017_v1 }
 0x428   :  { %v5076_v29 = vadd.f32 %v5058_v60, %v5057_v25  ;;  %v5072_v20 = vadd.f32 %v5071_v49, %v5055_v63  ;;  %v5232_v39 = vrot.slane %v5223_v46, %v9004_v54  ;;  %v5240_v2 = vrot.slane %v5223_v46, %v9020_v4 }
 0x429   :  { %5069 = vadd.xlane.f32.xlu1 %v5068_v58  ;;  %v9301_v32 = vrot.slane %v6113_v38, %v9001_v53  ;;  %v6122_v21 = vrot.slane %v6113_v38, %v9004_v54  ;;  %v6126_v5 = vrot.slane %v6113_v38, %v9017_v1  ;;  %v6130_v53 = vrot.slane %v6113_v38, %v9020_v4 }
 0x42a   :  { %v5073_v9 = vadd.f32 %v5072_v20, %v5056_v50  ;;  %v5077_v13 = vadd.f32 %v5076_v29, %v5059_v6 }
 0x42c   :  { %5074 = vadd.xlane.f32.xlu0 %v5073_v9  ;;  %v5078_v34 = vadd.f32 %v5077_v13, %v5060_v47 }
 0x42e   :  { %5079 = vadd.xlane.f32.xlu1 %v5078_v34 }
 0x498   :  { %v5972_v3 = vpop.f32.mrb[48].mxu0 }
 0x499   :  { %v7219_v8 = vadd.f32 %v5972_v3, %v5228_v56  ;;  %v6078_v11 = vpop.f32.mrb[48].mxu1  ;;  %v5974_v16 = vpop.f32.mrb[49].mxu0 }
 0x49a   :  { %v7227_v18 = vadd.f32 %v6078_v11, %v5236_v41  ;;  %v7220_v12 = vadd.f32 %v5974_v16, %v5232_v39  ;;  %v6080_v19 = vpop.f32.mrb[49].mxu1  ;;  %v5976_v26 = vpop.f32.mrb[50].mxu0 }
 0x49b   :  { %v6097_v30 = vmax.f32 %v7219_v8, 0.0  ;;  %v7228_v31 = vadd.f32 %v6080_v19, %v5240_v2  ;;  %v7221_v33 = vadd.f32 %v5976_v26, %v5228_v56  ;;  %v6082_v36 = vpop.f32.mrb[50].mxu1  ;;  %v5978_v37 = vpop.f32.mrb[51].mxu0 }
 0x49c   :  { %v6099_v22 = vmax.f32 %v7227_v18, 0.0  ;;  %v6098_v35 = vmax.f32 %v7220_v12, 0.0  ;;  %v7222_v42 = vadd.f32 %v5978_v37, %v5232_v39  ;;  %v6084_v14 = vpop.f32.mrb[51].mxu1  ;;  %v7229_v54 = vadd.f32 %v6082_v36, %v5236_v41 }
 0x49d   :  { %v6135_v43 = vmul.f32 %v9301_v32, %v6097_v30  ;;  %v6100_v44 = vmax.f32 %v7228_v31, 0.0  ;;  %v6101_v45 = vmax.f32 %v7221_v33, 0.0  ;;  %v7230_v1 = vadd.f32 %v6084_v14, %v5240_v2 }
 0x49e   :  { %v6136_v7 = vmul.f32 %v6122_v21, %v6098_v35  ;;  %v6102_v28 = vmax.f32 %v7222_v42, 0.0  ;;  %v6137_v52 = vmul.f32 %v6126_v5, %v6099_v22  ;;  %v6103_v62 = vmax.f32 %v7229_v54, 0.0 }
 0x49f   :  { %v6139_v24 = vmul.f32 %v9301_v32, %v6101_v45  ;;  %v6138_v23 = vmul.f32 %v6130_v53, %v6100_v44  ;;  %v6104_v60 = vmax.f32 %v7230_v1, 0.0  ;;  %v3985_v44 = vpop.xlane.xlu1 %3984 }
 0x4a0   :  { %v6151_v27 = vadd.f32 %v6136_v7, %v6135_v43  ;;  %v6140_v57 = vmul.f32 %v6122_v21, %v6102_v28  ;;  %v5982_v59 = vpop.f32.mrb[52].mxu0  ;;  %v6141_v8 = vmul.f32 %v6126_v5, %v6103_v62  ;;  %v5082_v7 = vstv %s7018_s17 }
 0x4a1   :  { %v7223_v15 = vadd.f32 %v5982_v59, %v5228_v56  ;;  %v6088_v4 = vpop.f32.mrb[52].mxu1  ;;  %v5984_v61 = vpop.f32.mrb[53].mxu0  ;;  %v6142_v12 = vmul.f32 %v6130_v53, %v6104_v60 }
 0x4a2   :  { %v6156_v55 = vadd.f32 %v6140_v57, %v6139_v24  ;;  %v7231_v17 = vadd.f32 %v6088_v4, %v5236_v41  ;;  %v7224_v63 = vadd.f32 %v5984_v61, %v5232_v39  ;;  %v6090_v25 = vpop.f32.mrb[53].mxu1  ;;  %v5986_v40 = vpop.f32.mrb[54].mxu0  ;;  %v6152_v49 = vadd.f32 %v6151_v27, %v6137_v52 }
 0x4a3   :  { %v6105_v0 = vmax.f32 %v7223_v15, 0.0  ;;  %v7232_v10 = vadd.f32 %v6090_v25, %v5240_v2  ;;  %v7225_v50 = vadd.f32 %v5986_v40, %v5228_v56  ;;  %v6092_v6 = vpop.f32.mrb[54].mxu1  ;;  %v5988_v29 = vpop.f32.mrb[55].mxu0 }
 0x4a4   :  { %v6107_v58 = vmax.f32 %v7231_v17, 0.0  ;;  %v6106_v20 = vmax.f32 %v7224_v63, 0.0  ;;  %v7233_v47 = vadd.f32 %v6092_v6, %v5236_v41  ;;  %v7226_v9 = vadd.f32 %v5988_v29, %v5232_v39  ;;  %v6094_v13 = vpop.f32.mrb[55].mxu1 }
 0x4a5   :  { %v6143_v34 = vmul.f32 %v9301_v32, %v6105_v0  ;;  %v6108_v46 = vmax.f32 %v7232_v10, 0.0  ;;  %v6109_v38 = vmax.f32 %v7225_v50, 0.0  ;;  %v7234_v3 = vadd.f32 %v6094_v13, %v5240_v2  ;;  %v3975_v2 = vpop.xlane.xlu0 %3974 }
 0x4a6   :  { %v6144_v11 = vmul.f32 %v6122_v21, %v6106_v20  ;;  %v6111_v16 = vmax.f32 %v7233_v47, 0.0  ;;  %v6110_v18 = vmax.f32 %v7226_v9, 0.0  ;;  %v6145_v19 = vmul.f32 %v6126_v5, %v6107_v58 }
 0x4a7   :  { %v6147_v56 = vmul.f32 %v9301_v32, %v6109_v38  ;;  %v6153_v26 = vadd.f32 %v6152_v49, %v6138_v23  ;;  %v6112_v33 = vmax.f32 %v7234_v3, 0.0  ;;  %v6157_v41 = vadd.f32 %v6156_v55, %v6141_v8 }
 0x4a8   :  { %v6161_v30 = vadd.f32 %v6144_v11, %v6143_v34  ;;  %v6148_v31 = vmul.f32 %v6122_v21, %v6110_v18  ;;  %v6146_v39 = vmul.f32 %v6130_v53, %v6108_v46  ;;  %v6149_v36 = vmul.f32 %v6126_v5, %v6111_v16  ;;  %v3990_v21 = vpop.xlane.xlu1 %3989 }
 0x4a9   :  { %6154 = vadd.xlane.f32.xlu0 %v6153_v26  ;;  %v6158_v22 = vadd.f32 %v6157_v41, %v6142_v12  ;;  %v6150_v42 = vmul.f32 %v6130_v53, %v6112_v33  ;;  %v3980_v32 = vpop.xlane.xlu0 %3979  ;;  %v3992_v5 = vstv %s3991_s24  ;;  %v8697_v29 = vmov 0.0|0.0  }
 0x4aa   :  { %v6166_v37 = vadd.f32 %v6148_v31, %v6147_v56  ;;  %v6162_v35 = vadd.f32 %v6161_v30, %v6145_v19  ;;  %v3994_v52 = vadd.f32 %v3992_v5, %v3980_v32  ;;  %v3993_v57 = vadd.f32 %v3992_v5, %v3975_v2  ;;  %7197 = vmatprep.subr.bf16.mxu1 %v8697_v29 }
 0x4ab   :  { %6159 = vadd.xlane.f32.xlu1 %v6158_v22  ;;  %v3995_v23 = vadd.f32 %v3992_v5, %v3985_v44  ;;  %v3996_v62 = vadd.f32 %v3992_v5, %v3990_v21  ;;  %7191 = vmatprep.subr.bf16.mxu0 %v8697_v29  ;;  %v8699_v58 = vmov 0.0   ;;  %v6172_v9 = vstv %s7147_s3 }
 0x4ac   :  { %v6163_v14 = vadd.f32 %v6162_v35, %v6146_v39  ;;  %v6167_v43 = vadd.f32 %v6166_v37, %v6149_v36  ;;  %7188 = vmatprep.mubr.msk.f32.mxu1 %vm8698_vm0, %v8699_v58  ;;  %7177 = vmatprep.mubr.msk.f32.mxu0 %vm8698_vm0, %v8699_v58 }
 0x4ae   :  { %6164 = vadd.xlane.f32.xlu0 %v6163_v14  ;;  %v6168_v45 = vadd.f32 %v6167_v43, %v6150_v42 }
 0x4b0   :  { %6169 = vadd.xlane.f32.xlu1 %v6168_v45 }
 0x4b4   :  { %v5065_v54 = vpop.xlane.xlu0 %5064 }
 0x4b5   :  { %v5083_v27 = vadd.f32 %v5082_v7, %v5065_v54 }
 0x4b6   :  { %v5070_v28 = vpop.xlane.xlu1 %5069 }
 0x4b7   :  { %v5084_v24 = vadd.f32 %v5082_v7, %v5070_v28  ;;  %v6177_v61 = vmul.f32 %v5083_v27, %v3993_v57 }
 0x4b9   :  { %v5075_v1 = vpop.xlane.xlu0 %5074  ;;  %v6178_v15 = vmul.f32 %v5084_v24, %v3994_v52 }
 0x4ba   :  { %v5085_v53 = vadd.f32 %v5082_v7, %v5075_v1 }
 0x4bb   :  { %v5080_v59 = vpop.xlane.xlu1 %5079  ;;  %v6181_v63 = vmax.f32 %v6177_v61, %v6178_v15 }
 0x4bc   :  { %v5086_v4 = vadd.f32 %v5082_v7, %v5080_v59  ;;  %v6179_v55 = vmul.f32 %v5085_v53, %v3995_v23  ;;  %v6248_v23 = vmul.u32 8, %v8995_v51 }
 0x4be   :  { %v6180_v17 = vmul.f32 %v5086_v4, %v3996_v62  ;;  %v6250_v4 = vadd.s32 8, %v6248_v23 }
 0x4c0   :  { %v6182_v25 = vmax.f32 %v6179_v55, %v6180_v17 }
 0x4c2   :  { %v6183_v40 = vmax.f32 %v6181_v63, %v6182_v25 }
 0x4c4   :  { %v6184_v49 = vrot.slane %v6183_v40, 4 }
 0x4c6   :  { %v6185_v60 = vmax.f32 %v6183_v40, %v6184_v49 }
 0x4c8   :  { %v6186_v0 = vrot.slane %v6185_v60, 2 }
 0x4ca   :  { %v6187_v10 = vmax.f32 %v6185_v60, %v6186_v0 }
 0x4cc   :  { %v6188_v50 = vrot.slane %v6187_v10, 1 }
 0x4ce   :  { %v6189_v6 = vmax.f32 %v6187_v10, %v6188_v50 }
 0x4d0   :  { %7315 = vpush %v6189_v6 }
 0x501   :  { %s7316_s26 = spop %7315 }
 0x502   :  { %v6191_v56 = vstv %s7316_s26 }
 0x503   :  { %8394 = vrcp.f32 %v6191_v56 }
 0x50d   :  { %v8395_v41 = vpop.eup %8394 }
 0x50e   :  { %v6193_v39 = vmul.f32 %v8395_v41, %v6177_v61  ;;  %v6194_v36 = vmul.f32 %v8395_v41, %v6178_v15  ;;  %v6195_v37 = vmul.f32 %v8395_v41, %v6179_v55  ;;  %v6196_v22 = vmul.f32 %v8395_v41, %v6180_v17 }
 0x50f   :  { %v6247_v15 = vand.u32 127, %v305_v48 }
 0x510   :  { %v6197_v35 = vmul.f32 12.0, %v6193_v39  ;;  %v6198_v2 = vmul.f32 12.0, %v6194_v36  ;;  %v6199_v42 = vmul.f32 12.0, %v6195_v37  ;;  %v6200_v14 = vmul.f32 12.0, %v6196_v22 }
 0x511   :  { %vm6249_vm1 = vcmp.ge.s32.totalorder %v6247_v15, %v6248_v23  ;;  %vm6251_vm2 = vcmp.lt.s32.totalorder %v6247_v15, %v6250_v4 }
 0x512   :  { %v7148_v43 = vadd.f32 -6.0, %v6197_v35  ;;  %v7149_v44 = vadd.f32 -6.0, %v6198_v2  ;;  %v7150_v45 = vadd.f32 -6.0, %v6199_v42  ;;  %v7151_v32 = vadd.f32 -6.0, %v6200_v14  ;;  %vm6252_vm3 = vmand %vm6249_vm1, %vm6251_vm2 }
 0x514   :  { %v7152_v21 = vmul.f32 -1.442695, %v7148_v43  ;;  %v7153_v54 = vmul.f32 -1.442695, %v7149_v44  ;;  %v7154_v7 = vmul.f32 -1.442695, %v7150_v45 }
 0x515   :  { %v7155_v28 = vmul.f32 -1.442695, %v7151_v32 }
 0x516   :  { %8396 = vpow2.f32 %v7152_v21 }
 0x517   :  { %8398 = vpow2.f32 %v7153_v54 }
 0x518   :  { %8400 = vpow2.f32 %v7154_v7 }
 0x519   :  { %8402 = vpow2.f32 %v7155_v28 }
 0x520   :  { %v8397_v5 = vpop.eup %8396 }
 0x521   :  { %v8399_v24 = vpop.eup %8398  ;;  %v6217_v27 = vadd.f32 1.0, %v8397_v5 }
 0x522   :  { %v8401_v1 = vpop.eup %8400  ;;  %v6218_v53 = vadd.f32 1.0, %v8399_v24 }
 0x523   :  { %v8403_v52 = vpop.eup %8402  ;;  %v6219_v57 = vadd.f32 1.0, %v8401_v1  ;;  %8404 = vrcp.f32 %v6217_v27 }
 0x524   :  { %v6220_v59 = vadd.f32 1.0, %v8403_v52  ;;  %8406 = vrcp.f32 %v6218_v53 }
 0x525   :  { %8408 = vrcp.f32 %v6219_v57 }
 0x526   :  { %8410 = vrcp.f32 %v6220_v59 }
 0x52d   :  { %v8405_v61 = vpop.eup %8404 }
 0x52e   :  { %v8407_v40 = vpop.eup %8406 }
 0x52f   :  { %v8409_v49 = vpop.eup %8408 }
 0x530   :  { %v8411_v10 = vpop.eup %8410 }
 0x536   :  { %v6155_v20 = vpop.xlane.xlu0 %6154 }
 0x537   :  { %v6173_v38 = vadd.f32 %v6172_v9, %v6155_v20 }
 0x538   :  { %v6160_v47 = vpop.xlane.xlu1 %6159 }
 0x539   :  { %v6174_v34 = vadd.f32 %v6172_v9, %v6160_v47 }
 0x53b   :  { %v6165_v13 = vpop.xlane.xlu0 %6164  ;;  %v6229_v11 = vmin.f32 %v6173_v38, %v6174_v34 }
 0x53c   :  { %v6175_v3 = vadd.f32 %v6172_v9, %v6165_v13 }
 0x53d   :  { %v6170_v46 = vpop.xlane.xlu1 %6169 }
 0x53e   :  { %v6176_v8 = vadd.f32 %v6172_v9, %v6170_v46  ;;  %v7156_v9 = vsel %vm6252_vm3, 1.0, %v8699_v58 }
 0x540   :  { %v6230_v16 = vmin.f32 %v6175_v3, %v6176_v8 }
 0x542   :  { %v6231_v18 = vmin.f32 %v6229_v11, %v6230_v16 }
 0x544   :  { %v6232_v12 = vrot.slane %v6231_v18, 4 }
 0x546   :  { %v6233_v19 = vmin.f32 %v6231_v18, %v6232_v12 }
 0x548   :  { %v6234_v26 = vrot.slane %v6233_v19, 2 }
 0x54a   :  { %v6235_v30 = vmin.f32 %v6233_v19, %v6234_v26 }
 0x54c   :  { %v6236_v31 = vrot.slane %v6235_v30, 1 }
 0x54e   :  { %v6237_v33 = vmin.f32 %v6235_v30, %v6236_v31 }
 0x550   :  { %7317 = vpush %v6237_v33 }
 0x581   :  { %s7318_s13 = spop %7317 }
 0x582   :  { %v6239_v62 = vstv %s7318_s13 }
 0x583   :  { %v6240_v55 = vsub.f32 %v6173_v38, %v6239_v62  ;;  %v6241_v17 = vsub.f32 %v6174_v34, %v6239_v62  ;;  %v6242_v63 = vsub.f32 %v6175_v3, %v6239_v62  ;;  %v6243_v25 = vsub.f32 %v6176_v8, %v6239_v62 }
 0x585   :  { %v6255_v60 = vmul.f32 %v8405_v61, %v6240_v55  ;;  %v6256_v0 = vmul.f32 %v8407_v40, %v6241_v17  ;;  %v7198_v50 = vpack.c.bf16 %v6241_v17, %v6240_v55  ;;  %v6257_v6 = vmul.f32 %v8409_v49, %v6242_v63 }
 0x586   :  { %v6258_v51 = vmul.f32 %v8411_v10, %v6243_v25  ;;  %v7201_v48 = vpack.c.bf16 %v6243_v25, %v6242_v63 }
 0x587   :  { %v7192_v20 = vpack.c.bf16 %v6256_v0, %v6255_v60  ;;  %7199 = vmatpush3.bf16.msra.mxu1 %v7198_v50 }
 0x588   :  { %7200 = vmatprep.subr.bf16.mxu1 %v8697_v29  ;;  %v7195_v47 = vpack.c.bf16 %v6258_v51, %v6257_v6 }
 0x589   :  { %7193 = vmatpush3.bf16.msra.mxu0 %v7192_v20 }
 0x58a   :  { %7194 = vmatprep.subr.bf16.mxu0 %v8697_v29 }
 0x58b   :  { %7202 = vmatpush3.bf16.msra.mxu1 %v7201_v48 }
 0x58d   :  { %7196 = vmatpush3.bf16.msra.mxu0 %v7195_v47 }
 0x58e   :  { %7189 = vmatmul.mubr.msk.f32.vlgmr.msra.gmra.mrb[56].mxu1 %vm6259_vm4, %v7156_v9 }
 0x590   :  { %7178 = vmatmul.mubr.msk.f32.vlgmr.msra.gmra.mrb[56].mxu0 %vm6259_vm4, %v7156_v9 }
 0x661   :  { %v6399_v13 = vpop.f32.mrb[56].mxu1 }
 0x662   :  { %v6400_v34 = vadd.f32 1e-10, %v6399_v13  ;;  %v7190_v46 = vpop.f32.mrb[57].mxu1 }
 0x663   :  { %v6329_v38 = vpop.f32.mrb[56].mxu0 }
 0x664   :  { %v7179_v3 = vpop.f32.mrb[57].mxu0  ;;  %8412 = vrcp.f32 %v6400_v34 }
 0x66e   :  { %v8413_v8 = vpop.eup %8412 }
 0x66f   :  { %v6404_v11 = vmul.f32 %v8413_v8, %v6329_v38 }
 0x671   :  { %v6406_v16 = vsel %vm6405_vm5, %v6404_v11, 0.0 }
 0x672   :  { %6407 = vadd.xlane.f32.xlu0 %v6406_v16 }
 0x6ff   :  { %v6408_v29 = vpop.xlane.xlu0 %6407 }
 0x700   :  { %v6409_v18 = vrot.slane %v6408_v29, 4 }
 0x702   :  { %v6410_v12 = vadd.f32 %v6409_v18, %v6408_v29 }
 0x704   :  { %v6411_v19 = vrot.slane %v6410_v12, 2 }
 0x706   :  { %v6412_v58 = vadd.f32 %v6411_v19, %v6410_v12 }
 0x708   :  { %v6413_v56 = vrot.slane %v6412_v58, 1 }
 0x70a   :  { %v6414_v26 = vadd.f32 %v6413_v56, %v6412_v58 }
 0x70c   :  { %7319 = vpush %v6414_v26 }
 0x73d   :  { %s7320_s2 = spop %7319 }
 0x73e   :  { %v6416_v30 = vstv %s7320_s2 }
 0x73f   :  { %v6418_v31 = vmul.f32 0.25, %v6416_v30 }
 0x741   :  { %6420 = vst.msk [vmem:[#allocation21] sm:$0x1] %vm6419_vm6, %v6418_v31 }
 0x742   :  { %8657 = shalt.err (!%p8654_p5)
}
 0x743   :  { %s9370_s19 = sld [smem:[#allocation36_spill]] }
 0x749   :  { %s8658_s0 = scalar_lea.hbm %s9370_s19, 16 }
 0x74a   :  { %p8659_p6 = scmp.ne.s32.totalorder %s9370_s19, %s8658_s0  ;;  %p8662_p7 = scmp.lt.u32.totalorder %s8658_s0, %s9370_s19 }
 0x74c   :  { %p8664_p8 = pnand %p8662_p7, %p8659_p6 }
 0x74e   :  { %8667 = shalt.err (!%p8664_p8)
}
 0x74f   :  { %6430 = dma.vmem_to_hbm [thread:$0]  %s6428_s29, 16, %s9370_s19, [#allocation4]  }
 0x750   :  { %8682 = dma.done.wait [#allocation4], 16  }
 0x751   :  { %8683 = vsyncadd [#allocation4], 4294967280 }
 0x752   :  { %6434 = vsyncpa [#allocation3], 1 }
 0x753   :  { %6435 = vsyncpa [#allocation7], 1 }
 0x754   :  { %6436 = vsyncpa [#allocation10], 1 }
 0x755   :  { %6437 = vsyncpa [#allocation13], 1 }
 0x756   :  { %6438 = vsyncpa [#allocation16], 1 }
 0x757   :  { %6439 = vsyncpa [#allocation19], 1 }
 0x758   :  { %6440 = vsyncpa [#allocation4], 1 }
 0x759   :  { %6441 = vsyncpa [#allocation5], 1 }

</bundles_post_ra>
